<compile_context>
chip_gen: v6e
topology: v6e:2x2x1
jax: 0.10.0
libtpu: 0.0.40
codegen_flags: <defaults>
</compile_context>

<pallas_src>
import functools

import jax
import jax.numpy as jnp
from jax.experimental import pallas as pl
from jax.experimental.pallas import tpu as pltpu

NEG_SLOPE = 0.2  # LeakyReLU slope used by the DGCNN-style conv blocks


def _leaky(v):
    # leaky_relu with slope 0.2:  max(v, 0.2*v)   (f32 VPU work)
    return jnp.maximum(v, NEG_SLOPE * v)


def _edge_block(feat, wd, wcd, b1, wb, bb, *, k, n):
    """One DGCNN edge-conv block, fused over the k neighbors.

    feat: (N, C) f32 per-point features.
    wd  : (C, L1)  first-layer weight applied to the neighbor feature x_j
    wcd : (C, L1)  first-layer weight applied to the center feature  (= Wc - Wd)
    b1  : (1, L1)
    wb  : (L1, L2), bb: (1, L2)  second 1x1-conv layer.
    Returns (N, L2) f32 = max over the k nearest neighbors of the 2-layer MLP.
    """
    f32 = jnp.float32

    # ---- kNN scores, kept in f32 so neighbor selection matches the reference.
    sq = jnp.sum(feat * feat, axis=-1, keepdims=True)                       # (N, 1)
    gram = jax.lax.dot_general(feat, feat, (((1,), (1,)), ((), ())),
                               preferred_element_type=f32)                  # (N, N)
    scores = 2.0 * gram - sq - jnp.transpose(sq)                            # = -dist^2
    cols = jax.lax.broadcasted_iota(jnp.int32, (n, n), 1)

    # ---- per-point projections, computed ONCE per block (center term folded).
    featb = feat.astype(jnp.bfloat16)
    proj = jnp.dot(featb, wd.astype(jnp.bfloat16),
                   preferred_element_type=f32)                              # (N, L1)
    center = jnp.dot(featb, wcd.astype(jnp.bfloat16),
                     preferred_element_type=f32) + b1                       # (N, L1)
    projb = proj.astype(jnp.bfloat16)
    wbb = wb.astype(jnp.bfloat16)

    l_out = wb.shape[-1]
    acc = jnp.full((n, l_out), -jnp.inf, f32)
    remaining = scores
    # k is a small static int -> unrolled; nothing (N*k, .) is ever stacked.
    for _ in range(k):
        m = jnp.max(remaining, axis=-1, keepdims=True)
        ismax = remaining >= m
        first = jnp.min(jnp.where(ismax, cols, n), axis=-1, keepdims=True)
        oh = cols == first                                                  # (N, N)
        gathered = jnp.dot(oh.astype(jnp.bfloat16), projb,
                           preferred_element_type=f32)                      # (N, L1)
        h = _leaky(gathered + center)
        h2 = _leaky(jnp.dot(h.astype(jnp.bfloat16), wbb,
                            preferred_element_type=f32) + bb)               # (N, L2)
        acc = jnp.maximum(acc, h2)                                          # running max
        remaining = jnp.where(oh, jnp.float32(-1e30), remaining)
    return acc


def _dgcnn_kernel(x_ref,
                  w1d_ref, w1c_ref, b1a_ref, w1b_ref, b1b_ref,
                  w2d_ref, w2c_ref, b2a_ref, w2b_ref, b2b_ref,
                  w3a_ref, b3a_ref, w3b_ref, b3b_ref,
                  o_ref, *, k, n):
    # Input arrives in the PyTorch (C_in, N) layout (lane-dense over N); the tiny
    # tile is transposed in-kernel (XLU) instead of paying an extra XLA HBM pass.
    x = jnp.transpose(x_ref[0].astype(jnp.float32))                         # (N, C_in)

    # block 1: graph feature -> conv1 (2 layers) -> max over k neighbors
    x1 = _edge_block(x, w1d_ref[...], w1c_ref[...], b1a_ref[...],
                     w1b_ref[...], b1b_ref[...], k=k, n=n)                  # (N, L1_2)
    # block 2: graph feature on x1 -> conv2 -> max over k
    x2 = _edge_block(x1, w2d_ref[...], w2c_ref[...], b2a_ref[...],
                     w2b_ref[...], b2b_ref[...], k=k, n=n)                  # (N, emb_out)

    # block 3: channel concat -> conv3 (1x1 conv1d MLP, 2 layers)
    x3 = jnp.concatenate([x1, x2], axis=-1)                                 # (N, L3_0)
    h = _leaky(jnp.dot(x3.astype(jnp.bfloat16), w3a_ref[...].astype(jnp.bfloat16),
                       preferred_element_type=jnp.float32) + b3a_ref[...])
    out = _leaky(jnp.dot(h.astype(jnp.bfloat16), w3b_ref[...].astype(jnp.bfloat16),
                         preferred_element_type=jnp.float32) + b3b_ref[...])

    # store lane-dense over N: (emb_out, N)
    o_ref[0] = jnp.transpose(out).astype(o_ref.dtype)


def _vmem_limit_bytes():
    # Generation-aware scoped-VMEM budget: ~3/4 of physical, capped at 100 MiB
    # (v5e/v6e: 128 MiB physical -> 96 MiB; v7x: 64 MiB physical -> 48 MiB).
    try:
        phys = pltpu.get_tpu_info().vmem_capacity_bytes
        return int(min(phys * 3 // 4, 100 * 1024 * 1024))
    except Exception:
        return 48 * 1024 * 1024


def dgcnn_encoder(x, params, *, n_near):
    """x: (B, C_in, N) in the PyTorch layout.  Returns (B, emb_out, N)."""
    b_sz, c_in, n = x.shape
    (w1a, b1a, w1b, b1b,
     w2a, b2a, w2b, b2b,
     w3a, b3a, w3b, b3b) = params
    emb_out = w3b.shape[-1]
    l1_2 = w1b.shape[-1]

    # Split the first edge-conv layer of blocks 1/2 into the neighbor part Wd and
    # the algebraically-folded center part (Wc - Wd).
    w1d, w1cd = w1a[:c_in], w1a[c_in:] - w1a[:c_in]
    w2d, w2cd = w2a[:l1_2], w2a[l1_2:] - w2a[:l1_2]
    kparams = [w1d, w1cd, b1a, w1b, b1b,
               w2d, w2cd, b2a, w2b, b2b,
               w3a, b3a, w3b, b3b]

    # Advisory cost estimate (helps XLA schedule around the custom call).
    k = n_near
    l1_1, l2_1, l2_2 = w1a.shape[1], w2a.shape[1], w2b.shape[1]
    l3_0, l3_1, l3_2 = w3a.shape[0], w3a.shape[1], w3b.shape[1]

    def _block_flops(c, la, lb):
        return (2 * n * n * c            # gram
                + 4 * n * c * la         # proj + center
                + k * (2 * n * n * la    # one-hot gather per neighbor
                       + 2 * n * la * lb))  # layer-2 per neighbor

    flops = b_sz * (_block_flops(c_in, l1_1, l1_2)
                    + _block_flops(l1_2, l2_1, l2_2)
                    + 2 * n * l3_0 * l3_1 + 2 * n * l3_1 * l3_2)
    bytes_accessed = 4 * (int(x.size) + sum(int(p.size) for p in kparams)
                          + b_sz * emb_out * n)

    kernel = functools.partial(_dgcnn_kernel, k=k, n=n)
    param_specs = [pl.BlockSpec(p.shape, lambda b: (0, 0)) for p in kparams]

    out = pl.pallas_call(
        kernel,
        out_shape=jax.ShapeDtypeStruct((b_sz, emb_out, n), jnp.float32),
        grid=(b_sz,),
        in_specs=[pl.BlockSpec((1, c_in, n), lambda b: (b, 0, 0))] + param_specs,
        out_specs=pl.BlockSpec((1, emb_out, n), lambda b: (b, 0, 0)),
        compiler_params=pltpu.CompilerParams(
            dimension_semantics=("parallel",),   # batch is fully independent
            vmem_limit_bytes=_vmem_limit_bytes()),
        cost_estimate=pl.CostEstimate(flops=int(flops), transcendentals=0,
                                      bytes_accessed=int(bytes_accessed)),
    )(x.astype(jnp.float32), *kparams)
    return out                                                              # (B, emb_out, N)


def _fold_bn(w, b, gamma, beta, mean, var, eps=1e-5):
    scale = gamma / jnp.sqrt(var + eps)
    w_f = w * scale[None, :]
    b_f = (b - mean) * scale + beta
    return w_f, b_f[None, :]


def init_params(key, emb_in, emb_out):
    """Deterministic synthetic parameters, with eval-mode BN folded in.
    Weights are stored as (C_in, C_out) so the kernel computes h @ W + b."""
    emb_inc = (emb_out / (4 * emb_in)) ** 0.25
    l1_0 = emb_in * 2
    l1_1 = int(l1_0 * emb_inc)
    l1_2 = int(l1_0 * emb_inc ** 2)
    l2_0 = l1_2 * 2
    l2_1 = int(l2_0 * emb_inc)
    l2_2 = emb_out
    l3_0 = l2_2 + l1_2
    l3_1 = int((emb_out / l3_0) ** 0.5 * l3_0)
    l3_2 = emb_out

    dims = [(l1_0, l1_1), (l1_1, l1_2),
            (l2_0, l2_1), (l2_1, l2_2),
            (l3_0, l3_1), (l3_1, l3_2)]
    params = []
    for i, (cin, cout) in enumerate(dims):
        kw, kb, kg, kbt = jax.random.split(jax.random.fold_in(key, i), 4)
        w = 0.1 * jax.random.normal(kw, (cin, cout), jnp.float32)
        b = 0.05 * jax.random.normal(kb, (cout,), jnp.float32)
        gamma = 1.0 + 0.1 * jax.random.normal(kg, (cout,), jnp.float32)
        beta = 0.05 * jax.random.normal(kbt, (cout,), jnp.float32)
        mean = jnp.zeros((cout,), jnp.float32)   # BN running stats (eval mode)
        var = jnp.ones((cout,), jnp.float32)
        w_f, b_f = _fold_bn(w, b, gamma, beta, mean, var)
        params += [w_f, b_f]
    return params


if __name__ == "__main__":
    key = jax.random.PRNGKey(0)
    emb_in, emb_out, n_near = 4, 32, 10
    B, N = 2, 16

    kx, kp = jax.random.split(key)
    x = jax.random.normal(kx, (B, emb_in, N), jnp.float32)   # PyTorch (B, C, N)
    params = init_params(kp, emb_in, emb_out)

    y = dgcnn_encoder(x, params, n_near=n_near)
    y = jax.block_until_ready(y)
    assert y.shape == (B, emb_out, N), y.shape
    assert bool(jnp.all(jnp.isfinite(y)))
    print("KERNEL_OK")
</pallas_src>

<mosaic_0001>
module attributes {stable_mosaic.version = 11 : i64} {
  func.func @_dgcnn_kernel(%arg0: i32, %arg1: memref<1x4x16xf32, #tpu.memory_space<vmem>>, %arg2: memref<4x9xf32, #tpu.memory_space<vmem>>, %arg3: memref<4x9xf32, #tpu.memory_space<vmem>>, %arg4: memref<1x9xf32, #tpu.memory_space<vmem>>, %arg5: memref<9x11xf32, #tpu.memory_space<vmem>>, %arg6: memref<1x11xf32, #tpu.memory_space<vmem>>, %arg7: memref<11x26xf32, #tpu.memory_space<vmem>>, %arg8: memref<11x26xf32, #tpu.memory_space<vmem>>, %arg9: memref<1x26xf32, #tpu.memory_space<vmem>>, %arg10: memref<26x32xf32, #tpu.memory_space<vmem>>, %arg11: memref<1x32xf32, #tpu.memory_space<vmem>>, %arg12: memref<43x37xf32, #tpu.memory_space<vmem>>, %arg13: memref<1x37xf32, #tpu.memory_space<vmem>>, %arg14: memref<37x32xf32, #tpu.memory_space<vmem>>, %arg15: memref<1x32xf32, #tpu.memory_space<vmem>>, %arg16: memref<1x32x16xf32, #tpu.memory_space<vmem>>) attributes {dimension_semantics = [#tpu.dimension_semantics<parallel>], iteration_bounds = array<i64: 2>, scalar_prefetch = 0 : i64, scratch_operands = 0 : i64, tpu.core_type = #tpu.core_type<tc>, window_params = [{transform_indices = @transform_0, window_bounds = array<i64: 1, 4, 16>}, {pipeline_mode = #tpu.pipeline_mode<synchronous>, transform_indices = @transform_1, window_bounds = array<i64: 4, 9>}, {pipeline_mode = #tpu.pipeline_mode<synchronous>, transform_indices = @transform_2, window_bounds = array<i64: 4, 9>}, {pipeline_mode = #tpu.pipeline_mode<synchronous>, transform_indices = @transform_3, window_bounds = array<i64: 1, 9>}, {pipeline_mode = #tpu.pipeline_mode<synchronous>, transform_indices = @transform_4, window_bounds = array<i64: 9, 11>}, {pipeline_mode = #tpu.pipeline_mode<synchronous>, transform_indices = @transform_5, window_bounds = array<i64: 1, 11>}, {pipeline_mode = #tpu.pipeline_mode<synchronous>, transform_indices = @transform_6, window_bounds = array<i64: 11, 26>}, {pipeline_mode = #tpu.pipeline_mode<synchronous>, transform_indices = @transform_7, window_bounds = array<i64: 11, 26>}, {pipeline_mode = #tpu.pipeline_mode<synchronous>, transform_indices = @transform_8, window_bounds = array<i64: 1, 26>}, {pipeline_mode = #tpu.pipeline_mode<synchronous>, transform_indices = @transform_9, window_bounds = array<i64: 26, 32>}, {pipeline_mode = #tpu.pipeline_mode<synchronous>, transform_indices = @transform_10, window_bounds = array<i64: 1, 32>}, {pipeline_mode = #tpu.pipeline_mode<synchronous>, transform_indices = @transform_11, window_bounds = array<i64: 43, 37>}, {pipeline_mode = #tpu.pipeline_mode<synchronous>, transform_indices = @transform_12, window_bounds = array<i64: 1, 37>}, {pipeline_mode = #tpu.pipeline_mode<synchronous>, transform_indices = @transform_13, window_bounds = array<i64: 37, 32>}, {pipeline_mode = #tpu.pipeline_mode<synchronous>, transform_indices = @transform_14, window_bounds = array<i64: 1, 32>}, {transform_indices = @transform_15, window_bounds = array<i64: 1, 32, 16>}]} {
    %c0 = arith.constant 0 : index
    %c0_0 = arith.constant 0 : index
    %c0_1 = arith.constant 0 : index
    %0 = vector.load %arg1[%c0, %c0_0, %c0_1] : memref<1x4x16xf32, #tpu.memory_space<vmem>>, vector<1x4x16xf32>
    %1 = vector.shape_cast %0 : vector<1x4x16xf32> to vector<4x16xf32>
    %2 = tpu.transpose %1, [1, 0] : vector<4x16xf32> -> vector<16x4xf32>
    %c0_2 = arith.constant 0 : index
    %c0_3 = arith.constant 0 : index
    %3 = vector.load %arg2[%c0_2, %c0_3] : memref<4x9xf32, #tpu.memory_space<vmem>>, vector<4x9xf32>
    %c0_4 = arith.constant 0 : index
    %c0_5 = arith.constant 0 : index
    %4 = vector.load %arg3[%c0_4, %c0_5] : memref<4x9xf32, #tpu.memory_space<vmem>>, vector<4x9xf32>
    %c0_6 = arith.constant 0 : index
    %c0_7 = arith.constant 0 : index
    %5 = vector.load %arg4[%c0_6, %c0_7] : memref<1x9xf32, #tpu.memory_space<vmem>>, vector<1x9xf32>
    %c0_8 = arith.constant 0 : index
    %c0_9 = arith.constant 0 : index
    %6 = vector.load %arg5[%c0_8, %c0_9] : memref<9x11xf32, #tpu.memory_space<vmem>>, vector<9x11xf32>
    %c0_10 = arith.constant 0 : index
    %c0_11 = arith.constant 0 : index
    %7 = vector.load %arg6[%c0_10, %c0_11] : memref<1x11xf32, #tpu.memory_space<vmem>>, vector<1x11xf32>
    %8 = arith.mulf %2, %2 : vector<16x4xf32>
    %cst = arith.constant dense<0.000000e+00> : vector<16xf32>
    %9 = vector.multi_reduction <add>, %8, %cst [1] : vector<16x4xf32> to vector<16xf32>
    %10 = vector.shape_cast %9 : vector<16xf32> to vector<16x1xf32>
    %cst_12 = arith.constant dense<0.000000e+00> : vector<16x16xf32>
    %11 = tpu.matmul %2, %2, %cst_12 {dimension_numbers = #tpu.dot_dimension_numbers<[1], [1], [0], [0], [0, 0, 1, 0], [], []>} : vector<16x4xf32>, vector<16x4xf32>, vector<16x16xf32> -> vector<16x16xf32>
    %cst_13 = arith.constant 2.000000e+00 : f32
    %12 = vector.broadcast %cst_13 : f32 to vector<16x16xf32>
    %13 = arith.mulf %12, %11 : vector<16x16xf32>
    %14 = vector.broadcast %10 : vector<16x1xf32> to vector<16x16xf32>
    %15 = arith.subf %13, %14 : vector<16x16xf32>
    %16 = tpu.transpose %10, [1, 0] : vector<16x1xf32> -> vector<1x16xf32>
    %17 = vector.broadcast %16 : vector<1x16xf32> to vector<16x16xf32>
    %18 = arith.subf %15, %17 : vector<16x16xf32>
    %19 = tpu.iota {dimensions = array<i32: 1>} : vector<16x16xi32>
    %20 = arith.truncf %2 : vector<16x4xf32> to vector<16x4xbf16>
    %21 = arith.truncf %3 : vector<4x9xf32> to vector<4x9xbf16>
    %cst_14 = arith.constant dense<0.000000e+00> : vector<16x9xf32>
    %22 = tpu.matmul %20, %21, %cst_14 {dimension_numbers = #tpu.dot_dimension_numbers<[1], [0], [0], [1], [0, 0, 1, 1], [], []>} : vector<16x4xbf16>, vector<4x9xbf16>, vector<16x9xf32> -> vector<16x9xf32>
    %23 = arith.truncf %4 : vector<4x9xf32> to vector<4x9xbf16>
    %cst_15 = arith.constant dense<0.000000e+00> : vector<16x9xf32>
    %24 = tpu.matmul %20, %23, %cst_15 {dimension_numbers = #tpu.dot_dimension_numbers<[1], [0], [0], [1], [0, 0, 1, 1], [], []>} : vector<16x4xbf16>, vector<4x9xbf16>, vector<16x9xf32> -> vector<16x9xf32>
    %25 = vector.broadcast %5 : vector<1x9xf32> to vector<16x9xf32>
    %26 = arith.addf %24, %25 : vector<16x9xf32>
    %27 = arith.truncf %22 : vector<16x9xf32> to vector<16x9xbf16>
    %28 = arith.truncf %6 : vector<9x11xf32> to vector<9x11xbf16>
    %cst_16 = arith.constant 0xFF800000 : f32
    %29 = vector.broadcast %cst_16 : f32 to vector<16x11xf32>
    %cst_17 = arith.constant dense<0xFF800000> : vector<16xf32>
    %30 = vector.multi_reduction <maximumf>, %18, %cst_17 [1] : vector<16x16xf32> to vector<16xf32>
    %31 = vector.shape_cast %30 : vector<16xf32> to vector<16x1xf32>
    %32 = vector.broadcast %31 : vector<16x1xf32> to vector<16x16xf32>
    %33 = arith.cmpf oge, %18, %32 : vector<16x16xf32>
    %c16_i32 = arith.constant 16 : i32
    %34 = vector.broadcast %c16_i32 : i32 to vector<16x16xi32>
    %35 = arith.select %33, %19, %34 : vector<16x16xi1>, vector<16x16xi32>
    %cst_18 = arith.constant dense<2147483647> : vector<16xi32>
    %36 = vector.multi_reduction <minsi>, %35, %cst_18 [1] : vector<16x16xi32> to vector<16xi32>
    %37 = vector.shape_cast %36 : vector<16xi32> to vector<16x1xi32>
    %38 = vector.broadcast %37 : vector<16x1xi32> to vector<16x16xi32>
    %39 = arith.cmpi eq, %19, %38 : vector<16x16xi32>
    %40 = arith.extui %39 : vector<16x16xi1> to vector<16x16xi32>
    %41 = arith.sitofp %40 : vector<16x16xi32> to vector<16x16xf32>
    %42 = arith.truncf %41 : vector<16x16xf32> to vector<16x16xbf16>
    %cst_19 = arith.constant dense<0.000000e+00> : vector<16x9xf32>
    %43 = tpu.matmul %42, %27, %cst_19 {dimension_numbers = #tpu.dot_dimension_numbers<[1], [0], [0], [1], [0, 0, 1, 1], [], []>} : vector<16x16xbf16>, vector<16x9xbf16>, vector<16x9xf32> -> vector<16x9xf32>
    %44 = arith.addf %43, %26 : vector<16x9xf32>
    %cst_20 = arith.constant 2.000000e-01 : f32
    %45 = vector.broadcast %cst_20 : f32 to vector<16x9xf32>
    %46 = arith.mulf %45, %44 : vector<16x9xf32>
    %47 = arith.maximumf %44, %46 : vector<16x9xf32>
    %48 = arith.truncf %47 : vector<16x9xf32> to vector<16x9xbf16>
    %cst_21 = arith.constant dense<0.000000e+00> : vector<16x11xf32>
    %49 = tpu.matmul %48, %28, %cst_21 {dimension_numbers = #tpu.dot_dimension_numbers<[1], [0], [0], [1], [0, 0, 1, 1], [], []>} : vector<16x9xbf16>, vector<9x11xbf16>, vector<16x11xf32> -> vector<16x11xf32>
    %50 = vector.broadcast %7 : vector<1x11xf32> to vector<16x11xf32>
    %51 = arith.addf %49, %50 : vector<16x11xf32>
    %cst_22 = arith.constant 2.000000e-01 : f32
    %52 = vector.broadcast %cst_22 : f32 to vector<16x11xf32>
    %53 = arith.mulf %52, %51 : vector<16x11xf32>
    %54 = arith.maximumf %51, %53 : vector<16x11xf32>
    %55 = arith.maximumf %29, %54 : vector<16x11xf32>
    %cst_23 = arith.constant -1.000000e+30 : f32
    %56 = vector.broadcast %cst_23 : f32 to vector<16x16xf32>
    %57 = arith.select %39, %56, %18 : vector<16x16xi1>, vector<16x16xf32>
    %cst_24 = arith.constant dense<0xFF800000> : vector<16xf32>
    %58 = vector.multi_reduction <maximumf>, %57, %cst_24 [1] : vector<16x16xf32> to vector<16xf32>
    %59 = vector.shape_cast %58 : vector<16xf32> to vector<16x1xf32>
    %60 = vector.broadcast %59 : vector<16x1xf32> to vector<16x16xf32>
    %61 = arith.cmpf oge, %57, %60 : vector<16x16xf32>
    %c16_i32_25 = arith.constant 16 : i32
    %62 = vector.broadcast %c16_i32_25 : i32 to vector<16x16xi32>
    %63 = arith.select %61, %19, %62 : vector<16x16xi1>, vector<16x16xi32>
    %cst_26 = arith.constant dense<2147483647> : vector<16xi32>
    %64 = vector.multi_reduction <minsi>, %63, %cst_26 [1] : vector<16x16xi32> to vector<16xi32>
    %65 = vector.shape_cast %64 : vector<16xi32> to vector<16x1xi32>
    %66 = vector.broadcast %65 : vector<16x1xi32> to vector<16x16xi32>
    %67 = arith.cmpi eq, %19, %66 : vector<16x16xi32>
    %68 = arith.extui %67 : vector<16x16xi1> to vector<16x16xi32>
    %69 = arith.sitofp %68 : vector<16x16xi32> to vector<16x16xf32>
    %70 = arith.truncf %69 : vector<16x16xf32> to vector<16x16xbf16>
    %cst_27 = arith.constant dense<0.000000e+00> : vector<16x9xf32>
    %71 = tpu.matmul %70, %27, %cst_27 {dimension_numbers = #tpu.dot_dimension_numbers<[1], [0], [0], [1], [0, 0, 1, 1], [], []>} : vector<16x16xbf16>, vector<16x9xbf16>, vector<16x9xf32> -> vector<16x9xf32>
    %72 = arith.addf %71, %26 : vector<16x9xf32>
    %cst_28 = arith.constant 2.000000e-01 : f32
    %73 = vector.broadcast %cst_28 : f32 to vector<16x9xf32>
    %74 = arith.mulf %73, %72 : vector<16x9xf32>
    %75 = arith.maximumf %72, %74 : vector<16x9xf32>
    %76 = arith.truncf %75 : vector<16x9xf32> to vector<16x9xbf16>
    %cst_29 = arith.constant dense<0.000000e+00> : vector<16x11xf32>
    %77 = tpu.matmul %76, %28, %cst_29 {dimension_numbers = #tpu.dot_dimension_numbers<[1], [0], [0], [1], [0, 0, 1, 1], [], []>} : vector<16x9xbf16>, vector<9x11xbf16>, vector<16x11xf32> -> vector<16x11xf32>
    %78 = vector.broadcast %7 : vector<1x11xf32> to vector<16x11xf32>
    %79 = arith.addf %77, %78 : vector<16x11xf32>
    %cst_30 = arith.constant 2.000000e-01 : f32
    %80 = vector.broadcast %cst_30 : f32 to vector<16x11xf32>
    %81 = arith.mulf %80, %79 : vector<16x11xf32>
    %82 = arith.maximumf %79, %81 : vector<16x11xf32>
    %83 = arith.maximumf %55, %82 : vector<16x11xf32>
    %cst_31 = arith.constant -1.000000e+30 : f32
    %84 = vector.broadcast %cst_31 : f32 to vector<16x16xf32>
    %85 = arith.select %67, %84, %57 : vector<16x16xi1>, vector<16x16xf32>
    %cst_32 = arith.constant dense<0xFF800000> : vector<16xf32>
    %86 = vector.multi_reduction <maximumf>, %85, %cst_32 [1] : vector<16x16xf32> to vector<16xf32>
    %87 = vector.shape_cast %86 : vector<16xf32> to vector<16x1xf32>
    %88 = vector.broadcast %87 : vector<16x1xf32> to vector<16x16xf32>
    %89 = arith.cmpf oge, %85, %88 : vector<16x16xf32>
    %c16_i32_33 = arith.constant 16 : i32
    %90 = vector.broadcast %c16_i32_33 : i32 to vector<16x16xi32>
    %91 = arith.select %89, %19, %90 : vector<16x16xi1>, vector<16x16xi32>
    %cst_34 = arith.constant dense<2147483647> : vector<16xi32>
    %92 = vector.multi_reduction <minsi>, %91, %cst_34 [1] : vector<16x16xi32> to vector<16xi32>
    %93 = vector.shape_cast %92 : vector<16xi32> to vector<16x1xi32>
    %94 = vector.broadcast %93 : vector<16x1xi32> to vector<16x16xi32>
    %95 = arith.cmpi eq, %19, %94 : vector<16x16xi32>
    %96 = arith.extui %95 : vector<16x16xi1> to vector<16x16xi32>
    %97 = arith.sitofp %96 : vector<16x16xi32> to vector<16x16xf32>
    %98 = arith.truncf %97 : vector<16x16xf32> to vector<16x16xbf16>
    %cst_35 = arith.constant dense<0.000000e+00> : vector<16x9xf32>
    %99 = tpu.matmul %98, %27, %cst_35 {dimension_numbers = #tpu.dot_dimension_numbers<[1], [0], [0], [1], [0, 0, 1, 1], [], []>} : vector<16x16xbf16>, vector<16x9xbf16>, vector<16x9xf32> -> vector<16x9xf32>
    %100 = arith.addf %99, %26 : vector<16x9xf32>
    %cst_36 = arith.constant 2.000000e-01 : f32
    %101 = vector.broadcast %cst_36 : f32 to vector<16x9xf32>
    %102 = arith.mulf %101, %100 : vector<16x9xf32>
    %103 = arith.maximumf %100, %102 : vector<16x9xf32>
    %104 = arith.truncf %103 : vector<16x9xf32> to vector<16x9xbf16>
    %cst_37 = arith.constant dense<0.000000e+00> : vector<16x11xf32>
    %105 = tpu.matmul %104, %28, %cst_37 {dimension_numbers = #tpu.dot_dimension_numbers<[1], [0], [0], [1], [0, 0, 1, 1], [], []>} : vector<16x9xbf16>, vector<9x11xbf16>, vector<16x11xf32> -> vector<16x11xf32>
    %106 = vector.broadcast %7 : vector<1x11xf32> to vector<16x11xf32>
    %107 = arith.addf %105, %106 : vector<16x11xf32>
    %cst_38 = arith.constant 2.000000e-01 : f32
    %108 = vector.broadcast %cst_38 : f32 to vector<16x11xf32>
    %109 = arith.mulf %108, %107 : vector<16x11xf32>
    %110 = arith.maximumf %107, %109 : vector<16x11xf32>
    %111 = arith.maximumf %83, %110 : vector<16x11xf32>
    %cst_39 = arith.constant -1.000000e+30 : f32
    %112 = vector.broadcast %cst_39 : f32 to vector<16x16xf32>
    %113 = arith.select %95, %112, %85 : vector<16x16xi1>, vector<16x16xf32>
    %cst_40 = arith.constant dense<0xFF800000> : vector<16xf32>
    %114 = vector.multi_reduction <maximumf>, %113, %cst_40 [1] : vector<16x16xf32> to vector<16xf32>
    %115 = vector.shape_cast %114 : vector<16xf32> to vector<16x1xf32>
    %116 = vector.broadcast %115 : vector<16x1xf32> to vector<16x16xf32>
    %117 = arith.cmpf oge, %113, %116 : vector<16x16xf32>
    %c16_i32_41 = arith.constant 16 : i32
    %118 = vector.broadcast %c16_i32_41 : i32 to vector<16x16xi32>
    %119 = arith.select %117, %19, %118 : vector<16x16xi1>, vector<16x16xi32>
    %cst_42 = arith.constant dense<2147483647> : vector<16xi32>
    %120 = vector.multi_reduction <minsi>, %119, %cst_42 [1] : vector<16x16xi32> to vector<16xi32>
    %121 = vector.shape_cast %120 : vector<16xi32> to vector<16x1xi32>
    %122 = vector.broadcast %121 : vector<16x1xi32> to vector<16x16xi32>
    %123 = arith.cmpi eq, %19, %122 : vector<16x16xi32>
    %124 = arith.extui %123 : vector<16x16xi1> to vector<16x16xi32>
    %125 = arith.sitofp %124 : vector<16x16xi32> to vector<16x16xf32>
    %126 = arith.truncf %125 : vector<16x16xf32> to vector<16x16xbf16>
    %cst_43 = arith.constant dense<0.000000e+00> : vector<16x9xf32>
    %127 = tpu.matmul %126, %27, %cst_43 {dimension_numbers = #tpu.dot_dimension_numbers<[1], [0], [0], [1], [0, 0, 1, 1], [], []>} : vector<16x16xbf16>, vector<16x9xbf16>, vector<16x9xf32> -> vector<16x9xf32>
    %128 = arith.addf %127, %26 : vector<16x9xf32>
    %cst_44 = arith.constant 2.000000e-01 : f32
    %129 = vector.broadcast %cst_44 : f32 to vector<16x9xf32>
    %130 = arith.mulf %129, %128 : vector<16x9xf32>
    %131 = arith.maximumf %128, %130 : vector<16x9xf32>
    %132 = arith.truncf %131 : vector<16x9xf32> to vector<16x9xbf16>
    %cst_45 = arith.constant dense<0.000000e+00> : vector<16x11xf32>
    %133 = tpu.matmul %132, %28, %cst_45 {dimension_numbers = #tpu.dot_dimension_numbers<[1], [0], [0], [1], [0, 0, 1, 1], [], []>} : vector<16x9xbf16>, vector<9x11xbf16>, vector<16x11xf32> -> vector<16x11xf32>
    %134 = vector.broadcast %7 : vector<1x11xf32> to vector<16x11xf32>
    %135 = arith.addf %133, %134 : vector<16x11xf32>
    %cst_46 = arith.constant 2.000000e-01 : f32
    %136 = vector.broadcast %cst_46 : f32 to vector<16x11xf32>
    %137 = arith.mulf %136, %135 : vector<16x11xf32>
    %138 = arith.maximumf %135, %137 : vector<16x11xf32>
    %139 = arith.maximumf %111, %138 : vector<16x11xf32>
    %cst_47 = arith.constant -1.000000e+30 : f32
    %140 = vector.broadcast %cst_47 : f32 to vector<16x16xf32>
    %141 = arith.select %123, %140, %113 : vector<16x16xi1>, vector<16x16xf32>
    %cst_48 = arith.constant dense<0xFF800000> : vector<16xf32>
    %142 = vector.multi_reduction <maximumf>, %141, %cst_48 [1] : vector<16x16xf32> to vector<16xf32>
    %143 = vector.shape_cast %142 : vector<16xf32> to vector<16x1xf32>
    %144 = vector.broadcast %143 : vector<16x1xf32> to vector<16x16xf32>
    %145 = arith.cmpf oge, %141, %144 : vector<16x16xf32>
    %c16_i32_49 = arith.constant 16 : i32
    %146 = vector.broadcast %c16_i32_49 : i32 to vector<16x16xi32>
    %147 = arith.select %145, %19, %146 : vector<16x16xi1>, vector<16x16xi32>
    %cst_50 = arith.constant dense<2147483647> : vector<16xi32>
    %148 = vector.multi_reduction <minsi>, %147, %cst_50 [1] : vector<16x16xi32> to vector<16xi32>
    %149 = vector.shape_cast %148 : vector<16xi32> to vector<16x1xi32>
    %150 = vector.broadcast %149 : vector<16x1xi32> to vector<16x16xi32>
    %151 = arith.cmpi eq, %19, %150 : vector<16x16xi32>
    %152 = arith.extui %151 : vector<16x16xi1> to vector<16x16xi32>
    %153 = arith.sitofp %152 : vector<16x16xi32> to vector<16x16xf32>
    %154 = arith.truncf %153 : vector<16x16xf32> to vector<16x16xbf16>
    %cst_51 = arith.constant dense<0.000000e+00> : vector<16x9xf32>
    %155 = tpu.matmul %154, %27, %cst_51 {dimension_numbers = #tpu.dot_dimension_numbers<[1], [0], [0], [1], [0, 0, 1, 1], [], []>} : vector<16x16xbf16>, vector<16x9xbf16>, vector<16x9xf32> -> vector<16x9xf32>
    %156 = arith.addf %155, %26 : vector<16x9xf32>
    %cst_52 = arith.constant 2.000000e-01 : f32
    %157 = vector.broadcast %cst_52 : f32 to vector<16x9xf32>
    %158 = arith.mulf %157, %156 : vector<16x9xf32>
    %159 = arith.maximumf %156, %158 : vector<16x9xf32>
    %160 = arith.truncf %159 : vector<16x9xf32> to vector<16x9xbf16>
    %cst_53 = arith.constant dense<0.000000e+00> : vector<16x11xf32>
    %161 = tpu.matmul %160, %28, %cst_53 {dimension_numbers = #tpu.dot_dimension_numbers<[1], [0], [0], [1], [0, 0, 1, 1], [], []>} : vector<16x9xbf16>, vector<9x11xbf16>, vector<16x11xf32> -> vector<16x11xf32>
    %162 = vector.broadcast %7 : vector<1x11xf32> to vector<16x11xf32>
    %163 = arith.addf %161, %162 : vector<16x11xf32>
    %cst_54 = arith.constant 2.000000e-01 : f32
    %164 = vector.broadcast %cst_54 : f32 to vector<16x11xf32>
    %165 = arith.mulf %164, %163 : vector<16x11xf32>
    %166 = arith.maximumf %163, %165 : vector<16x11xf32>
    %167 = arith.maximumf %139, %166 : vector<16x11xf32>
    %cst_55 = arith.constant -1.000000e+30 : f32
    %168 = vector.broadcast %cst_55 : f32 to vector<16x16xf32>
    %169 = arith.select %151, %168, %141 : vector<16x16xi1>, vector<16x16xf32>
    %cst_56 = arith.constant dense<0xFF800000> : vector<16xf32>
    %170 = vector.multi_reduction <maximumf>, %169, %cst_56 [1] : vector<16x16xf32> to vector<16xf32>
    %171 = vector.shape_cast %170 : vector<16xf32> to vector<16x1xf32>
    %172 = vector.broadcast %171 : vector<16x1xf32> to vector<16x16xf32>
    %173 = arith.cmpf oge, %169, %172 : vector<16x16xf32>
    %c16_i32_57 = arith.constant 16 : i32
    %174 = vector.broadcast %c16_i32_57 : i32 to vector<16x16xi32>
    %175 = arith.select %173, %19, %174 : vector<16x16xi1>, vector<16x16xi32>
    %cst_58 = arith.constant dense<2147483647> : vector<16xi32>
    %176 = vector.multi_reduction <minsi>, %175, %cst_58 [1] : vector<16x16xi32> to vector<16xi32>
    %177 = vector.shape_cast %176 : vector<16xi32> to vector<16x1xi32>
    %178 = vector.broadcast %177 : vector<16x1xi32> to vector<16x16xi32>
    %179 = arith.cmpi eq, %19, %178 : vector<16x16xi32>
    %180 = arith.extui %179 : vector<16x16xi1> to vector<16x16xi32>
    %181 = arith.sitofp %180 : vector<16x16xi32> to vector<16x16xf32>
    %182 = arith.truncf %181 : vector<16x16xf32> to vector<16x16xbf16>
    %cst_59 = arith.constant dense<0.000000e+00> : vector<16x9xf32>
    %183 = tpu.matmul %182, %27, %cst_59 {dimension_numbers = #tpu.dot_dimension_numbers<[1], [0], [0], [1], [0, 0, 1, 1], [], []>} : vector<16x16xbf16>, vector<16x9xbf16>, vector<16x9xf32> -> vector<16x9xf32>
    %184 = arith.addf %183, %26 : vector<16x9xf32>
    %cst_60 = arith.constant 2.000000e-01 : f32
    %185 = vector.broadcast %cst_60 : f32 to vector<16x9xf32>
    %186 = arith.mulf %185, %184 : vector<16x9xf32>
    %187 = arith.maximumf %184, %186 : vector<16x9xf32>
    %188 = arith.truncf %187 : vector<16x9xf32> to vector<16x9xbf16>
    %cst_61 = arith.constant dense<0.000000e+00> : vector<16x11xf32>
    %189 = tpu.matmul %188, %28, %cst_61 {dimension_numbers = #tpu.dot_dimension_numbers<[1], [0], [0], [1], [0, 0, 1, 1], [], []>} : vector<16x9xbf16>, vector<9x11xbf16>, vector<16x11xf32> -> vector<16x11xf32>
    %190 = vector.broadcast %7 : vector<1x11xf32> to vector<16x11xf32>
    %191 = arith.addf %189, %190 : vector<16x11xf32>
    %cst_62 = arith.constant 2.000000e-01 : f32
    %192 = vector.broadcast %cst_62 : f32 to vector<16x11xf32>
    %193 = arith.mulf %192, %191 : vector<16x11xf32>
    %194 = arith.maximumf %191, %193 : vector<16x11xf32>
    %195 = arith.maximumf %167, %194 : vector<16x11xf32>
    %cst_63 = arith.constant -1.000000e+30 : f32
    %196 = vector.broadcast %cst_63 : f32 to vector<16x16xf32>
    %197 = arith.select %179, %196, %169 : vector<16x16xi1>, vector<16x16xf32>
    %cst_64 = arith.constant dense<0xFF800000> : vector<16xf32>
    %198 = vector.multi_reduction <maximumf>, %197, %cst_64 [1] : vector<16x16xf32> to vector<16xf32>
    %199 = vector.shape_cast %198 : vector<16xf32> to vector<16x1xf32>
    %200 = vector.broadcast %199 : vector<16x1xf32> to vector<16x16xf32>
    %201 = arith.cmpf oge, %197, %200 : vector<16x16xf32>
    %c16_i32_65 = arith.constant 16 : i32
    %202 = vector.broadcast %c16_i32_65 : i32 to vector<16x16xi32>
    %203 = arith.select %201, %19, %202 : vector<16x16xi1>, vector<16x16xi32>
    %cst_66 = arith.constant dense<2147483647> : vector<16xi32>
    %204 = vector.multi_reduction <minsi>, %203, %cst_66 [1] : vector<16x16xi32> to vector<16xi32>
    %205 = vector.shape_cast %204 : vector<16xi32> to vector<16x1xi32>
    %206 = vector.broadcast %205 : vector<16x1xi32> to vector<16x16xi32>
    %207 = arith.cmpi eq, %19, %206 : vector<16x16xi32>
    %208 = arith.extui %207 : vector<16x16xi1> to vector<16x16xi32>
    %209 = arith.sitofp %208 : vector<16x16xi32> to vector<16x16xf32>
    %210 = arith.truncf %209 : vector<16x16xf32> to vector<16x16xbf16>
    %cst_67 = arith.constant dense<0.000000e+00> : vector<16x9xf32>
    %211 = tpu.matmul %210, %27, %cst_67 {dimension_numbers = #tpu.dot_dimension_numbers<[1], [0], [0], [1], [0, 0, 1, 1], [], []>} : vector<16x16xbf16>, vector<16x9xbf16>, vector<16x9xf32> -> vector<16x9xf32>
    %212 = arith.addf %211, %26 : vector<16x9xf32>
    %cst_68 = arith.constant 2.000000e-01 : f32
    %213 = vector.broadcast %cst_68 : f32 to vector<16x9xf32>
    %214 = arith.mulf %213, %212 : vector<16x9xf32>
    %215 = arith.maximumf %212, %214 : vector<16x9xf32>
    %216 = arith.truncf %215 : vector<16x9xf32> to vector<16x9xbf16>
    %cst_69 = arith.constant dense<0.000000e+00> : vector<16x11xf32>
    %217 = tpu.matmul %216, %28, %cst_69 {dimension_numbers = #tpu.dot_dimension_numbers<[1], [0], [0], [1], [0, 0, 1, 1], [], []>} : vector<16x9xbf16>, vector<9x11xbf16>, vector<16x11xf32> -> vector<16x11xf32>
    %218 = vector.broadcast %7 : vector<1x11xf32> to vector<16x11xf32>
    %219 = arith.addf %217, %218 : vector<16x11xf32>
    %cst_70 = arith.constant 2.000000e-01 : f32
    %220 = vector.broadcast %cst_70 : f32 to vector<16x11xf32>
    %221 = arith.mulf %220, %219 : vector<16x11xf32>
    %222 = arith.maximumf %219, %221 : vector<16x11xf32>
    %223 = arith.maximumf %195, %222 : vector<16x11xf32>
    %cst_71 = arith.constant -1.000000e+30 : f32
    %224 = vector.broadcast %cst_71 : f32 to vector<16x16xf32>
    %225 = arith.select %207, %224, %197 : vector<16x16xi1>, vector<16x16xf32>
    %cst_72 = arith.constant dense<0xFF800000> : vector<16xf32>
    %226 = vector.multi_reduction <maximumf>, %225, %cst_72 [1] : vector<16x16xf32> to vector<16xf32>
    %227 = vector.shape_cast %226 : vector<16xf32> to vector<16x1xf32>
    %228 = vector.broadcast %227 : vector<16x1xf32> to vector<16x16xf32>
    %229 = arith.cmpf oge, %225, %228 : vector<16x16xf32>
    %c16_i32_73 = arith.constant 16 : i32
    %230 = vector.broadcast %c16_i32_73 : i32 to vector<16x16xi32>
    %231 = arith.select %229, %19, %230 : vector<16x16xi1>, vector<16x16xi32>
    %cst_74 = arith.constant dense<2147483647> : vector<16xi32>
    %232 = vector.multi_reduction <minsi>, %231, %cst_74 [1] : vector<16x16xi32> to vector<16xi32>
    %233 = vector.shape_cast %232 : vector<16xi32> to vector<16x1xi32>
    %234 = vector.broadcast %233 : vector<16x1xi32> to vector<16x16xi32>
    %235 = arith.cmpi eq, %19, %234 : vector<16x16xi32>
    %236 = arith.extui %235 : vector<16x16xi1> to vector<16x16xi32>
    %237 = arith.sitofp %236 : vector<16x16xi32> to vector<16x16xf32>
    %238 = arith.truncf %237 : vector<16x16xf32> to vector<16x16xbf16>
    %cst_75 = arith.constant dense<0.000000e+00> : vector<16x9xf32>
    %239 = tpu.matmul %238, %27, %cst_75 {dimension_numbers = #tpu.dot_dimension_numbers<[1], [0], [0], [1], [0, 0, 1, 1], [], []>} : vector<16x16xbf16>, vector<16x9xbf16>, vector<16x9xf32> -> vector<16x9xf32>
    %240 = arith.addf %239, %26 : vector<16x9xf32>
    %cst_76 = arith.constant 2.000000e-01 : f32
    %241 = vector.broadcast %cst_76 : f32 to vector<16x9xf32>
    %242 = arith.mulf %241, %240 : vector<16x9xf32>
    %243 = arith.maximumf %240, %242 : vector<16x9xf32>
    %244 = arith.truncf %243 : vector<16x9xf32> to vector<16x9xbf16>
    %cst_77 = arith.constant dense<0.000000e+00> : vector<16x11xf32>
    %245 = tpu.matmul %244, %28, %cst_77 {dimension_numbers = #tpu.dot_dimension_numbers<[1], [0], [0], [1], [0, 0, 1, 1], [], []>} : vector<16x9xbf16>, vector<9x11xbf16>, vector<16x11xf32> -> vector<16x11xf32>
    %246 = vector.broadcast %7 : vector<1x11xf32> to vector<16x11xf32>
    %247 = arith.addf %245, %246 : vector<16x11xf32>
    %cst_78 = arith.constant 2.000000e-01 : f32
    %248 = vector.broadcast %cst_78 : f32 to vector<16x11xf32>
    %249 = arith.mulf %248, %247 : vector<16x11xf32>
    %250 = arith.maximumf %247, %249 : vector<16x11xf32>
    %251 = arith.maximumf %223, %250 : vector<16x11xf32>
    %cst_79 = arith.constant -1.000000e+30 : f32
    %252 = vector.broadcast %cst_79 : f32 to vector<16x16xf32>
    %253 = arith.select %235, %252, %225 : vector<16x16xi1>, vector<16x16xf32>
    %cst_80 = arith.constant dense<0xFF800000> : vector<16xf32>
    %254 = vector.multi_reduction <maximumf>, %253, %cst_80 [1] : vector<16x16xf32> to vector<16xf32>
    %255 = vector.shape_cast %254 : vector<16xf32> to vector<16x1xf32>
    %256 = vector.broadcast %255 : vector<16x1xf32> to vector<16x16xf32>
    %257 = arith.cmpf oge, %253, %256 : vector<16x16xf32>
    %c16_i32_81 = arith.constant 16 : i32
    %258 = vector.broadcast %c16_i32_81 : i32 to vector<16x16xi32>
    %259 = arith.select %257, %19, %258 : vector<16x16xi1>, vector<16x16xi32>
    %cst_82 = arith.constant dense<2147483647> : vector<16xi32>
    %260 = vector.multi_reduction <minsi>, %259, %cst_82 [1] : vector<16x16xi32> to vector<16xi32>
    %261 = vector.shape_cast %260 : vector<16xi32> to vector<16x1xi32>
    %262 = vector.broadcast %261 : vector<16x1xi32> to vector<16x16xi32>
    %263 = arith.cmpi eq, %19, %262 : vector<16x16xi32>
    %264 = arith.extui %263 : vector<16x16xi1> to vector<16x16xi32>
    %265 = arith.sitofp %264 : vector<16x16xi32> to vector<16x16xf32>
    %266 = arith.truncf %265 : vector<16x16xf32> to vector<16x16xbf16>
    %cst_83 = arith.constant dense<0.000000e+00> : vector<16x9xf32>
    %267 = tpu.matmul %266, %27, %cst_83 {dimension_numbers = #tpu.dot_dimension_numbers<[1], [0], [0], [1], [0, 0, 1, 1], [], []>} : vector<16x16xbf16>, vector<16x9xbf16>, vector<16x9xf32> -> vector<16x9xf32>
    %268 = arith.addf %267, %26 : vector<16x9xf32>
    %cst_84 = arith.constant 2.000000e-01 : f32
    %269 = vector.broadcast %cst_84 : f32 to vector<16x9xf32>
    %270 = arith.mulf %269, %268 : vector<16x9xf32>
    %271 = arith.maximumf %268, %270 : vector<16x9xf32>
    %272 = arith.truncf %271 : vector<16x9xf32> to vector<16x9xbf16>
    %cst_85 = arith.constant dense<0.000000e+00> : vector<16x11xf32>
    %273 = tpu.matmul %272, %28, %cst_85 {dimension_numbers = #tpu.dot_dimension_numbers<[1], [0], [0], [1], [0, 0, 1, 1], [], []>} : vector<16x9xbf16>, vector<9x11xbf16>, vector<16x11xf32> -> vector<16x11xf32>
    %274 = vector.broadcast %7 : vector<1x11xf32> to vector<16x11xf32>
    %275 = arith.addf %273, %274 : vector<16x11xf32>
    %cst_86 = arith.constant 2.000000e-01 : f32
    %276 = vector.broadcast %cst_86 : f32 to vector<16x11xf32>
    %277 = arith.mulf %276, %275 : vector<16x11xf32>
    %278 = arith.maximumf %275, %277 : vector<16x11xf32>
    %279 = arith.maximumf %251, %278 : vector<16x11xf32>
    %cst_87 = arith.constant -1.000000e+30 : f32
    %280 = vector.broadcast %cst_87 : f32 to vector<16x16xf32>
    %281 = arith.select %263, %280, %253 : vector<16x16xi1>, vector<16x16xf32>
    %cst_88 = arith.constant dense<0xFF800000> : vector<16xf32>
    %282 = vector.multi_reduction <maximumf>, %281, %cst_88 [1] : vector<16x16xf32> to vector<16xf32>
    %283 = vector.shape_cast %282 : vector<16xf32> to vector<16x1xf32>
    %284 = vector.broadcast %283 : vector<16x1xf32> to vector<16x16xf32>
    %285 = arith.cmpf oge, %281, %284 : vector<16x16xf32>
    %c16_i32_89 = arith.constant 16 : i32
    %286 = vector.broadcast %c16_i32_89 : i32 to vector<16x16xi32>
    %287 = arith.select %285, %19, %286 : vector<16x16xi1>, vector<16x16xi32>
    %cst_90 = arith.constant dense<2147483647> : vector<16xi32>
    %288 = vector.multi_reduction <minsi>, %287, %cst_90 [1] : vector<16x16xi32> to vector<16xi32>
    %289 = vector.shape_cast %288 : vector<16xi32> to vector<16x1xi32>
    %290 = vector.broadcast %289 : vector<16x1xi32> to vector<16x16xi32>
    %291 = arith.cmpi eq, %19, %290 : vector<16x16xi32>
    %292 = arith.extui %291 : vector<16x16xi1> to vector<16x16xi32>
    %293 = arith.sitofp %292 : vector<16x16xi32> to vector<16x16xf32>
    %294 = arith.truncf %293 : vector<16x16xf32> to vector<16x16xbf16>
    %cst_91 = arith.constant dense<0.000000e+00> : vector<16x9xf32>
    %295 = tpu.matmul %294, %27, %cst_91 {dimension_numbers = #tpu.dot_dimension_numbers<[1], [0], [0], [1], [0, 0, 1, 1], [], []>} : vector<16x16xbf16>, vector<16x9xbf16>, vector<16x9xf32> -> vector<16x9xf32>
    %296 = arith.addf %295, %26 : vector<16x9xf32>
    %cst_92 = arith.constant 2.000000e-01 : f32
    %297 = vector.broadcast %cst_92 : f32 to vector<16x9xf32>
    %298 = arith.mulf %297, %296 : vector<16x9xf32>
    %299 = arith.maximumf %296, %298 : vector<16x9xf32>
    %300 = arith.truncf %299 : vector<16x9xf32> to vector<16x9xbf16>
    %cst_93 = arith.constant dense<0.000000e+00> : vector<16x11xf32>
    %301 = tpu.matmul %300, %28, %cst_93 {dimension_numbers = #tpu.dot_dimension_numbers<[1], [0], [0], [1], [0, 0, 1, 1], [], []>} : vector<16x9xbf16>, vector<9x11xbf16>, vector<16x11xf32> -> vector<16x11xf32>
    %302 = vector.broadcast %7 : vector<1x11xf32> to vector<16x11xf32>
    %303 = arith.addf %301, %302 : vector<16x11xf32>
    %cst_94 = arith.constant 2.000000e-01 : f32
    %304 = vector.broadcast %cst_94 : f32 to vector<16x11xf32>
    %305 = arith.mulf %304, %303 : vector<16x11xf32>
    %306 = arith.maximumf %303, %305 : vector<16x11xf32>
    %307 = arith.maximumf %279, %306 : vector<16x11xf32>
    %c0_95 = arith.constant 0 : index
    %c0_96 = arith.constant 0 : index
    %308 = vector.load %arg7[%c0_95, %c0_96] : memref<11x26xf32, #tpu.memory_space<vmem>>, vector<11x26xf32>
    %c0_97 = arith.constant 0 : index
    %c0_98 = arith.constant 0 : index
    %309 = vector.load %arg8[%c0_97, %c0_98] : memref<11x26xf32, #tpu.memory_space<vmem>>, vector<11x26xf32>
    %c0_99 = arith.constant 0 : index
    %c0_100 = arith.constant 0 : index
    %310 = vector.load %arg9[%c0_99, %c0_100] : memref<1x26xf32, #tpu.memory_space<vmem>>, vector<1x26xf32>
    %c0_101 = arith.constant 0 : index
    %c0_102 = arith.constant 0 : index
    %311 = vector.load %arg10[%c0_101, %c0_102] : memref<26x32xf32, #tpu.memory_space<vmem>>, vector<26x32xf32>
    %c0_103 = arith.constant 0 : index
    %c0_104 = arith.constant 0 : index
    %312 = vector.load %arg11[%c0_103, %c0_104] : memref<1x32xf32, #tpu.memory_space<vmem>>, vector<1x32xf32>
    %313 = arith.mulf %307, %307 : vector<16x11xf32>
    %cst_105 = arith.constant dense<0.000000e+00> : vector<16xf32>
    %314 = vector.multi_reduction <add>, %313, %cst_105 [1] : vector<16x11xf32> to vector<16xf32>
    %315 = vector.shape_cast %314 : vector<16xf32> to vector<16x1xf32>
    %cst_106 = arith.constant dense<0.000000e+00> : vector<16x16xf32>
    %316 = tpu.matmul %307, %307, %cst_106 {dimension_numbers = #tpu.dot_dimension_numbers<[1], [1], [0], [0], [0, 0, 1, 0], [], []>} : vector<16x11xf32>, vector<16x11xf32>, vector<16x16xf32> -> vector<16x16xf32>
    %cst_107 = arith.constant 2.000000e+00 : f32
    %317 = vector.broadcast %cst_107 : f32 to vector<16x16xf32>
    %318 = arith.mulf %317, %316 : vector<16x16xf32>
    %319 = vector.broadcast %315 : vector<16x1xf32> to vector<16x16xf32>
    %320 = arith.subf %318, %319 : vector<16x16xf32>
    %321 = tpu.transpose %315, [1, 0] : vector<16x1xf32> -> vector<1x16xf32>
    %322 = vector.broadcast %321 : vector<1x16xf32> to vector<16x16xf32>
    %323 = arith.subf %320, %322 : vector<16x16xf32>
    %324 = tpu.iota {dimensions = array<i32: 1>} : vector<16x16xi32>
    %325 = arith.truncf %307 : vector<16x11xf32> to vector<16x11xbf16>
    %326 = arith.truncf %308 : vector<11x26xf32> to vector<11x26xbf16>
    %cst_108 = arith.constant dense<0.000000e+00> : vector<16x26xf32>
    %327 = tpu.matmul %325, %326, %cst_108 {dimension_numbers = #tpu.dot_dimension_numbers<[1], [0], [0], [1], [0, 0, 1, 1], [], []>} : vector<16x11xbf16>, vector<11x26xbf16>, vector<16x26xf32> -> vector<16x26xf32>
    %328 = arith.truncf %309 : vector<11x26xf32> to vector<11x26xbf16>
    %cst_109 = arith.constant dense<0.000000e+00> : vector<16x26xf32>
    %329 = tpu.matmul %325, %328, %cst_109 {dimension_numbers = #tpu.dot_dimension_numbers<[1], [0], [0], [1], [0, 0, 1, 1], [], []>} : vector<16x11xbf16>, vector<11x26xbf16>, vector<16x26xf32> -> vector<16x26xf32>
    %330 = vector.broadcast %310 : vector<1x26xf32> to vector<16x26xf32>
    %331 = arith.addf %329, %330 : vector<16x26xf32>
    %332 = arith.truncf %327 : vector<16x26xf32> to vector<16x26xbf16>
    %333 = arith.truncf %311 : vector<26x32xf32> to vector<26x32xbf16>
    %cst_110 = arith.constant 0xFF800000 : f32
    %334 = vector.broadcast %cst_110 : f32 to vector<16x32xf32>
    %cst_111 = arith.constant dense<0xFF800000> : vector<16xf32>
    %335 = vector.multi_reduction <maximumf>, %323, %cst_111 [1] : vector<16x16xf32> to vector<16xf32>
    %336 = vector.shape_cast %335 : vector<16xf32> to vector<16x1xf32>
    %337 = vector.broadcast %336 : vector<16x1xf32> to vector<16x16xf32>
    %338 = arith.cmpf oge, %323, %337 : vector<16x16xf32>
    %c16_i32_112 = arith.constant 16 : i32
    %339 = vector.broadcast %c16_i32_112 : i32 to vector<16x16xi32>
    %340 = arith.select %338, %324, %339 : vector<16x16xi1>, vector<16x16xi32>
    %cst_113 = arith.constant dense<2147483647> : vector<16xi32>
    %341 = vector.multi_reduction <minsi>, %340, %cst_113 [1] : vector<16x16xi32> to vector<16xi32>
    %342 = vector.shape_cast %341 : vector<16xi32> to vector<16x1xi32>
    %343 = vector.broadcast %342 : vector<16x1xi32> to vector<16x16xi32>
    %344 = arith.cmpi eq, %324, %343 : vector<16x16xi32>
    %345 = arith.extui %344 : vector<16x16xi1> to vector<16x16xi32>
    %346 = arith.sitofp %345 : vector<16x16xi32> to vector<16x16xf32>
    %347 = arith.truncf %346 : vector<16x16xf32> to vector<16x16xbf16>
    %cst_114 = arith.constant dense<0.000000e+00> : vector<16x26xf32>
    %348 = tpu.matmul %347, %332, %cst_114 {dimension_numbers = #tpu.dot_dimension_numbers<[1], [0], [0], [1], [0, 0, 1, 1], [], []>} : vector<16x16xbf16>, vector<16x26xbf16>, vector<16x26xf32> -> vector<16x26xf32>
    %349 = arith.addf %348, %331 : vector<16x26xf32>
    %cst_115 = arith.constant 2.000000e-01 : f32
    %350 = vector.broadcast %cst_115 : f32 to vector<16x26xf32>
    %351 = arith.mulf %350, %349 : vector<16x26xf32>
    %352 = arith.maximumf %349, %351 : vector<16x26xf32>
    %353 = arith.truncf %352 : vector<16x26xf32> to vector<16x26xbf16>
    %cst_116 = arith.constant dense<0.000000e+00> : vector<16x32xf32>
    %354 = tpu.matmul %353, %333, %cst_116 {dimension_numbers = #tpu.dot_dimension_numbers<[1], [0], [0], [1], [0, 0, 1, 1], [], []>} : vector<16x26xbf16>, vector<26x32xbf16>, vector<16x32xf32> -> vector<16x32xf32>
    %355 = vector.broadcast %312 : vector<1x32xf32> to vector<16x32xf32>
    %356 = arith.addf %354, %355 : vector<16x32xf32>
    %cst_117 = arith.constant 2.000000e-01 : f32
    %357 = vector.broadcast %cst_117 : f32 to vector<16x32xf32>
    %358 = arith.mulf %357, %356 : vector<16x32xf32>
    %359 = arith.maximumf %356, %358 : vector<16x32xf32>
    %360 = arith.maximumf %334, %359 : vector<16x32xf32>
    %cst_118 = arith.constant -1.000000e+30 : f32
    %361 = vector.broadcast %cst_118 : f32 to vector<16x16xf32>
    %362 = arith.select %344, %361, %323 : vector<16x16xi1>, vector<16x16xf32>
    %cst_119 = arith.constant dense<0xFF800000> : vector<16xf32>
    %363 = vector.multi_reduction <maximumf>, %362, %cst_119 [1] : vector<16x16xf32> to vector<16xf32>
    %364 = vector.shape_cast %363 : vector<16xf32> to vector<16x1xf32>
    %365 = vector.broadcast %364 : vector<16x1xf32> to vector<16x16xf32>
    %366 = arith.cmpf oge, %362, %365 : vector<16x16xf32>
    %c16_i32_120 = arith.constant 16 : i32
    %367 = vector.broadcast %c16_i32_120 : i32 to vector<16x16xi32>
    %368 = arith.select %366, %324, %367 : vector<16x16xi1>, vector<16x16xi32>
    %cst_121 = arith.constant dense<2147483647> : vector<16xi32>
    %369 = vector.multi_reduction <minsi>, %368, %cst_121 [1] : vector<16x16xi32> to vector<16xi32>
    %370 = vector.shape_cast %369 : vector<16xi32> to vector<16x1xi32>
    %371 = vector.broadcast %370 : vector<16x1xi32> to vector<16x16xi32>
    %372 = arith.cmpi eq, %324, %371 : vector<16x16xi32>
    %373 = arith.extui %372 : vector<16x16xi1> to vector<16x16xi32>
    %374 = arith.sitofp %373 : vector<16x16xi32> to vector<16x16xf32>
    %375 = arith.truncf %374 : vector<16x16xf32> to vector<16x16xbf16>
    %cst_122 = arith.constant dense<0.000000e+00> : vector<16x26xf32>
    %376 = tpu.matmul %375, %332, %cst_122 {dimension_numbers = #tpu.dot_dimension_numbers<[1], [0], [0], [1], [0, 0, 1, 1], [], []>} : vector<16x16xbf16>, vector<16x26xbf16>, vector<16x26xf32> -> vector<16x26xf32>
    %377 = arith.addf %376, %331 : vector<16x26xf32>
    %cst_123 = arith.constant 2.000000e-01 : f32
    %378 = vector.broadcast %cst_123 : f32 to vector<16x26xf32>
    %379 = arith.mulf %378, %377 : vector<16x26xf32>
    %380 = arith.maximumf %377, %379 : vector<16x26xf32>
    %381 = arith.truncf %380 : vector<16x26xf32> to vector<16x26xbf16>
    %cst_124 = arith.constant dense<0.000000e+00> : vector<16x32xf32>
    %382 = tpu.matmul %381, %333, %cst_124 {dimension_numbers = #tpu.dot_dimension_numbers<[1], [0], [0], [1], [0, 0, 1, 1], [], []>} : vector<16x26xbf16>, vector<26x32xbf16>, vector<16x32xf32> -> vector<16x32xf32>
    %383 = vector.broadcast %312 : vector<1x32xf32> to vector<16x32xf32>
    %384 = arith.addf %382, %383 : vector<16x32xf32>
    %cst_125 = arith.constant 2.000000e-01 : f32
    %385 = vector.broadcast %cst_125 : f32 to vector<16x32xf32>
    %386 = arith.mulf %385, %384 : vector<16x32xf32>
    %387 = arith.maximumf %384, %386 : vector<16x32xf32>
    %388 = arith.maximumf %360, %387 : vector<16x32xf32>
    %cst_126 = arith.constant -1.000000e+30 : f32
    %389 = vector.broadcast %cst_126 : f32 to vector<16x16xf32>
    %390 = arith.select %372, %389, %362 : vector<16x16xi1>, vector<16x16xf32>
    %cst_127 = arith.constant dense<0xFF800000> : vector<16xf32>
    %391 = vector.multi_reduction <maximumf>, %390, %cst_127 [1] : vector<16x16xf32> to vector<16xf32>
    %392 = vector.shape_cast %391 : vector<16xf32> to vector<16x1xf32>
    %393 = vector.broadcast %392 : vector<16x1xf32> to vector<16x16xf32>
    %394 = arith.cmpf oge, %390, %393 : vector<16x16xf32>
    %c16_i32_128 = arith.constant 16 : i32
    %395 = vector.broadcast %c16_i32_128 : i32 to vector<16x16xi32>
    %396 = arith.select %394, %324, %395 : vector<16x16xi1>, vector<16x16xi32>
    %cst_129 = arith.constant dense<2147483647> : vector<16xi32>
    %397 = vector.multi_reduction <minsi>, %396, %cst_129 [1] : vector<16x16xi32> to vector<16xi32>
    %398 = vector.shape_cast %397 : vector<16xi32> to vector<16x1xi32>
    %399 = vector.broadcast %398 : vector<16x1xi32> to vector<16x16xi32>
    %400 = arith.cmpi eq, %324, %399 : vector<16x16xi32>
    %401 = arith.extui %400 : vector<16x16xi1> to vector<16x16xi32>
    %402 = arith.sitofp %401 : vector<16x16xi32> to vector<16x16xf32>
    %403 = arith.truncf %402 : vector<16x16xf32> to vector<16x16xbf16>
    %cst_130 = arith.constant dense<0.000000e+00> : vector<16x26xf32>
    %404 = tpu.matmul %403, %332, %cst_130 {dimension_numbers = #tpu.dot_dimension_numbers<[1], [0], [0], [1], [0, 0, 1, 1], [], []>} : vector<16x16xbf16>, vector<16x26xbf16>, vector<16x26xf32> -> vector<16x26xf32>
    %405 = arith.addf %404, %331 : vector<16x26xf32>
    %cst_131 = arith.constant 2.000000e-01 : f32
    %406 = vector.broadcast %cst_131 : f32 to vector<16x26xf32>
    %407 = arith.mulf %406, %405 : vector<16x26xf32>
    %408 = arith.maximumf %405, %407 : vector<16x26xf32>
    %409 = arith.truncf %408 : vector<16x26xf32> to vector<16x26xbf16>
    %cst_132 = arith.constant dense<0.000000e+00> : vector<16x32xf32>
    %410 = tpu.matmul %409, %333, %cst_132 {dimension_numbers = #tpu.dot_dimension_numbers<[1], [0], [0], [1], [0, 0, 1, 1], [], []>} : vector<16x26xbf16>, vector<26x32xbf16>, vector<16x32xf32> -> vector<16x32xf32>
    %411 = vector.broadcast %312 : vector<1x32xf32> to vector<16x32xf32>
    %412 = arith.addf %410, %411 : vector<16x32xf32>
    %cst_133 = arith.constant 2.000000e-01 : f32
    %413 = vector.broadcast %cst_133 : f32 to vector<16x32xf32>
    %414 = arith.mulf %413, %412 : vector<16x32xf32>
    %415 = arith.maximumf %412, %414 : vector<16x32xf32>
    %416 = arith.maximumf %388, %415 : vector<16x32xf32>
    %cst_134 = arith.constant -1.000000e+30 : f32
    %417 = vector.broadcast %cst_134 : f32 to vector<16x16xf32>
    %418 = arith.select %400, %417, %390 : vector<16x16xi1>, vector<16x16xf32>
    %cst_135 = arith.constant dense<0xFF800000> : vector<16xf32>
    %419 = vector.multi_reduction <maximumf>, %418, %cst_135 [1] : vector<16x16xf32> to vector<16xf32>
    %420 = vector.shape_cast %419 : vector<16xf32> to vector<16x1xf32>
    %421 = vector.broadcast %420 : vector<16x1xf32> to vector<16x16xf32>
    %422 = arith.cmpf oge, %418, %421 : vector<16x16xf32>
    %c16_i32_136 = arith.constant 16 : i32
    %423 = vector.broadcast %c16_i32_136 : i32 to vector<16x16xi32>
    %424 = arith.select %422, %324, %423 : vector<16x16xi1>, vector<16x16xi32>
    %cst_137 = arith.constant dense<2147483647> : vector<16xi32>
    %425 = vector.multi_reduction <minsi>, %424, %cst_137 [1] : vector<16x16xi32> to vector<16xi32>
    %426 = vector.shape_cast %425 : vector<16xi32> to vector<16x1xi32>
    %427 = vector.broadcast %426 : vector<16x1xi32> to vector<16x16xi32>
    %428 = arith.cmpi eq, %324, %427 : vector<16x16xi32>
    %429 = arith.extui %428 : vector<16x16xi1> to vector<16x16xi32>
    %430 = arith.sitofp %429 : vector<16x16xi32> to vector<16x16xf32>
    %431 = arith.truncf %430 : vector<16x16xf32> to vector<16x16xbf16>
    %cst_138 = arith.constant dense<0.000000e+00> : vector<16x26xf32>
    %432 = tpu.matmul %431, %332, %cst_138 {dimension_numbers = #tpu.dot_dimension_numbers<[1], [0], [0], [1], [0, 0, 1, 1], [], []>} : vector<16x16xbf16>, vector<16x26xbf16>, vector<16x26xf32> -> vector<16x26xf32>
    %433 = arith.addf %432, %331 : vector<16x26xf32>
    %cst_139 = arith.constant 2.000000e-01 : f32
    %434 = vector.broadcast %cst_139 : f32 to vector<16x26xf32>
    %435 = arith.mulf %434, %433 : vector<16x26xf32>
    %436 = arith.maximumf %433, %435 : vector<16x26xf32>
    %437 = arith.truncf %436 : vector<16x26xf32> to vector<16x26xbf16>
    %cst_140 = arith.constant dense<0.000000e+00> : vector<16x32xf32>
    %438 = tpu.matmul %437, %333, %cst_140 {dimension_numbers = #tpu.dot_dimension_numbers<[1], [0], [0], [1], [0, 0, 1, 1], [], []>} : vector<16x26xbf16>, vector<26x32xbf16>, vector<16x32xf32> -> vector<16x32xf32>
    %439 = vector.broadcast %312 : vector<1x32xf32> to vector<16x32xf32>
    %440 = arith.addf %438, %439 : vector<16x32xf32>
    %cst_141 = arith.constant 2.000000e-01 : f32
    %441 = vector.broadcast %cst_141 : f32 to vector<16x32xf32>
    %442 = arith.mulf %441, %440 : vector<16x32xf32>
    %443 = arith.maximumf %440, %442 : vector<16x32xf32>
    %444 = arith.maximumf %416, %443 : vector<16x32xf32>
    %cst_142 = arith.constant -1.000000e+30 : f32
    %445 = vector.broadcast %cst_142 : f32 to vector<16x16xf32>
    %446 = arith.select %428, %445, %418 : vector<16x16xi1>, vector<16x16xf32>
    %cst_143 = arith.constant dense<0xFF800000> : vector<16xf32>
    %447 = vector.multi_reduction <maximumf>, %446, %cst_143 [1] : vector<16x16xf32> to vector<16xf32>
    %448 = vector.shape_cast %447 : vector<16xf32> to vector<16x1xf32>
    %449 = vector.broadcast %448 : vector<16x1xf32> to vector<16x16xf32>
    %450 = arith.cmpf oge, %446, %449 : vector<16x16xf32>
    %c16_i32_144 = arith.constant 16 : i32
    %451 = vector.broadcast %c16_i32_144 : i32 to vector<16x16xi32>
    %452 = arith.select %450, %324, %451 : vector<16x16xi1>, vector<16x16xi32>
    %cst_145 = arith.constant dense<2147483647> : vector<16xi32>
    %453 = vector.multi_reduction <minsi>, %452, %cst_145 [1] : vector<16x16xi32> to vector<16xi32>
    %454 = vector.shape_cast %453 : vector<16xi32> to vector<16x1xi32>
    %455 = vector.broadcast %454 : vector<16x1xi32> to vector<16x16xi32>
    %456 = arith.cmpi eq, %324, %455 : vector<16x16xi32>
    %457 = arith.extui %456 : vector<16x16xi1> to vector<16x16xi32>
    %458 = arith.sitofp %457 : vector<16x16xi32> to vector<16x16xf32>
    %459 = arith.truncf %458 : vector<16x16xf32> to vector<16x16xbf16>
    %cst_146 = arith.constant dense<0.000000e+00> : vector<16x26xf32>
    %460 = tpu.matmul %459, %332, %cst_146 {dimension_numbers = #tpu.dot_dimension_numbers<[1], [0], [0], [1], [0, 0, 1, 1], [], []>} : vector<16x16xbf16>, vector<16x26xbf16>, vector<16x26xf32> -> vector<16x26xf32>
    %461 = arith.addf %460, %331 : vector<16x26xf32>
    %cst_147 = arith.constant 2.000000e-01 : f32
    %462 = vector.broadcast %cst_147 : f32 to vector<16x26xf32>
    %463 = arith.mulf %462, %461 : vector<16x26xf32>
    %464 = arith.maximumf %461, %463 : vector<16x26xf32>
    %465 = arith.truncf %464 : vector<16x26xf32> to vector<16x26xbf16>
    %cst_148 = arith.constant dense<0.000000e+00> : vector<16x32xf32>
    %466 = tpu.matmul %465, %333, %cst_148 {dimension_numbers = #tpu.dot_dimension_numbers<[1], [0], [0], [1], [0, 0, 1, 1], [], []>} : vector<16x26xbf16>, vector<26x32xbf16>, vector<16x32xf32> -> vector<16x32xf32>
    %467 = vector.broadcast %312 : vector<1x32xf32> to vector<16x32xf32>
    %468 = arith.addf %466, %467 : vector<16x32xf32>
    %cst_149 = arith.constant 2.000000e-01 : f32
    %469 = vector.broadcast %cst_149 : f32 to vector<16x32xf32>
    %470 = arith.mulf %469, %468 : vector<16x32xf32>
    %471 = arith.maximumf %468, %470 : vector<16x32xf32>
    %472 = arith.maximumf %444, %471 : vector<16x32xf32>
    %cst_150 = arith.constant -1.000000e+30 : f32
    %473 = vector.broadcast %cst_150 : f32 to vector<16x16xf32>
    %474 = arith.select %456, %473, %446 : vector<16x16xi1>, vector<16x16xf32>
    %cst_151 = arith.constant dense<0xFF800000> : vector<16xf32>
    %475 = vector.multi_reduction <maximumf>, %474, %cst_151 [1] : vector<16x16xf32> to vector<16xf32>
    %476 = vector.shape_cast %475 : vector<16xf32> to vector<16x1xf32>
    %477 = vector.broadcast %476 : vector<16x1xf32> to vector<16x16xf32>
    %478 = arith.cmpf oge, %474, %477 : vector<16x16xf32>
    %c16_i32_152 = arith.constant 16 : i32
    %479 = vector.broadcast %c16_i32_152 : i32 to vector<16x16xi32>
    %480 = arith.select %478, %324, %479 : vector<16x16xi1>, vector<16x16xi32>
    %cst_153 = arith.constant dense<2147483647> : vector<16xi32>
    %481 = vector.multi_reduction <minsi>, %480, %cst_153 [1] : vector<16x16xi32> to vector<16xi32>
    %482 = vector.shape_cast %481 : vector<16xi32> to vector<16x1xi32>
    %483 = vector.broadcast %482 : vector<16x1xi32> to vector<16x16xi32>
    %484 = arith.cmpi eq, %324, %483 : vector<16x16xi32>
    %485 = arith.extui %484 : vector<16x16xi1> to vector<16x16xi32>
    %486 = arith.sitofp %485 : vector<16x16xi32> to vector<16x16xf32>
    %487 = arith.truncf %486 : vector<16x16xf32> to vector<16x16xbf16>
    %cst_154 = arith.constant dense<0.000000e+00> : vector<16x26xf32>
    %488 = tpu.matmul %487, %332, %cst_154 {dimension_numbers = #tpu.dot_dimension_numbers<[1], [0], [0], [1], [0, 0, 1, 1], [], []>} : vector<16x16xbf16>, vector<16x26xbf16>, vector<16x26xf32> -> vector<16x26xf32>
    %489 = arith.addf %488, %331 : vector<16x26xf32>
    %cst_155 = arith.constant 2.000000e-01 : f32
    %490 = vector.broadcast %cst_155 : f32 to vector<16x26xf32>
    %491 = arith.mulf %490, %489 : vector<16x26xf32>
    %492 = arith.maximumf %489, %491 : vector<16x26xf32>
    %493 = arith.truncf %492 : vector<16x26xf32> to vector<16x26xbf16>
    %cst_156 = arith.constant dense<0.000000e+00> : vector<16x32xf32>
    %494 = tpu.matmul %493, %333, %cst_156 {dimension_numbers = #tpu.dot_dimension_numbers<[1], [0], [0], [1], [0, 0, 1, 1], [], []>} : vector<16x26xbf16>, vector<26x32xbf16>, vector<16x32xf32> -> vector<16x32xf32>
    %495 = vector.broadcast %312 : vector<1x32xf32> to vector<16x32xf32>
    %496 = arith.addf %494, %495 : vector<16x32xf32>
    %cst_157 = arith.constant 2.000000e-01 : f32
    %497 = vector.broadcast %cst_157 : f32 to vector<16x32xf32>
    %498 = arith.mulf %497, %496 : vector<16x32xf32>
    %499 = arith.maximumf %496, %498 : vector<16x32xf32>
    %500 = arith.maximumf %472, %499 : vector<16x32xf32>
    %cst_158 = arith.constant -1.000000e+30 : f32
    %501 = vector.broadcast %cst_158 : f32 to vector<16x16xf32>
    %502 = arith.select %484, %501, %474 : vector<16x16xi1>, vector<16x16xf32>
    %cst_159 = arith.constant dense<0xFF800000> : vector<16xf32>
    %503 = vector.multi_reduction <maximumf>, %502, %cst_159 [1] : vector<16x16xf32> to vector<16xf32>
    %504 = vector.shape_cast %503 : vector<16xf32> to vector<16x1xf32>
    %505 = vector.broadcast %504 : vector<16x1xf32> to vector<16x16xf32>
    %506 = arith.cmpf oge, %502, %505 : vector<16x16xf32>
    %c16_i32_160 = arith.constant 16 : i32
    %507 = vector.broadcast %c16_i32_160 : i32 to vector<16x16xi32>
    %508 = arith.select %506, %324, %507 : vector<16x16xi1>, vector<16x16xi32>
    %cst_161 = arith.constant dense<2147483647> : vector<16xi32>
    %509 = vector.multi_reduction <minsi>, %508, %cst_161 [1] : vector<16x16xi32> to vector<16xi32>
    %510 = vector.shape_cast %509 : vector<16xi32> to vector<16x1xi32>
    %511 = vector.broadcast %510 : vector<16x1xi32> to vector<16x16xi32>
    %512 = arith.cmpi eq, %324, %511 : vector<16x16xi32>
    %513 = arith.extui %512 : vector<16x16xi1> to vector<16x16xi32>
    %514 = arith.sitofp %513 : vector<16x16xi32> to vector<16x16xf32>
    %515 = arith.truncf %514 : vector<16x16xf32> to vector<16x16xbf16>
    %cst_162 = arith.constant dense<0.000000e+00> : vector<16x26xf32>
    %516 = tpu.matmul %515, %332, %cst_162 {dimension_numbers = #tpu.dot_dimension_numbers<[1], [0], [0], [1], [0, 0, 1, 1], [], []>} : vector<16x16xbf16>, vector<16x26xbf16>, vector<16x26xf32> -> vector<16x26xf32>
    %517 = arith.addf %516, %331 : vector<16x26xf32>
    %cst_163 = arith.constant 2.000000e-01 : f32
    %518 = vector.broadcast %cst_163 : f32 to vector<16x26xf32>
    %519 = arith.mulf %518, %517 : vector<16x26xf32>
    %520 = arith.maximumf %517, %519 : vector<16x26xf32>
    %521 = arith.truncf %520 : vector<16x26xf32> to vector<16x26xbf16>
    %cst_164 = arith.constant dense<0.000000e+00> : vector<16x32xf32>
    %522 = tpu.matmul %521, %333, %cst_164 {dimension_numbers = #tpu.dot_dimension_numbers<[1], [0], [0], [1], [0, 0, 1, 1], [], []>} : vector<16x26xbf16>, vector<26x32xbf16>, vector<16x32xf32> -> vector<16x32xf32>
    %523 = vector.broadcast %312 : vector<1x32xf32> to vector<16x32xf32>
    %524 = arith.addf %522, %523 : vector<16x32xf32>
    %cst_165 = arith.constant 2.000000e-01 : f32
    %525 = vector.broadcast %cst_165 : f32 to vector<16x32xf32>
    %526 = arith.mulf %525, %524 : vector<16x32xf32>
    %527 = arith.maximumf %524, %526 : vector<16x32xf32>
    %528 = arith.maximumf %500, %527 : vector<16x32xf32>
    %cst_166 = arith.constant -1.000000e+30 : f32
    %529 = vector.broadcast %cst_166 : f32 to vector<16x16xf32>
    %530 = arith.select %512, %529, %502 : vector<16x16xi1>, vector<16x16xf32>
    %cst_167 = arith.constant dense<0xFF800000> : vector<16xf32>
    %531 = vector.multi_reduction <maximumf>, %530, %cst_167 [1] : vector<16x16xf32> to vector<16xf32>
    %532 = vector.shape_cast %531 : vector<16xf32> to vector<16x1xf32>
    %533 = vector.broadcast %532 : vector<16x1xf32> to vector<16x16xf32>
    %534 = arith.cmpf oge, %530, %533 : vector<16x16xf32>
    %c16_i32_168 = arith.constant 16 : i32
    %535 = vector.broadcast %c16_i32_168 : i32 to vector<16x16xi32>
    %536 = arith.select %534, %324, %535 : vector<16x16xi1>, vector<16x16xi32>
    %cst_169 = arith.constant dense<2147483647> : vector<16xi32>
    %537 = vector.multi_reduction <minsi>, %536, %cst_169 [1] : vector<16x16xi32> to vector<16xi32>
    %538 = vector.shape_cast %537 : vector<16xi32> to vector<16x1xi32>
    %539 = vector.broadcast %538 : vector<16x1xi32> to vector<16x16xi32>
    %540 = arith.cmpi eq, %324, %539 : vector<16x16xi32>
    %541 = arith.extui %540 : vector<16x16xi1> to vector<16x16xi32>
    %542 = arith.sitofp %541 : vector<16x16xi32> to vector<16x16xf32>
    %543 = arith.truncf %542 : vector<16x16xf32> to vector<16x16xbf16>
    %cst_170 = arith.constant dense<0.000000e+00> : vector<16x26xf32>
    %544 = tpu.matmul %543, %332, %cst_170 {dimension_numbers = #tpu.dot_dimension_numbers<[1], [0], [0], [1], [0, 0, 1, 1], [], []>} : vector<16x16xbf16>, vector<16x26xbf16>, vector<16x26xf32> -> vector<16x26xf32>
    %545 = arith.addf %544, %331 : vector<16x26xf32>
    %cst_171 = arith.constant 2.000000e-01 : f32
    %546 = vector.broadcast %cst_171 : f32 to vector<16x26xf32>
    %547 = arith.mulf %546, %545 : vector<16x26xf32>
    %548 = arith.maximumf %545, %547 : vector<16x26xf32>
    %549 = arith.truncf %548 : vector<16x26xf32> to vector<16x26xbf16>
    %cst_172 = arith.constant dense<0.000000e+00> : vector<16x32xf32>
    %550 = tpu.matmul %549, %333, %cst_172 {dimension_numbers = #tpu.dot_dimension_numbers<[1], [0], [0], [1], [0, 0, 1, 1], [], []>} : vector<16x26xbf16>, vector<26x32xbf16>, vector<16x32xf32> -> vector<16x32xf32>
    %551 = vector.broadcast %312 : vector<1x32xf32> to vector<16x32xf32>
    %552 = arith.addf %550, %551 : vector<16x32xf32>
    %cst_173 = arith.constant 2.000000e-01 : f32
    %553 = vector.broadcast %cst_173 : f32 to vector<16x32xf32>
    %554 = arith.mulf %553, %552 : vector<16x32xf32>
    %555 = arith.maximumf %552, %554 : vector<16x32xf32>
    %556 = arith.maximumf %528, %555 : vector<16x32xf32>
    %cst_174 = arith.constant -1.000000e+30 : f32
    %557 = vector.broadcast %cst_174 : f32 to vector<16x16xf32>
    %558 = arith.select %540, %557, %530 : vector<16x16xi1>, vector<16x16xf32>
    %cst_175 = arith.constant dense<0xFF800000> : vector<16xf32>
    %559 = vector.multi_reduction <maximumf>, %558, %cst_175 [1] : vector<16x16xf32> to vector<16xf32>
    %560 = vector.shape_cast %559 : vector<16xf32> to vector<16x1xf32>
    %561 = vector.broadcast %560 : vector<16x1xf32> to vector<16x16xf32>
    %562 = arith.cmpf oge, %558, %561 : vector<16x16xf32>
    %c16_i32_176 = arith.constant 16 : i32
    %563 = vector.broadcast %c16_i32_176 : i32 to vector<16x16xi32>
    %564 = arith.select %562, %324, %563 : vector<16x16xi1>, vector<16x16xi32>
    %cst_177 = arith.constant dense<2147483647> : vector<16xi32>
    %565 = vector.multi_reduction <minsi>, %564, %cst_177 [1] : vector<16x16xi32> to vector<16xi32>
    %566 = vector.shape_cast %565 : vector<16xi32> to vector<16x1xi32>
    %567 = vector.broadcast %566 : vector<16x1xi32> to vector<16x16xi32>
    %568 = arith.cmpi eq, %324, %567 : vector<16x16xi32>
    %569 = arith.extui %568 : vector<16x16xi1> to vector<16x16xi32>
    %570 = arith.sitofp %569 : vector<16x16xi32> to vector<16x16xf32>
    %571 = arith.truncf %570 : vector<16x16xf32> to vector<16x16xbf16>
    %cst_178 = arith.constant dense<0.000000e+00> : vector<16x26xf32>
    %572 = tpu.matmul %571, %332, %cst_178 {dimension_numbers = #tpu.dot_dimension_numbers<[1], [0], [0], [1], [0, 0, 1, 1], [], []>} : vector<16x16xbf16>, vector<16x26xbf16>, vector<16x26xf32> -> vector<16x26xf32>
    %573 = arith.addf %572, %331 : vector<16x26xf32>
    %cst_179 = arith.constant 2.000000e-01 : f32
    %574 = vector.broadcast %cst_179 : f32 to vector<16x26xf32>
    %575 = arith.mulf %574, %573 : vector<16x26xf32>
    %576 = arith.maximumf %573, %575 : vector<16x26xf32>
    %577 = arith.truncf %576 : vector<16x26xf32> to vector<16x26xbf16>
    %cst_180 = arith.constant dense<0.000000e+00> : vector<16x32xf32>
    %578 = tpu.matmul %577, %333, %cst_180 {dimension_numbers = #tpu.dot_dimension_numbers<[1], [0], [0], [1], [0, 0, 1, 1], [], []>} : vector<16x26xbf16>, vector<26x32xbf16>, vector<16x32xf32> -> vector<16x32xf32>
    %579 = vector.broadcast %312 : vector<1x32xf32> to vector<16x32xf32>
    %580 = arith.addf %578, %579 : vector<16x32xf32>
    %cst_181 = arith.constant 2.000000e-01 : f32
    %581 = vector.broadcast %cst_181 : f32 to vector<16x32xf32>
    %582 = arith.mulf %581, %580 : vector<16x32xf32>
    %583 = arith.maximumf %580, %582 : vector<16x32xf32>
    %584 = arith.maximumf %556, %583 : vector<16x32xf32>
    %cst_182 = arith.constant -1.000000e+30 : f32
    %585 = vector.broadcast %cst_182 : f32 to vector<16x16xf32>
    %586 = arith.select %568, %585, %558 : vector<16x16xi1>, vector<16x16xf32>
    %cst_183 = arith.constant dense<0xFF800000> : vector<16xf32>
    %587 = vector.multi_reduction <maximumf>, %586, %cst_183 [1] : vector<16x16xf32> to vector<16xf32>
    %588 = vector.shape_cast %587 : vector<16xf32> to vector<16x1xf32>
    %589 = vector.broadcast %588 : vector<16x1xf32> to vector<16x16xf32>
    %590 = arith.cmpf oge, %586, %589 : vector<16x16xf32>
    %c16_i32_184 = arith.constant 16 : i32
    %591 = vector.broadcast %c16_i32_184 : i32 to vector<16x16xi32>
    %592 = arith.select %590, %324, %591 : vector<16x16xi1>, vector<16x16xi32>
    %cst_185 = arith.constant dense<2147483647> : vector<16xi32>
    %593 = vector.multi_reduction <minsi>, %592, %cst_185 [1] : vector<16x16xi32> to vector<16xi32>
    %594 = vector.shape_cast %593 : vector<16xi32> to vector<16x1xi32>
    %595 = vector.broadcast %594 : vector<16x1xi32> to vector<16x16xi32>
    %596 = arith.cmpi eq, %324, %595 : vector<16x16xi32>
    %597 = arith.extui %596 : vector<16x16xi1> to vector<16x16xi32>
    %598 = arith.sitofp %597 : vector<16x16xi32> to vector<16x16xf32>
    %599 = arith.truncf %598 : vector<16x16xf32> to vector<16x16xbf16>
    %cst_186 = arith.constant dense<0.000000e+00> : vector<16x26xf32>
    %600 = tpu.matmul %599, %332, %cst_186 {dimension_numbers = #tpu.dot_dimension_numbers<[1], [0], [0], [1], [0, 0, 1, 1], [], []>} : vector<16x16xbf16>, vector<16x26xbf16>, vector<16x26xf32> -> vector<16x26xf32>
    %601 = arith.addf %600, %331 : vector<16x26xf32>
    %cst_187 = arith.constant 2.000000e-01 : f32
    %602 = vector.broadcast %cst_187 : f32 to vector<16x26xf32>
    %603 = arith.mulf %602, %601 : vector<16x26xf32>
    %604 = arith.maximumf %601, %603 : vector<16x26xf32>
    %605 = arith.truncf %604 : vector<16x26xf32> to vector<16x26xbf16>
    %cst_188 = arith.constant dense<0.000000e+00> : vector<16x32xf32>
    %606 = tpu.matmul %605, %333, %cst_188 {dimension_numbers = #tpu.dot_dimension_numbers<[1], [0], [0], [1], [0, 0, 1, 1], [], []>} : vector<16x26xbf16>, vector<26x32xbf16>, vector<16x32xf32> -> vector<16x32xf32>
    %607 = vector.broadcast %312 : vector<1x32xf32> to vector<16x32xf32>
    %608 = arith.addf %606, %607 : vector<16x32xf32>
    %cst_189 = arith.constant 2.000000e-01 : f32
    %609 = vector.broadcast %cst_189 : f32 to vector<16x32xf32>
    %610 = arith.mulf %609, %608 : vector<16x32xf32>
    %611 = arith.maximumf %608, %610 : vector<16x32xf32>
    %612 = arith.maximumf %584, %611 : vector<16x32xf32>
    %613 = tpu.concatenate %307, %612 in 1 : vector<16x11xf32>, vector<16x32xf32> -> vector<16x43xf32>
    %614 = arith.truncf %613 : vector<16x43xf32> to vector<16x43xbf16>
    %c0_190 = arith.constant 0 : index
    %c0_191 = arith.constant 0 : index
    %615 = vector.load %arg12[%c0_190, %c0_191] : memref<43x37xf32, #tpu.memory_space<vmem>>, vector<43x37xf32>
    %616 = arith.truncf %615 : vector<43x37xf32> to vector<43x37xbf16>
    %cst_192 = arith.constant dense<0.000000e+00> : vector<16x37xf32>
    %617 = tpu.matmul %614, %616, %cst_192 {dimension_numbers = #tpu.dot_dimension_numbers<[1], [0], [0], [1], [0, 0, 1, 1], [], []>} : vector<16x43xbf16>, vector<43x37xbf16>, vector<16x37xf32> -> vector<16x37xf32>
    %c0_193 = arith.constant 0 : index
    %c0_194 = arith.constant 0 : index
    %618 = vector.load %arg13[%c0_193, %c0_194] : memref<1x37xf32, #tpu.memory_space<vmem>>, vector<1x37xf32>
    %619 = vector.broadcast %618 : vector<1x37xf32> to vector<16x37xf32>
    %620 = arith.addf %617, %619 : vector<16x37xf32>
    %cst_195 = arith.constant 2.000000e-01 : f32
    %621 = vector.broadcast %cst_195 : f32 to vector<16x37xf32>
    %622 = arith.mulf %621, %620 : vector<16x37xf32>
    %623 = arith.maximumf %620, %622 : vector<16x37xf32>
    %624 = arith.truncf %623 : vector<16x37xf32> to vector<16x37xbf16>
    %c0_196 = arith.constant 0 : index
    %c0_197 = arith.constant 0 : index
    %625 = vector.load %arg14[%c0_196, %c0_197] : memref<37x32xf32, #tpu.memory_space<vmem>>, vector<37x32xf32>
    %626 = arith.truncf %625 : vector<37x32xf32> to vector<37x32xbf16>
    %cst_198 = arith.constant dense<0.000000e+00> : vector<16x32xf32>
    %627 = tpu.matmul %624, %626, %cst_198 {dimension_numbers = #tpu.dot_dimension_numbers<[1], [0], [0], [1], [0, 0, 1, 1], [], []>} : vector<16x37xbf16>, vector<37x32xbf16>, vector<16x32xf32> -> vector<16x32xf32>
    %c0_199 = arith.constant 0 : index
    %c0_200 = arith.constant 0 : index
    %628 = vector.load %arg15[%c0_199, %c0_200] : memref<1x32xf32, #tpu.memory_space<vmem>>, vector<1x32xf32>
    %629 = vector.broadcast %628 : vector<1x32xf32> to vector<16x32xf32>
    %630 = arith.addf %627, %629 : vector<16x32xf32>
    %cst_201 = arith.constant 2.000000e-01 : f32
    %631 = vector.broadcast %cst_201 : f32 to vector<16x32xf32>
    %632 = arith.mulf %631, %630 : vector<16x32xf32>
    %633 = arith.maximumf %630, %632 : vector<16x32xf32>
    %634 = tpu.transpose %633, [1, 0] : vector<16x32xf32> -> vector<32x16xf32>
    %c0_202 = arith.constant 0 : index
    %c0_203 = arith.constant 0 : index
    %c0_204 = arith.constant 0 : index
    %635 = vector.load %arg16[%c0_202, %c0_203, %c0_204] : memref<1x32x16xf32, #tpu.memory_space<vmem>>, vector<1x32x16xf32>
    %636 = vector.shape_cast %635 : vector<1x32x16xf32> to vector<32x16xf32>
    %637 = vector.shape_cast %634 : vector<32x16xf32> to vector<1x32x16xf32>
    tpu.vector_store %arg16[%c0_202, %c0_203, %c0_204], %637 {strides = array<i32>} : memref<1x32x16xf32, #tpu.memory_space<vmem>>, vector<1x32x16xf32>,
    return
  }
  func.func @transform_0(%arg0: i32) -> (i32, i32, i32) {
    %c0_i32 = arith.constant 0 : i32
    %c0_i32_0 = arith.constant 0 : i32
    %c0_i32_1 = arith.constant 0 : i32
    return %arg0, %c0_i32, %c0_i32_0 : i32, i32, i32
  }
  func.func @transform_1(%arg0: i32) -> (i32, i32) {
    %c0_i32 = arith.constant 0 : i32
    %c0_i32_0 = arith.constant 0 : i32
    %c0_i32_1 = arith.constant 0 : i32
    return %c0_i32, %c0_i32_0 : i32, i32
  }
  func.func @transform_2(%arg0: i32) -> (i32, i32) {
    %c0_i32 = arith.constant 0 : i32
    %c0_i32_0 = arith.constant 0 : i32
    %c0_i32_1 = arith.constant 0 : i32
    return %c0_i32, %c0_i32_0 : i32, i32
  }
  func.func @transform_3(%arg0: i32) -> (i32, i32) {
    %c0_i32 = arith.constant 0 : i32
    %c0_i32_0 = arith.constant 0 : i32
    %c0_i32_1 = arith.constant 0 : i32
    return %c0_i32, %c0_i32_0 : i32, i32
  }
  func.func @transform_4(%arg0: i32) -> (i32, i32) {
    %c0_i32 = arith.constant 0 : i32
    %c0_i32_0 = arith.constant 0 : i32
    %c0_i32_1 = arith.constant 0 : i32
    return %c0_i32, %c0_i32_0 : i32, i32
  }
  func.func @transform_5(%arg0: i32) -> (i32, i32) {
    %c0_i32 = arith.constant 0 : i32
    %c0_i32_0 = arith.constant 0 : i32
    %c0_i32_1 = arith.constant 0 : i32
    return %c0_i32, %c0_i32_0 : i32, i32
  }
  func.func @transform_6(%arg0: i32) -> (i32, i32) {
    %c0_i32 = arith.constant 0 : i32
    %c0_i32_0 = arith.constant 0 : i32
    %c0_i32_1 = arith.constant 0 : i32
    return %c0_i32, %c0_i32_0 : i32, i32
  }
  func.func @transform_7(%arg0: i32) -> (i32, i32) {
    %c0_i32 = arith.constant 0 : i32
    %c0_i32_0 = arith.constant 0 : i32
    %c0_i32_1 = arith.constant 0 : i32
    return %c0_i32, %c0_i32_0 : i32, i32
  }
  func.func @transform_8(%arg0: i32) -> (i32, i32) {
    %c0_i32 = arith.constant 0 : i32
    %c0_i32_0 = arith.constant 0 : i32
    %c0_i32_1 = arith.constant 0 : i32
    return %c0_i32, %c0_i32_0 : i32, i32
  }
  func.func @transform_9(%arg0: i32) -> (i32, i32) {
    %c0_i32 = arith.constant 0 : i32
    %c0_i32_0 = arith.constant 0 : i32
    %c0_i32_1 = arith.constant 0 : i32
    return %c0_i32, %c0_i32_0 : i32, i32
  }
  func.func @transform_10(%arg0: i32) -> (i32, i32) {
    %c0_i32 = arith.constant 0 : i32
    %c0_i32_0 = arith.constant 0 : i32
    %c0_i32_1 = arith.constant 0 : i32
    return %c0_i32, %c0_i32_0 : i32, i32
  }
  func.func @transform_11(%arg0: i32) -> (i32, i32) {
    %c0_i32 = arith.constant 0 : i32
    %c0_i32_0 = arith.constant 0 : i32
    %c0_i32_1 = arith.constant 0 : i32
    return %c0_i32, %c0_i32_0 : i32, i32
  }
  func.func @transform_12(%arg0: i32) -> (i32, i32) {
    %c0_i32 = arith.constant 0 : i32
    %c0_i32_0 = arith.constant 0 : i32
    %c0_i32_1 = arith.constant 0 : i32
    return %c0_i32, %c0_i32_0 : i32, i32
  }
  func.func @transform_13(%arg0: i32) -> (i32, i32) {
    %c0_i32 = arith.constant 0 : i32
    %c0_i32_0 = arith.constant 0 : i32
    %c0_i32_1 = arith.constant 0 : i32
    return %c0_i32, %c0_i32_0 : i32, i32
  }
  func.func @transform_14(%arg0: i32) -> (i32, i32) {
    %c0_i32 = arith.constant 0 : i32
    %c0_i32_0 = arith.constant 0 : i32
    %c0_i32_1 = arith.constant 0 : i32
    return %c0_i32, %c0_i32_0 : i32, i32
  }
  func.func @transform_15(%arg0: i32) -> (i32, i32, i32) {
    %c0_i32 = arith.constant 0 : i32
    %c0_i32_0 = arith.constant 0 : i32
    %c0_i32_1 = arith.constant 0 : i32
    return %arg0, %c0_i32, %c0_i32_0 : i32, i32, i32
  }
}

</mosaic_0001>

<bundles_post_ra>
// kernel: tpu_custom_call.1
= control target key start
LH: loop header
LB: loop body
LE: loop exit
PB: predicated region body
PF: predicated region fallthrough
CT: control target
= control target key end

     0   :  { %s4889_s18 = smov 0   ;;  %s5889_s0 = inlined_call_operand.vmem [shape: f32[2,4,16], index: 0, kind: input, shape index: {}]   ;;  %s5890_s1 = inlined_call_operand.vmem [shape: f32[4,9], index: 1, kind: input, shape index: {}]   ;;  %s5891_s2 = inlined_call_operand.vmem [shape: f32[4,9], index: 2, kind: input, shape index: {}]   ;;  %s5892_s3 = inlined_call_operand.vmem [shape: f32[1,9], index: 3, kind: input, shape index: {}]   ;;  %s5893_s4 = inlined_call_operand.vmem [shape: f32[9,11], index: 4, kind: input, shape index: {}]   ;;  %s5894_s5 = inlined_call_operand.vmem [shape: f32[1,11], index: 5, kind: input, shape index: {}]   ;;  %s5895_s6 = inlined_call_operand.vmem [shape: f32[11,26], index: 6, kind: input, shape index: {}]   ;;  %s5896_s7 = inlined_call_operand.vmem [shape: f32[11,26], index: 7, kind: input, shape index: {}]   ;;  %s5897_s8 = inlined_call_operand.vmem [shape: f32[1,26], index: 8, kind: input, shape index: {}]   ;;  %s5898_s9 = inlined_call_operand.vmem [shape: f32[26,32], index: 9, kind: input, shape index: {}]   ;;  %s5899_s10 = inlined_call_operand.vmem [shape: f32[1,32], index: 10, kind: input, shape index: {}]   ;;  %s5900_s11 = inlined_call_operand.vmem [shape: f32[43,37], index: 11, kind: input, shape index: {}]   ;;  %s5901_s12 = inlined_call_operand.vmem [shape: f32[1,37], index: 12, kind: input, shape index: {}]   ;;  %s5902_s13 = inlined_call_operand.vmem [shape: f32[37,32], index: 13, kind: input, shape index: {}]   ;;  %s5903_s14 = inlined_call_operand.vmem [shape: f32[1,32], index: 14, kind: input, shape index: {}]   ;;  %s5904_s15 = inlined_call_operand.vmem [shape: f32[2,32,16], index: 15, kind: output, shape index: {}]  }
   0x1 LB: > { %s4235_s19 = sadd.s32 4294967295, %s4803_s18   ;;  %p4239_p0 = scmp.ge.s32.totalorder %s4803_s18, 1  ;;  %s4803_s18 = sphi %s4889_s18, %s25_s18  }
   0x2   : > { %p436_p1 = scmp.lt.s32.totalorder %s4803_s18, 3 }
   0x4   : > { %p437_p2 = pnand %p4239_p0, %p436_p1 }
   0x5   : > { %p483_p3 = scmp.lt.s32.totalorder (!%p437_p2), %s4235_s19, 1 }
   0x6   : > { %440 = sbr.rel (%p437_p2) target bundleno = 10772 (0x2a14), region = 80 }
   0xb   : > { %s5906_s19 = smov (!%p483_p3, %s4235_s19), 1  ;;  %v526_v0 = vld [vmem:[%s5890_s1] sm:$0xf]  ;;  %v4805_v2 = vmov 0.0   ;;  %vm671_vm0 = vcmask 1041408   ;;  %vm877_vm1 = vcmask 1044480   ;;  %v658_v37 = vlaneseq }
   0xc   : > { %s4240_s22 = sshll.u32 %s5906_s19, 2  ;;  %v667_v1 = vpack.c.bf16 %v526_v0, %v526_v0  ;;  %4467 = vmatprep.subr.bf16.mxu1 %v4805_v2  ;;  %v4806_v5 = vmov 65535   ;;  %vm4807_vm2 = vmmov 0   ;;  %vm534_vm3 = vcmask 31744   ;;  %v527_v12 = vld [vmem:[%s5891_s2] sm:$0xf] }
   0xd   : > { %s486_s25 = scalar_lea.vmem %s5889_s0, %s4240_s22  ;;  %v4909_v6 = vsel %vm877_vm1, 4294967295, %v4806_v5  ;;  %v4912_v7 = vsel %vm671_vm0, 4294967295, %v4806_v5  ;;  %4469 = vmatprep.mubr.msk.bf16.mxu1 %vm4807_vm2, %v4805_v2  ;;  %vm876_vm4 = vcmask 1043456   ;;  %v529_v15 = vld [vmem:[%s5893_s4] sm:$0xff]  ;;  %v530_v16 = vld [vmem:[%s5893_s4 + $0x8] sm:$0x1]  ;;  %v716_v18 = vpack.c.bf16 %v527_v12, %v527_v12 }
   0xe   : > { %v493_v3 = vld [vmem:[%s486_s25] sm:$0xf]  ;;  %v673_v4 = vsel %vm671_vm0, %v667_v1, 0  ;;  %v878_v19 = vsel %vm876_vm4, 4294967295, %v4806_v5  ;;  %v768_v20 = vpack.c.bf16 %v530_v16, %v529_v15  ;;  %v4958_v38 = vshrl.u32 %v658_v37, 7  ;;  %s4808_s22 = smov 11  }
   0xf   : > { %494 = vxpose.xlu0.b32.start.end [1/1] (short) (narrow) %v493_v3, 16  ;;  %4468 = vmatpush3.bf16.msra.mxu1 %v673_v4  ;;  %v879_v21 = vsel %vm877_vm1, %v878_v19, 0  ;;  %v724_v22 = vsel %vm671_vm0, %v716_v18, 0  ;;  %vm769_vm5 = vcmask 130048   ;;  %v4965_v50 = vand.u32 127, %v658_v37 }
  0x10   : > { %4479 = vmatprep.subr.bf16.mxu1 %v4805_v2  ;;  %v4940_v23 = vand.u32 %v879_v21, %v768_v20  ;;  %v660_v40 = vsub.s32 0, %v4958_v38  ;;  %vm872_vm14 = vcmask 72704  }
  0x8b   : > { %v510_v8 = vpop.trf.xlu0 }
  0x8c   : > { %4464 = vmatprep.mubr.msk.f32.mxu0 %vm534_vm3, %v510_v8  ;;  %v532_v9 = vmul.f32 %v510_v8, %v510_v8 }
  0x8e   : > { %v535_v10 = vsel %vm534_vm3, %v532_v9, 0.0 }
  0x8f   : > { %536 = vadd.xlane.f32.xlu0 %v535_v10  ;;  %v511_v11 = vpop.trf.xlu0 }
  0x90   : > { %4460 = vmatprep.subr.msk.mxu0 %vm534_vm3, %v511_v11  ;;  %v666_v13 = vpack.c.bf16 %v511_v11, %v510_v8  ;;  %v533_v14 = vmul.f32 %v511_v11, %v511_v11 }
  0x91   : > { %4461 = vmatpush3.xpose.msk.msra.mxu0 %vm534_vm3, %v511_v11 }
  0x92   : > { %4462 = vmatprep.subr.msk.mxu0 %vm534_vm3, %v510_v8  ;;  %4470 = vmatmul.mubr.msk.bf16.vlgmr.msra.gmra.mxu1 %vm534_vm3, %v666_v13  ;;  %v538_v17 = vsel %vm534_vm3, %v533_v14, 0.0 }
  0x93   : > { %539 = vadd.xlane.f32.xlu1 %v538_v17  ;;  %4481 = vmatprep.mubr.msk.bf16.mxu1 %vm4807_vm2, %v4805_v2 }
  0x95   : > { %4463 = vmatpush3.xpose.msk.msra.mxu0 %vm534_vm3, %v510_v8 }
  0x96   : > { %4473 = vmatprep.subr.bf16.mxu0 %v4805_v2 }
  0x98   : > { %4465 = vmatmul.mubr.msk.f32.vlgmr.msra.gmra.mxu0 %vm534_vm3, %v511_v11 }
  0x99   : > { %4474 = vmatpush3.bf16.msra.mxu0 %v724_v22  ;;  %4475 = vmatprep.mubr.msk.bf16.mxu0 %vm4807_vm2, %v4805_v2 }
  0x9a   : > { %4485 = vmatprep.subr.bf16.mxu0 %v4805_v2 }
  0x9c   : > { %4476 = vmatmul.mubr.msk.bf16.vlgmr.msra.gmra.mxu0 %vm534_vm3, %v666_v13 }
  0x9d   : > { %4486 = vmatpush3.bf16.msra.mxu0 %v4940_v23  ;;  %4487 = vmatprep.mubr.msk.bf16.mxu0 %vm4807_vm2, %v4805_v2 }
  0x9e   : > { %4497 = vmatprep.subr.bf16.mxu0 %v4805_v2 }
 0x118   : > { %v537_v24 = vpop.xlane.xlu0 %536 }
 0x119   : > { %626 = vxpose.xlu1.b32.start [1/2] (short) (narrow) %v537_v24, 8 }
 0x11c   : > { %v540_v25 = vpop.xlane.xlu1 %539 }
 0x11d   : > { %627 = vxpose.xlu1.b32.end [2/2] (short) (narrow) %v540_v25, 8 }
 0x152   : > { %v709_v26 = vpop.f32.mrf.mxu1 }
 0x154   : > { %v4471_v27 = vpop.f32.mrf.mxu1 }
 0x156   : > { %v712_v28 = vpop.f32.mrf.mxu1 }
 0x157   : > { %v4950_v29 = vpack.c.bf16 %v712_v28, %v709_v26 }
 0x158   : > { %v4466_v30 = vpop.f32.mrf.mxu0  ;;  %v4472_v31 = vpop.f32.mrf.mxu1 }
 0x159   : > { %4480 = vmatpush3.bf16.msra.mxu1 %v4950_v29  ;;  %v623_v41 = vmul.f32 2.0, %v4466_v30 }
 0x15a   : > { %v613_v32 = vpop.f32.mrf.mxu0  ;;  %4491 = vmatprep.subr.bf16.mxu1 %v4805_v2 }
 0x15b   : > { %v622_v39 = vmul.f32 2.0, %v613_v32  ;;  %v625_v45 = vsub.f32 %v623_v41, %v540_v25  ;;  %v4248_v41 = vld [vmem:[%s5892_s3] ss:$0 sm:$0xff] }
 0x15c   : > { %v4954_v33 = vpop.f32.mrf.mxu0 }
 0x15d   : > { %v624_v43 = vsub.f32 %v622_v39, %v537_v24 }
 0x15e   : > { %v4477_v34 = vpop.f32.mrf.mxu0 }
 0x160   : > { %v4956_v35 = vpop.f32.mrf.mxu0 }
 0x162   : > { %v4478_v36 = vpop.f32.mrf.mxu0 }
 0x195   : > { %v642_v42 = vpop.trf.xlu1 }
 0x196   : > { %v661_v44 = vrot.slane %v642_v42, %v660_v40  ;;  %v4998_v42 = vadd.f32 %v4248_v41, %v4954_v33 }
 0x198   : > { %v662_v46 = vsub.f32 %v624_v43, %v661_v44  ;;  %v663_v47 = vsub.f32 %v625_v45, %v661_v44 }
 0x19a   : > { %v770_v48 = vsel %vm769_vm5, %v662_v46, -inf  ;;  %v773_v49 = vsel %vm769_vm5, %v663_v47, -inf }
 0x19b   : > { %771 = vmax.xlane.f32.xlu0 %v770_v48 }
 0x19f   : > { %774 = vmax.xlane.f32.xlu0 %v773_v49 }
 0x224   : > { %v772_v51 = vpop.xlane.xlu0 %771 }
 0x225   : > { %vm776_vm6 = vcmp.ge.f32.partialorder %v662_v46, %v772_v51 }
 0x226   : > { %v778_v52 = vsel %vm776_vm6, %v4965_v50, 16 }
 0x227   : > { %v780_v53 = vsel %vm769_vm5, %v778_v52, 2147483647 }
 0x228   : > { %v775_v54 = vpop.xlane.xlu0 %774  ;;  %v782_v55 = vshra.s32 %v780_v53, 16  ;;  %v781_v61 = vand.u32 65535, %v780_v53 }
 0x229   : > { %vm777_vm7 = vcmp.ge.f32.partialorder %v663_v47, %v775_v54 }
 0x22a   : > { %v779_v56 = vsel %vm777_vm7, %v4965_v50, 16  ;;  %v784_v57 = vcvt.s32.f32 %v782_v55  ;;  %v783_v63 = vcvt.s32.f32 %v781_v61 }
 0x22b   : > { %v795_v58 = vsel %vm769_vm5, %v779_v56, 2147483647 }
 0x22c   : > { %785 = vmin.xlane.f32.xlu1 %v784_v57  ;;  %v797_v59 = vshra.s32 %v795_v58, 16  ;;  %v796_v0 = vand.u32 65535, %v795_v58 }
 0x22e   : > { %v799_v60 = vcvt.s32.f32 %v797_v59  ;;  %v798_v4 = vcvt.s32.f32 %v796_v0 }
 0x230   : > { %800 = vmin.xlane.f32.xlu0 %v799_v60 }
 0x2b5   : > { %v786_v62 = vpop.xlane.xlu1 %785 }
 0x2b6   : > { %vm787_vm8 = vcmp.eq.f32.partialorder %v784_v57, %v786_v62  ;;  %v792_v8 = vcvt.f32.s32 %v786_v62 }
 0x2b7   : > { %v788_v1 = vsel %vm787_vm8, %v783_v63, inf }
 0x2b8   : > { %789 = vmin.xlane.f32.xlu0 %v788_v1  ;;  %v793_v10 = vshll.u32 %v792_v8, 16 }
 0x2b9   : > { %v801_v3 = vpop.xlane.xlu0 %800 }
 0x2ba   : > { %vm802_vm9 = vcmp.eq.f32.partialorder %v799_v60, %v801_v3  ;;  %v807_v11 = vcvt.f32.s32 %v801_v3 }
 0x2bb   : > { %v803_v5 = vsel %vm802_vm9, %v798_v4, inf }
 0x2bc   : > { %804 = vmin.xlane.f32.xlu0 %v803_v5  ;;  %v808_v15 = vshll.u32 %v807_v11, 16 }
 0x341   : > { %v790_v9 = vpop.xlane.xlu0 %789 }
 0x342   : > { %v791_v12 = vcvt.f32.s32 %v790_v9 }
 0x344   : > { %v794_v13 = vadd.s32 %v793_v10, %v791_v12 }
 0x345   : > { %v805_v14 = vpop.xlane.xlu0 %804 }
 0x346   : > { %v806_v16 = vcvt.f32.s32 %v805_v14  ;;  %vm810_vm10 = vcmp.eq.s32.totalorder %v4965_v50, %v794_v13 }
 0x347   : > { %v4972_v17 = vsel %vm810_vm10, -1e+30, %v662_v46  ;;  %v4250_v20 = vsel %vm810_vm10, 1.0, %v4805_v2  ;;  %v5002_v46 = vadd.f32 %v4248_v41, %v4956_v35 }
 0x348   : > { %v809_v18 = vadd.s32 %v808_v15, %v806_v16  ;;  %v930_v19 = vsel %vm769_vm5, %v4972_v17, -inf }
 0x349   : > { %931 = vmax.xlane.f32.xlu0 %v930_v19 }
 0x34a   : > { %vm811_vm11 = vcmp.eq.s32.totalorder %v4965_v50, %v809_v18 }
 0x34b   : > { %v4978_v21 = vsel %vm811_vm11, -1e+30, %v663_v47  ;;  %v4251_v22 = vsel %vm811_vm11, 1.0, %v4805_v2 }
 0x34c   : > { %v933_v24 = vsel %vm769_vm5, %v4978_v21, -inf  ;;  %v816_v25 = vpack.c.bf16 %v4251_v22, %v4250_v20 }
 0x34d   : > { %934 = vmax.xlane.f32.xlu0 %v933_v24 }
 0x34e   : > { %4482 = vmatmul.mubr.msk.bf16.vlgmr.msra.gmra.mxu1 %vm769_vm5, %v816_v25 }
 0x34f   : > { %4492 = vmatpush3.bf16.msra.mxu1 %v4950_v29  ;;  %4493 = vmatprep.mubr.msk.bf16.mxu1 %vm4807_vm2, %v4805_v2 }
 0x350   : > { %4503 = vmatprep.subr.bf16.mxu1 %v4805_v2 }
 0x3d2   : > { %v932_v26 = vpop.xlane.xlu0 %931 }
 0x3d3   : > { %vm936_vm12 = vcmp.ge.f32.partialorder %v4972_v17, %v932_v26 }
 0x3d4   : > { %v938_v27 = vsel %vm936_vm12, %v4965_v50, 16 }
 0x3d5   : > { %v940_v28 = vsel %vm769_vm5, %v938_v27, 2147483647 }
 0x3d6   : > { %v935_v30 = vpop.xlane.xlu0 %934  ;;  %v942_v31 = vshra.s32 %v940_v28, 16  ;;  %v941_v33 = vand.u32 65535, %v940_v28 }
 0x3d7   : > { %vm937_vm13 = vcmp.ge.f32.partialorder %v4978_v21, %v935_v30 }
 0x3d8   : > { %v939_v32 = vsel %vm937_vm13, %v4965_v50, 16  ;;  %v944_v34 = vcvt.s32.f32 %v942_v31  ;;  %v943_v56 = vcvt.s32.f32 %v941_v33 }
 0x3d9   : > { %v955_v36 = vsel %vm769_vm5, %v939_v32, 2147483647 }
 0x3da   : > { %945 = vmin.xlane.f32.xlu0 %v944_v34  ;;  %v957_v37 = vshra.s32 %v955_v36, 16  ;;  %v956_v57 = vand.u32 65535, %v955_v36 }
 0x3dc   : > { %v959_v39 = vcvt.s32.f32 %v957_v37  ;;  %v958_v60 = vcvt.s32.f32 %v956_v57 }
 0x3de   : > { %960 = vmin.xlane.f32.xlu0 %v959_v39 }
 0x40e   : > { %v854_v43 = vpop.f32.mrf.mxu1 }
 0x40f   : > { %v855_v44 = vadd.f32 %v854_v43, %v4998_v42 }
 0x410   : > { %v4483_v45 = vpop.f32.mrf.mxu1 }
 0x411   : > { %v861_v48 = vmul.f32 0.2, %v855_v44 }
 0x412   : > { %v857_v47 = vpop.f32.mrf.mxu1 }
 0x413   : > { %v858_v49 = vadd.f32 %v857_v47, %v5002_v46  ;;  %v863_v53 = vmax.f32 %v855_v44, %v861_v48 }
 0x414   : > { %v4484_v51 = vpop.f32.mrf.mxu1 }
 0x415   : > { %v862_v52 = vmul.f32 0.2, %v858_v49 }
 0x417   : > { %v864_v54 = vmax.f32 %v858_v49, %v862_v52 }
 0x419   : > { %v865_v55 = vpack.c.bf16 %v864_v54, %v863_v53 }
 0x41b   : > { %4488 = vmatmul.mubr.msk.bf16.vlgmr.msra.gmra.mxu0 %vm872_vm14, %v865_v55 }
 0x41c   : > { %4498 = vmatpush3.bf16.msra.mxu0 %v4940_v23  ;;  %4499 = vmatprep.mubr.msk.bf16.mxu0 %vm4807_vm2, %v4805_v2 }
 0x41d   : > { %4509 = vmatprep.subr.bf16.mxu0 %v4805_v2 }
 0x463   : > { %v946_v35 = vpop.xlane.xlu0 %945 }
 0x464   : > { %vm947_vm15 = vcmp.eq.f32.partialorder %v944_v34, %v946_v35  ;;  %v952_v3 = vcvt.f32.s32 %v946_v35 }
 0x465   : > { %v948_v58 = vsel %vm947_vm15, %v943_v56, inf }
 0x466   : > { %949 = vmin.xlane.f32.xlu0 %v948_v58  ;;  %v953_v5 = vshll.u32 %v952_v3, 16  ;;  %v5049_v58 = vld [vmem:[%s5894_s5] ss:$0 sm:$0xff] }
 0x467   : > { %v961_v59 = vpop.xlane.xlu0 %960 }
 0x468   : > { %vm962_vm0 = vcmp.eq.f32.partialorder %v959_v39, %v961_v59  ;;  %v967_v8 = vcvt.f32.s32 %v961_v59 }
 0x469   : > { %v963_v61 = vsel %vm962_vm0, %v958_v60, inf }
 0x46a   : > { %964 = vmin.xlane.f32.xlu0 %v963_v61  ;;  %v968_v12 = vshll.u32 %v967_v8, 16 }
 0x4db   : > { %v5010_v62 = vpop.f32.mrf.mxu0 }
 0x4dc   : > { %v918_v59 = vadd.f32 %v5049_v58, %v5010_v62 }
 0x4dd   : > { %v4489_v63 = vpop.f32.mrf.mxu0 }
 0x4de   : > { %v924_v61 = vmul.f32 0.2, %v918_v59 }
 0x4df   : > { %v5012_v0 = vpop.f32.mrf.mxu0 }
 0x4e0   : > { %v921_v63 = vadd.f32 %v5049_v58, %v5012_v0  ;;  %v926_v8 = vmax.f32 %v918_v59, %v924_v61 }
 0x4e1   : > { %v4490_v1 = vpop.f32.mrf.mxu0 }
 0x4ef   : > { %v950_v4 = vpop.xlane.xlu0 %949 }
 0x4f0   : > { %v951_v9 = vcvt.f32.s32 %v950_v4 }
 0x4f2   : > { %v954_v10 = vadd.s32 %v953_v5, %v951_v9  ;;  %v925_v9 = vmul.f32 0.2, %v921_v63 }
 0x4f3   : > { %v965_v11 = vpop.xlane.xlu0 %964 }
 0x4f4   : > { %v966_v13 = vcvt.f32.s32 %v965_v11  ;;  %vm970_vm3 = vcmp.eq.s32.totalorder %v4965_v50, %v954_v10  ;;  %v927_v62 = vmax.f32 %v921_v63, %v925_v9 }
 0x4f5   : > { %v5016_v14 = vsel %vm970_vm3, -1e+30, %v4972_v17  ;;  %v4255_v18 = vsel %vm970_vm3, 1.0, %v4805_v2 }
 0x4f6   : > { %v969_v15 = vadd.s32 %v968_v12, %v966_v13  ;;  %v1078_v16 = vsel %vm769_vm5, %v5016_v14, -inf }
 0x4f7   : > { %1079 = vmax.xlane.f32.xlu0 %v1078_v16 }
 0x4f8   : > { %vm971_vm4 = vcmp.eq.s32.totalorder %v4965_v50, %v969_v15 }
 0x4f9   : > { %v5023_v19 = vsel %vm971_vm4, -1e+30, %v4978_v21  ;;  %v4256_v20 = vsel %vm971_vm4, 1.0, %v4805_v2 }
 0x4fa   : > { %v1081_v22 = vsel %vm769_vm5, %v5023_v19, -inf  ;;  %v976_v24 = vpack.c.bf16 %v4256_v20, %v4255_v18 }
 0x4fb   : > { %1082 = vmax.xlane.f32.xlu1 %v1081_v22 }
 0x4fc   : > { %4494 = vmatmul.mubr.msk.bf16.vlgmr.msra.gmra.mxu1 %vm769_vm5, %v976_v24 }
 0x4fd   : > { %4504 = vmatpush3.bf16.msra.mxu1 %v4950_v29  ;;  %4505 = vmatprep.mubr.msk.bf16.mxu1 %vm4807_vm2, %v4805_v2 }
 0x4fe   : > { %4515 = vmatprep.subr.bf16.mxu1 %v4805_v2 }
 0x580   : > { %v1080_v17 = vpop.xlane.xlu0 %1079 }
 0x581   : > { %vm1084_vm6 = vcmp.ge.f32.partialorder %v5016_v14, %v1080_v17 }
 0x582   : > { %v1086_v21 = vsel %vm1084_vm6, %v4965_v50, 16 }
 0x583   : > { %v1088_v25 = vsel %vm769_vm5, %v1086_v21, 2147483647 }
 0x584   : > { %v1083_v26 = vpop.xlane.xlu1 %1082  ;;  %v1090_v27 = vshra.s32 %v1088_v25, 16  ;;  %v1089_v52 = vand.u32 65535, %v1088_v25 }
 0x585   : > { %vm1085_vm7 = vcmp.ge.f32.partialorder %v5023_v19, %v1083_v26 }
 0x586   : > { %v1087_v28 = vsel %vm1085_vm7, %v4965_v50, 16  ;;  %v1092_v30 = vcvt.s32.f32 %v1090_v27  ;;  %v1091_v54 = vcvt.s32.f32 %v1089_v52 }
 0x587   : > { %v1103_v31 = vsel %vm769_vm5, %v1087_v28, 2147483647 }
 0x588   : > { %1093 = vmin.xlane.f32.xlu0 %v1092_v30  ;;  %v1105_v32 = vshra.s32 %v1103_v31, 16  ;;  %v1104_v55 = vand.u32 65535, %v1103_v31 }
 0x58a   : > { %v1107_v34 = vcvt.s32.f32 %v1105_v32  ;;  %v1106_v56 = vcvt.s32.f32 %v1104_v55 }
 0x58c   : > { %1108 = vmin.xlane.f32.xlu1 %v1107_v34 }
 0x5bc   : > { %v1014_v36 = vpop.f32.mrf.mxu1 }
 0x5bd   : > { %v1015_v37 = vadd.f32 %v1014_v36, %v4998_v42 }
 0x5be   : > { %v4495_v39 = vpop.f32.mrf.mxu1 }
 0x5bf   : > { %v1021_v43 = vmul.f32 0.2, %v1015_v37 }
 0x5c0   : > { %v1017_v41 = vpop.f32.mrf.mxu1 }
 0x5c1   : > { %v1018_v44 = vadd.f32 %v1017_v41, %v5002_v46  ;;  %v1023_v48 = vmax.f32 %v1015_v37, %v1021_v43 }
 0x5c2   : > { %v4496_v45 = vpop.f32.mrf.mxu1 }
 0x5c3   : > { %v1022_v47 = vmul.f32 0.2, %v1018_v44 }
 0x5c5   : > { %v1024_v49 = vmax.f32 %v1018_v44, %v1022_v47 }
 0x5c7   : > { %v1025_v51 = vpack.c.bf16 %v1024_v49, %v1023_v48 }
 0x5c9   : > { %4500 = vmatmul.mubr.msk.bf16.vlgmr.msra.gmra.mxu0 %vm872_vm14, %v1025_v51 }
 0x5ca   : > { %4510 = vmatpush3.bf16.msra.mxu0 %v4940_v23  ;;  %4511 = vmatprep.mubr.msk.bf16.mxu0 %vm4807_vm2, %v4805_v2 }
 0x5cb   : > { %4521 = vmatprep.subr.bf16.mxu0 %v4805_v2 }
 0x611   : > { %v1094_v53 = vpop.xlane.xlu0 %1093 }
 0x612   : > { %vm1095_vm8 = vcmp.eq.f32.partialorder %v1092_v30, %v1094_v53  ;;  %v1100_v20 = vcvt.f32.s32 %v1094_v53 }
 0x613   : > { %v1096_v33 = vsel %vm1095_vm8, %v1091_v54, inf }
 0x614   : > { %1097 = vmin.xlane.f32.xlu0 %v1096_v33  ;;  %v1101_v22 = vshll.u32 %v1100_v20, 16 }
 0x615   : > { %v1109_v35 = vpop.xlane.xlu1 %1108 }
 0x616   : > { %vm1110_vm9 = vcmp.eq.f32.partialorder %v1107_v34, %v1109_v35  ;;  %v1115_v24 = vcvt.f32.s32 %v1109_v35 }
 0x617   : > { %v1111_v57 = vsel %vm1110_vm9, %v1106_v56, inf }
 0x618   : > { %1112 = vmin.xlane.f32.xlu1 %v1111_v57  ;;  %v1116_v26 = vshll.u32 %v1115_v24, 16 }
 0x689   : > { %v1063_v60 = vpop.f32.mrf.mxu0 }
 0x68a   : > { %v1064_v1 = vadd.f32 %v5049_v58, %v1063_v60 }
 0x68b   : > { %v4501_v3 = vpop.f32.mrf.mxu0 }
 0x68c   : > { %v1070_v4 = vmul.f32 0.2, %v1064_v1 }
 0x68d   : > { %v1066_v5 = vpop.f32.mrf.mxu0 }
 0x68e   : > { %v1072_v10 = vmax.f32 %v1064_v1, %v1070_v4  ;;  %v1067_v11 = vadd.f32 %v5049_v58, %v1066_v5 }
 0x68f   : > { %v4502_v12 = vpop.f32.mrf.mxu0 }
 0x690   : > { %v5057_v13 = vmax.f32 %v926_v8, %v1072_v10  ;;  %v1071_v15 = vmul.f32 0.2, %v1067_v11 }
 0x692   : > { %v1073_v16 = vmax.f32 %v1067_v11, %v1071_v15 }
 0x694   : > { %v5059_v18 = vmax.f32 %v927_v62, %v1073_v16 }
 0x69d   : > { %v1098_v0 = vpop.xlane.xlu0 %1097 }
 0x69e   : > { %v1099_v17 = vcvt.f32.s32 %v1098_v0 }
 0x6a0   : > { %v1102_v21 = vadd.s32 %v1101_v22, %v1099_v17 }
 0x6a1   : > { %v1113_v25 = vpop.xlane.xlu1 %1112 }
 0x6a2   : > { %v1114_v27 = vcvt.f32.s32 %v1113_v25  ;;  %vm1118_vm10 = vcmp.eq.s32.totalorder %v4965_v50, %v1102_v21 }
 0x6a3   : > { %v5063_v28 = vsel %vm1118_vm10, -1e+30, %v5016_v14  ;;  %v4259_v32 = vsel %vm1118_vm10, 1.0, %v4805_v2 }
 0x6a4   : > { %v1117_v30 = vadd.s32 %v1116_v26, %v1114_v27  ;;  %v1226_v31 = vsel %vm769_vm5, %v5063_v28, -inf }
 0x6a5   : > { %1227 = vmax.xlane.f32.xlu0 %v1226_v31 }
 0x6a6   : > { %vm1119_vm11 = vcmp.eq.s32.totalorder %v4965_v50, %v1117_v30 }
 0x6a7   : > { %v5070_v34 = vsel %vm1119_vm11, -1e+30, %v5023_v19  ;;  %v4260_v36 = vsel %vm1119_vm11, 1.0, %v4805_v2 }
 0x6a8   : > { %v1229_v37 = vsel %vm769_vm5, %v5070_v34, -inf  ;;  %v1124_v39 = vpack.c.bf16 %v4260_v36, %v4259_v32 }
 0x6a9   : > { %1230 = vmax.xlane.f32.xlu1 %v1229_v37 }
 0x6aa   : > { %4506 = vmatmul.mubr.msk.bf16.vlgmr.msra.gmra.mxu1 %vm769_vm5, %v1124_v39 }
 0x6ab   : > { %4516 = vmatpush3.bf16.msra.mxu1 %v4950_v29  ;;  %4517 = vmatprep.mubr.msk.bf16.mxu1 %vm4807_vm2, %v4805_v2 }
 0x6ac   : > { %4527 = vmatprep.subr.bf16.mxu1 %v4805_v2 }
 0x72e   : > { %v1228_v14 = vpop.xlane.xlu0 %1227 }
 0x72f   : > { %vm1232_vm12 = vcmp.ge.f32.partialorder %v5063_v28, %v1228_v14 }
 0x730   : > { %v1234_v19 = vsel %vm1232_vm12, %v4965_v50, 16 }
 0x731   : > { %v1236_v41 = vsel %vm769_vm5, %v1234_v19, 2147483647 }
 0x732   : > { %v1231_v43 = vpop.xlane.xlu1 %1230  ;;  %v1238_v44 = vshra.s32 %v1236_v41, 16  ;;  %v1237_v63 = vand.u32 65535, %v1236_v41 }
 0x733   : > { %vm1233_vm13 = vcmp.ge.f32.partialorder %v5070_v34, %v1231_v43 }
 0x734   : > { %v1235_v45 = vsel %vm1233_vm13, %v4965_v50, 16  ;;  %v1240_v47 = vcvt.s32.f32 %v1238_v44  ;;  %v1239_v3 = vcvt.s32.f32 %v1237_v63 }
 0x735   : > { %v1251_v48 = vsel %vm769_vm5, %v1235_v45, 2147483647 }
 0x736   : > { %1241 = vmin.xlane.f32.xlu0 %v1240_v47  ;;  %v1253_v49 = vshra.s32 %v1251_v48, 16  ;;  %v1252_v4 = vand.u32 65535, %v1251_v48 }
 0x738   : > { %v1255_v51 = vcvt.s32.f32 %v1253_v49  ;;  %v1254_v9 = vcvt.s32.f32 %v1252_v4 }
 0x73a   : > { %1256 = vmin.xlane.f32.xlu1 %v1255_v51 }
 0x76a   : > { %v1162_v52 = vpop.f32.mrf.mxu1 }
 0x76b   : > { %v1163_v53 = vadd.f32 %v1162_v52, %v4998_v42 }
 0x76c   : > { %v4507_v54 = vpop.f32.mrf.mxu1 }
 0x76d   : > { %v1169_v33 = vmul.f32 0.2, %v1163_v53 }
 0x76e   : > { %v1165_v55 = vpop.f32.mrf.mxu1 }
 0x76f   : > { %v1166_v35 = vadd.f32 %v1165_v55, %v5002_v46  ;;  %v1171_v59 = vmax.f32 %v1163_v53, %v1169_v33 }
 0x770   : > { %v4508_v56 = vpop.f32.mrf.mxu1 }
 0x771   : > { %v1170_v57 = vmul.f32 0.2, %v1166_v35 }
 0x773   : > { %v1172_v60 = vmax.f32 %v1166_v35, %v1170_v57 }
 0x775   : > { %v1173_v61 = vpack.c.bf16 %v1172_v60, %v1171_v59 }
 0x777   : > { %4512 = vmatmul.mubr.msk.bf16.vlgmr.msra.gmra.mxu0 %vm872_vm14, %v1173_v61 }
 0x778   : > { %4522 = vmatpush3.bf16.msra.mxu0 %v4940_v23  ;;  %4523 = vmatprep.mubr.msk.bf16.mxu0 %vm4807_vm2, %v4805_v2 }
 0x779   : > { %4533 = vmatprep.subr.bf16.mxu0 %v4805_v2 }
 0x7bf   : > { %v1242_v1 = vpop.xlane.xlu0 %1241 }
 0x7c0   : > { %vm1243_vm15 = vcmp.eq.f32.partialorder %v1240_v47, %v1242_v1  ;;  %v1248_v26 = vcvt.f32.s32 %v1242_v1 }
 0x7c1   : > { %v1244_v5 = vsel %vm1243_vm15, %v1239_v3, inf }
 0x7c2   : > { %1245 = vmin.xlane.f32.xlu0 %v1244_v5  ;;  %v1249_v30 = vshll.u32 %v1248_v26, 16 }
 0x7c3   : > { %v1257_v8 = vpop.xlane.xlu1 %1256 }
 0x7c4   : > { %vm1258_vm0 = vcmp.eq.f32.partialorder %v1255_v51, %v1257_v8  ;;  %v1263_v31 = vcvt.f32.s32 %v1257_v8 }
 0x7c5   : > { %v1259_v10 = vsel %vm1258_vm0, %v1254_v9, inf }
 0x7c6   : > { %1260 = vmin.xlane.f32.xlu1 %v1259_v10  ;;  %v1264_v39 = vshll.u32 %v1263_v31, 16 }
 0x837   : > { %v1211_v11 = vpop.f32.mrf.mxu0 }
 0x838   : > { %v1212_v12 = vadd.f32 %v5049_v58, %v1211_v11 }
 0x839   : > { %v4513_v15 = vpop.f32.mrf.mxu0 }
 0x83a   : > { %v1218_v62 = vmul.f32 0.2, %v1212_v12 }
 0x83b   : > { %v1214_v16 = vpop.f32.mrf.mxu0 }
 0x83c   : > { %v1220_v20 = vmax.f32 %v1212_v12, %v1218_v62  ;;  %v1215_v0 = vadd.f32 %v5049_v58, %v1214_v16 }
 0x83d   : > { %v4514_v22 = vpop.f32.mrf.mxu0 }
 0x83e   : > { %v5096_v24 = vmax.f32 %v5057_v13, %v1220_v20  ;;  %v1219_v17 = vmul.f32 0.2, %v1215_v0 }
 0x840   : > { %v1221_v21 = vmax.f32 %v1215_v0, %v1219_v17 }
 0x842   : > { %v5099_v25 = vmax.f32 %v5059_v18, %v1221_v21 }
 0x84b   : > { %v1246_v27 = vpop.xlane.xlu0 %1245 }
 0x84c   : > { %v1247_v32 = vcvt.f32.s32 %v1246_v27 }
 0x84e   : > { %v1250_v36 = vadd.s32 %v1249_v30, %v1247_v32 }
 0x84f   : > { %v1261_v37 = vpop.xlane.xlu1 %1260 }
 0x850   : > { %v1262_v14 = vcvt.f32.s32 %v1261_v37  ;;  %vm1266_vm3 = vcmp.eq.s32.totalorder %v4965_v50, %v1250_v36 }
 0x851   : > { %v5103_v19 = vsel %vm1266_vm3, -1e+30, %v5063_v28  ;;  %v4263_v18 = vsel %vm1266_vm3, 1.0, %v4805_v2 }
 0x852   : > { %v1265_v13 = vadd.s32 %v1264_v39, %v1262_v14  ;;  %v1374_v41 = vsel %vm769_vm5, %v5103_v19, -inf }
 0x853   : > { %1375 = vmax.xlane.f32.xlu0 %v1374_v41 }
 0x854   : > { %vm1267_vm4 = vcmp.eq.s32.totalorder %v4965_v50, %v1265_v13 }
 0x855   : > { %v5110_v43 = vsel %vm1267_vm4, -1e+30, %v5070_v34  ;;  %v4264_v44 = vsel %vm1267_vm4, 1.0, %v4805_v2 }
 0x856   : > { %v1377_v45 = vsel %vm769_vm5, %v5110_v43, -inf  ;;  %v1272_v47 = vpack.c.bf16 %v4264_v44, %v4263_v18 }
 0x857   : > { %1378 = vmax.xlane.f32.xlu1 %v1377_v45 }
 0x858   : > { %4518 = vmatmul.mubr.msk.bf16.vlgmr.msra.gmra.mxu1 %vm769_vm5, %v1272_v47 }
 0x859   : > { %4528 = vmatpush3.bf16.msra.mxu1 %v4950_v29  ;;  %4529 = vmatprep.mubr.msk.bf16.mxu1 %vm4807_vm2, %v4805_v2 }
 0x85a   : > { %4539 = vmatprep.subr.bf16.mxu1 %v4805_v2 }
 0x8dc   : > { %v1376_v28 = vpop.xlane.xlu0 %1375 }
 0x8dd   : > { %vm1380_vm6 = vcmp.ge.f32.partialorder %v5103_v19, %v1376_v28 }
 0x8de   : > { %v1382_v34 = vsel %vm1380_vm6, %v4965_v50, 16 }
 0x8df   : > { %v1384_v48 = vsel %vm769_vm5, %v1382_v34, 2147483647 }
 0x8e0   : > { %v1379_v49 = vpop.xlane.xlu1 %1378  ;;  %v1386_v51 = vshra.s32 %v1384_v48, 16  ;;  %v1385_v8 = vand.u32 65535, %v1384_v48 }
 0x8e1   : > { %vm1381_vm7 = vcmp.ge.f32.partialorder %v5110_v43, %v1379_v49 }
 0x8e2   : > { %v1383_v52 = vsel %vm1381_vm7, %v4965_v50, 16  ;;  %v1388_v53 = vcvt.s32.f32 %v1386_v51  ;;  %v1387_v10 = vcvt.s32.f32 %v1385_v8 }
 0x8e3   : > { %v1399_v54 = vsel %vm769_vm5, %v1383_v52, 2147483647 }
 0x8e4   : > { %1389 = vmin.xlane.f32.xlu0 %v1388_v53  ;;  %v1401_v55 = vshra.s32 %v1399_v54, 16  ;;  %v1400_v11 = vand.u32 65535, %v1399_v54 }
 0x8e6   : > { %v1403_v33 = vcvt.s32.f32 %v1401_v55  ;;  %v1402_v62 = vcvt.s32.f32 %v1400_v11 }
 0x8e8   : > { %1404 = vmin.xlane.f32.xlu1 %v1403_v33 }
 0x918   : > { %v1310_v35 = vpop.f32.mrf.mxu1 }
 0x919   : > { %v1311_v56 = vadd.f32 %v1310_v35, %v4998_v42 }
 0x91a   : > { %v4519_v57 = vpop.f32.mrf.mxu1 }
 0x91b   : > { %v1317_v60 = vmul.f32 0.2, %v1311_v56 }
 0x91c   : > { %v1313_v59 = vpop.f32.mrf.mxu1 }
 0x91d   : > { %v1314_v61 = vadd.f32 %v1313_v59, %v5002_v46  ;;  %v1319_v3 = vmax.f32 %v1311_v56, %v1317_v60 }
 0x91e   : > { %v4520_v63 = vpop.f32.mrf.mxu1 }
 0x91f   : > { %v1318_v1 = vmul.f32 0.2, %v1314_v61 }
 0x921   : > { %v1320_v4 = vmax.f32 %v1314_v61, %v1318_v1 }
 0x923   : > { %v1321_v5 = vpack.c.bf16 %v1320_v4, %v1319_v3 }
 0x925   : > { %4524 = vmatmul.mubr.msk.bf16.vlgmr.msra.gmra.mxu0 %vm872_vm14, %v1321_v5 }
 0x926   : > { %4534 = vmatpush3.bf16.msra.mxu0 %v4940_v23  ;;  %4535 = vmatprep.mubr.msk.bf16.mxu0 %vm4807_vm2, %v4805_v2 }
 0x927   : > { %4545 = vmatprep.subr.bf16.mxu0 %v4805_v2 }
 0x96d   : > { %v1390_v9 = vpop.xlane.xlu0 %1389 }
 0x96e   : > { %vm1391_vm8 = vcmp.eq.f32.partialorder %v1388_v53, %v1390_v9  ;;  %v1396_v39 = vcvt.f32.s32 %v1390_v9 }
 0x96f   : > { %v1392_v12 = vsel %vm1391_vm8, %v1387_v10, inf }
 0x970   : > { %1393 = vmin.xlane.f32.xlu0 %v1392_v12  ;;  %v1397_v13 = vshll.u32 %v1396_v39, 16 }
 0x971   : > { %v1405_v15 = vpop.xlane.xlu1 %1404 }
 0x972   : > { %vm1406_vm9 = vcmp.eq.f32.partialorder %v1403_v33, %v1405_v15  ;;  %v1411_v41 = vcvt.f32.s32 %v1405_v15 }
 0x973   : > { %v1407_v16 = vsel %vm1406_vm9, %v1402_v62, inf }
 0x974   : > { %1408 = vmin.xlane.f32.xlu1 %v1407_v16  ;;  %v1412_v47 = vshll.u32 %v1411_v41, 16 }
 0x9e5   : > { %v1359_v20 = vpop.f32.mrf.mxu0 }
 0x9e6   : > { %v1360_v0 = vadd.f32 %v5049_v58, %v1359_v20 }
 0x9e7   : > { %v4525_v22 = vpop.f32.mrf.mxu0 }
 0x9e8   : > { %v1366_v17 = vmul.f32 0.2, %v1360_v0 }
 0x9e9   : > { %v1362_v21 = vpop.f32.mrf.mxu0 }
 0x9ea   : > { %v1368_v26 = vmax.f32 %v1360_v0, %v1366_v17  ;;  %v1363_v27 = vadd.f32 %v5049_v58, %v1362_v21 }
 0x9eb   : > { %v4526_v30 = vpop.f32.mrf.mxu0 }
 0x9ec   : > { %v5136_v31 = vmax.f32 %v5096_v24, %v1368_v26  ;;  %v1367_v32 = vmul.f32 0.2, %v1363_v27 }
 0x9ee   : > { %v1369_v36 = vmax.f32 %v1363_v27, %v1367_v32 }
 0x9f0   : > { %v5139_v37 = vmax.f32 %v5099_v25, %v1369_v36 }
 0x9f9   : > { %v1394_v14 = vpop.xlane.xlu0 %1393 }
 0x9fa   : > { %v1395_v18 = vcvt.f32.s32 %v1394_v14 }
 0x9fc   : > { %v1398_v44 = vadd.s32 %v1397_v13, %v1395_v18 }
 0x9fd   : > { %v1409_v45 = vpop.xlane.xlu1 %1408 }
 0x9fe   : > { %v1410_v28 = vcvt.f32.s32 %v1409_v45  ;;  %vm1414_vm10 = vcmp.eq.s32.totalorder %v4965_v50, %v1398_v44 }
 0x9ff   : > { %v5143_v34 = vsel %vm1414_vm10, -1e+30, %v5103_v19  ;;  %v4267_v25 = vsel %vm1414_vm10, 1.0, %v4805_v2 }
 0xa00   : > { %v1413_v24 = vadd.s32 %v1412_v47, %v1410_v28  ;;  %v1522_v48 = vsel %vm769_vm5, %v5143_v34, -inf }
 0xa01   : > { %1523 = vmax.xlane.f32.xlu0 %v1522_v48 }
 0xa02   : > { %vm1415_vm11 = vcmp.eq.s32.totalorder %v4965_v50, %v1413_v24 }
 0xa03   : > { %v5150_v49 = vsel %vm1415_vm11, -1e+30, %v5110_v43  ;;  %v4268_v51 = vsel %vm1415_vm11, 1.0, %v4805_v2 }
 0xa04   : > { %v1525_v52 = vsel %vm769_vm5, %v5150_v49, -inf  ;;  %v1420_v53 = vpack.c.bf16 %v4268_v51, %v4267_v25 }
 0xa05   : > { %1526 = vmax.xlane.f32.xlu1 %v1525_v52 }
 0xa06   : > { %4530 = vmatmul.mubr.msk.bf16.vlgmr.msra.gmra.mxu1 %vm769_vm5, %v1420_v53 }
 0xa07   : > { %4540 = vmatpush3.bf16.msra.mxu1 %v4950_v29  ;;  %4541 = vmatprep.mubr.msk.bf16.mxu1 %vm4807_vm2, %v4805_v2 }
 0xa08   : > { %4551 = vmatprep.subr.bf16.mxu1 %v4805_v2 }
 0xa8a   : > { %v1524_v19 = vpop.xlane.xlu0 %1523 }
 0xa8b   : > { %vm1528_vm12 = vcmp.ge.f32.partialorder %v5143_v34, %v1524_v19 }
 0xa8c   : > { %v1530_v43 = vsel %vm1528_vm12, %v4965_v50, 16 }
 0xa8d   : > { %v1532_v54 = vsel %vm769_vm5, %v1530_v43, 2147483647 }
 0xa8e   : > { %v1527_v55 = vpop.xlane.xlu1 %1526  ;;  %v1534_v33 = vshra.s32 %v1532_v54, 16  ;;  %v1533_v15 = vand.u32 65535, %v1532_v54 }
 0xa8f   : > { %vm1529_vm13 = vcmp.ge.f32.partialorder %v5150_v49, %v1527_v55 }
 0xa90   : > { %v1531_v35 = vsel %vm1529_vm13, %v4965_v50, 16  ;;  %v1536_v56 = vcvt.s32.f32 %v1534_v33  ;;  %v1535_v16 = vcvt.s32.f32 %v1533_v15 }
 0xa91   : > { %v1547_v57 = vsel %vm769_vm5, %v1531_v35, 2147483647 }
 0xa92   : > { %1537 = vmin.xlane.f32.xlu0 %v1536_v56  ;;  %v1549_v59 = vshra.s32 %v1547_v57, 16  ;;  %v1548_v20 = vand.u32 65535, %v1547_v57 }
 0xa94   : > { %v1551_v60 = vcvt.s32.f32 %v1549_v59  ;;  %v1550_v17 = vcvt.s32.f32 %v1548_v20 }
 0xa96   : > { %1552 = vmin.xlane.f32.xlu1 %v1551_v60 }
 0xac6   : > { %v1458_v61 = vpop.f32.mrf.mxu1 }
 0xac7   : > { %v1459_v63 = vadd.f32 %v1458_v61, %v4998_v42 }
 0xac8   : > { %v4531_v1 = vpop.f32.mrf.mxu1 }
 0xac9   : > { %v1465_v4 = vmul.f32 0.2, %v1459_v63 }
 0xaca   : > { %v1461_v3 = vpop.f32.mrf.mxu1 }
 0xacb   : > { %v1462_v5 = vadd.f32 %v1461_v3, %v5002_v46  ;;  %v1467_v10 = vmax.f32 %v1459_v63, %v1465_v4 }
 0xacc   : > { %v4532_v8 = vpop.f32.mrf.mxu1 }
 0xacd   : > { %v1466_v9 = vmul.f32 0.2, %v1462_v5 }
 0xacf   : > { %v1468_v11 = vmax.f32 %v1462_v5, %v1466_v9 }
 0xad1   : > { %v1469_v12 = vpack.c.bf16 %v1468_v11, %v1467_v10 }
 0xad3   : > { %4536 = vmatmul.mubr.msk.bf16.vlgmr.msra.gmra.mxu0 %vm872_vm14, %v1469_v12 }
 0xad4   : > { %4546 = vmatpush3.bf16.msra.mxu0 %v4940_v23  ;;  %4547 = vmatprep.mubr.msk.bf16.mxu0 %vm4807_vm2, %v4805_v2 }
 0xad5   : > { %4557 = vmatprep.subr.bf16.mxu0 %v4805_v2 }
 0xb1b   : > { %v1538_v62 = vpop.xlane.xlu0 %1537 }
 0xb1c   : > { %vm1539_vm15 = vcmp.eq.f32.partialorder %v1536_v56, %v1538_v62  ;;  %v1544_v47 = vcvt.f32.s32 %v1538_v62 }
 0xb1d   : > { %v1540_v0 = vsel %vm1539_vm15, %v1535_v16, inf }
 0xb1e   : > { %1541 = vmin.xlane.f32.xlu0 %v1540_v0  ;;  %v1545_v24 = vshll.u32 %v1544_v47, 16 }
 0xb1f   : > { %v1553_v22 = vpop.xlane.xlu1 %1552 }
 0xb20   : > { %vm1554_vm0 = vcmp.eq.f32.partialorder %v1551_v60, %v1553_v22  ;;  %v1559_v48 = vcvt.f32.s32 %v1553_v22 }
 0xb21   : > { %v1555_v21 = vsel %vm1554_vm0, %v1550_v17, inf }
 0xb22   : > { %1556 = vmin.xlane.f32.xlu1 %v1555_v21  ;;  %v1560_v53 = vshll.u32 %v1559_v48, 16 }
 0xb93   : > { %v1507_v26 = vpop.f32.mrf.mxu0 }
 0xb94   : > { %v1508_v27 = vadd.f32 %v5049_v58, %v1507_v26 }
 0xb95   : > { %v4537_v30 = vpop.f32.mrf.mxu0 }
 0xb96   : > { %v1514_v32 = vmul.f32 0.2, %v1508_v27 }
 0xb97   : > { %v1510_v36 = vpop.f32.mrf.mxu0 }
 0xb98   : > { %v1516_v39 = vmax.f32 %v1508_v27, %v1514_v32  ;;  %v1511_v14 = vadd.f32 %v5049_v58, %v1510_v36 }
 0xb99   : > { %v4538_v13 = vpop.f32.mrf.mxu0 }
 0xb9a   : > { %v5176_v41 = vmax.f32 %v5136_v31, %v1516_v39  ;;  %v1515_v18 = vmul.f32 0.2, %v1511_v14 }
 0xb9c   : > { %v1517_v44 = vmax.f32 %v1511_v14, %v1515_v18 }
 0xb9e   : > { %v5179_v45 = vmax.f32 %v5139_v37, %v1517_v44 }
 0xba7   : > { %v1542_v28 = vpop.xlane.xlu0 %1541 }
 0xba8   : > { %v1543_v25 = vcvt.f32.s32 %v1542_v28 }
 0xbaa   : > { %v1546_v51 = vadd.s32 %v1545_v24, %v1543_v25 }
 0xbab   : > { %v1557_v52 = vpop.xlane.xlu1 %1556 }
 0xbac   : > { %v1558_v19 = vcvt.f32.s32 %v1557_v52  ;;  %vm1562_vm3 = vcmp.eq.s32.totalorder %v4965_v50, %v1546_v51 }
 0xbad   : > { %v5183_v43 = vsel %vm1562_vm3, -1e+30, %v5143_v34  ;;  %v4271_v37 = vsel %vm1562_vm3, 1.0, %v4805_v2 }
 0xbae   : > { %v1561_v31 = vadd.s32 %v1560_v53, %v1558_v19  ;;  %v1670_v54 = vsel %vm769_vm5, %v5183_v43, -inf }
 0xbaf   : > { %1671 = vmax.xlane.f32.xlu0 %v1670_v54 }
 0xbb0   : > { %vm1563_vm4 = vcmp.eq.s32.totalorder %v4965_v50, %v1561_v31 }
 0xbb1   : > { %v5190_v55 = vsel %vm1563_vm4, -1e+30, %v5150_v49  ;;  %v4272_v33 = vsel %vm1563_vm4, 1.0, %v4805_v2 }
 0xbb2   : > { %v1673_v35 = vsel %vm769_vm5, %v5190_v55, -inf  ;;  %v1568_v56 = vpack.c.bf16 %v4272_v33, %v4271_v37 }
 0xbb3   : > { %1674 = vmax.xlane.f32.xlu1 %v1673_v35 }
 0xbb4   : > { %4542 = vmatmul.mubr.msk.bf16.vlgmr.msra.gmra.mxu1 %vm769_vm5, %v1568_v56 }
 0xbb5   : > { %4552 = vmatpush3.bf16.msra.mxu1 %v4950_v29  ;;  %4553 = vmatprep.mubr.msk.bf16.mxu1 %vm4807_vm2, %v4805_v2 }
 0xbb6   : > { %4563 = vmatprep.subr.bf16.mxu1 %v4805_v2 }
 0xc38   : > { %v1672_v34 = vpop.xlane.xlu0 %1671 }
 0xc39   : > { %vm1676_vm6 = vcmp.ge.f32.partialorder %v5183_v43, %v1672_v34 }
 0xc3a   : > { %v1678_v49 = vsel %vm1676_vm6, %v4965_v50, 16 }
 0xc3b   : > { %v1680_v57 = vsel %vm769_vm5, %v1678_v49, 2147483647 }
 0xc3c   : > { %v1675_v59 = vpop.xlane.xlu1 %1674  ;;  %v1682_v60 = vshra.s32 %v1680_v57, 16  ;;  %v1681_v22 = vand.u32 65535, %v1680_v57 }
 0xc3d   : > { %vm1677_vm7 = vcmp.ge.f32.partialorder %v5190_v55, %v1675_v59 }
 0xc3e   : > { %v1679_v61 = vsel %vm1677_vm7, %v4965_v50, 16  ;;  %v1684_v63 = vcvt.s32.f32 %v1682_v60  ;;  %v1683_v21 = vcvt.s32.f32 %v1681_v22 }
 0xc3f   : > { %v1695_v1 = vsel %vm769_vm5, %v1679_v61, 2147483647 }
 0xc40   : > { %1685 = vmin.xlane.f32.xlu0 %v1684_v63  ;;  %v1697_v3 = vshra.s32 %v1695_v1, 16  ;;  %v1696_v26 = vand.u32 65535, %v1695_v1 }
 0xc42   : > { %v1699_v4 = vcvt.s32.f32 %v1697_v3  ;;  %v1698_v32 = vcvt.s32.f32 %v1696_v26 }
 0xc44   : > { %1700 = vmin.xlane.f32.xlu1 %v1699_v4 }
 0xc74   : > { %v1606_v5 = vpop.f32.mrf.mxu1 }
 0xc75   : > { %v1607_v8 = vadd.f32 %v1606_v5, %v4998_v42 }
 0xc76   : > { %v4543_v9 = vpop.f32.mrf.mxu1 }
 0xc77   : > { %v1613_v11 = vmul.f32 0.2, %v1607_v8 }
 0xc78   : > { %v1609_v10 = vpop.f32.mrf.mxu1 }
 0xc79   : > { %v1610_v12 = vadd.f32 %v1609_v10, %v5002_v46  ;;  %v1615_v16 = vmax.f32 %v1607_v8, %v1613_v11 }
 0xc7a   : > { %v4544_v15 = vpop.f32.mrf.mxu1 }
 0xc7b   : > { %v1614_v62 = vmul.f32 0.2, %v1610_v12 }
 0xc7d   : > { %v1616_v20 = vmax.f32 %v1610_v12, %v1614_v62 }
 0xc7f   : > { %v1617_v0 = vpack.c.bf16 %v1616_v20, %v1615_v16 }
 0xc81   : > { %4548 = vmatmul.mubr.msk.bf16.vlgmr.msra.gmra.mxu0 %vm872_vm14, %v1617_v0 }
 0xc82   : > { %4558 = vmatpush3.bf16.msra.mxu0 %v4940_v23  ;;  %4559 = vmatprep.mubr.msk.bf16.mxu0 %vm4807_vm2, %v4805_v2 }
 0xc83   : > { %4569 = vmatprep.subr.bf16.mxu0 %v4805_v2 }
 0xcc9   : > { %v1686_v17 = vpop.xlane.xlu0 %1685 }
 0xcca   : > { %vm1687_vm8 = vcmp.eq.f32.partialorder %v1684_v63, %v1686_v17  ;;  %v1692_v53 = vcvt.f32.s32 %v1686_v17 }
 0xccb   : > { %v1688_v27 = vsel %vm1687_vm8, %v1683_v21, inf }
 0xccc   : > { %1689 = vmin.xlane.f32.xlu0 %v1688_v27  ;;  %v1693_v31 = vshll.u32 %v1692_v53, 16 }
 0xccd   : > { %v1701_v30 = vpop.xlane.xlu1 %1700 }
 0xcce   : > { %vm1702_vm9 = vcmp.eq.f32.partialorder %v1699_v4, %v1701_v30  ;;  %v1707_v54 = vcvt.f32.s32 %v1701_v30 }
 0xccf   : > { %v1703_v36 = vsel %vm1702_vm9, %v1698_v32, inf }
 0xcd0   : > { %1704 = vmin.xlane.f32.xlu1 %v1703_v36  ;;  %v1708_v56 = vshll.u32 %v1707_v54, 16 }
 0xd41   : > { %v1655_v39 = vpop.f32.mrf.mxu0 }
 0xd42   : > { %v1656_v14 = vadd.f32 %v5049_v58, %v1655_v39 }
 0xd43   : > { %v4549_v13 = vpop.f32.mrf.mxu0 }
 0xd44   : > { %v1662_v18 = vmul.f32 0.2, %v1656_v14 }
 0xd45   : > { %v1658_v44 = vpop.f32.mrf.mxu0 }
 0xd46   : > { %v1664_v47 = vmax.f32 %v1656_v14, %v1662_v18  ;;  %v1659_v28 = vadd.f32 %v5049_v58, %v1658_v44 }
 0xd47   : > { %v4550_v24 = vpop.f32.mrf.mxu0 }
 0xd48   : > { %v5216_v48 = vmax.f32 %v5176_v41, %v1664_v47  ;;  %v1663_v25 = vmul.f32 0.2, %v1659_v28 }
 0xd4a   : > { %v1665_v51 = vmax.f32 %v1659_v28, %v1663_v25 }
 0xd4c   : > { %v5219_v52 = vmax.f32 %v5179_v45, %v1665_v51 }
 0xd55   : > { %v1690_v19 = vpop.xlane.xlu0 %1689 }
 0xd56   : > { %v1691_v37 = vcvt.f32.s32 %v1690_v19 }
 0xd58   : > { %v1694_v33 = vadd.s32 %v1693_v31, %v1691_v37 }
 0xd59   : > { %v1705_v35 = vpop.xlane.xlu1 %1704 }
 0xd5a   : > { %v1706_v34 = vcvt.f32.s32 %v1705_v35  ;;  %vm1710_vm10 = vcmp.eq.s32.totalorder %v4965_v50, %v1694_v33 }
 0xd5b   : > { %v5223_v49 = vsel %vm1710_vm10, -1e+30, %v5183_v43  ;;  %v4275_v45 = vsel %vm1710_vm10, 1.0, %v4805_v2 }
 0xd5c   : > { %v1709_v41 = vadd.s32 %v1708_v56, %v1706_v34  ;;  %v1818_v57 = vsel %vm769_vm5, %v5223_v49, -inf }
 0xd5d   : > { %1819 = vmax.xlane.f32.xlu0 %v1818_v57 }
 0xd5e   : > { %vm1711_vm11 = vcmp.eq.s32.totalorder %v4965_v50, %v1709_v41 }
 0xd5f   : > { %v5230_v59 = vsel %vm1711_vm11, -1e+30, %v5190_v55  ;;  %v4276_v60 = vsel %vm1711_vm11, 1.0, %v4805_v2 }
 0xd60   : > { %v1821_v61 = vsel %vm769_vm5, %v5230_v59, -inf  ;;  %v1716_v63 = vpack.c.bf16 %v4276_v60, %v4275_v45 }
 0xd61   : > { %1822 = vmax.xlane.f32.xlu1 %v1821_v61 }
 0xd62   : > { %4554 = vmatmul.mubr.msk.bf16.vlgmr.msra.gmra.mxu1 %vm769_vm5, %v1716_v63 }
 0xd63   : > { %4564 = vmatpush3.bf16.msra.mxu1 %v4950_v29  ;;  %4565 = vmatprep.mubr.msk.bf16.mxu1 %vm4807_vm2, %v4805_v2 }
 0xd64   : > { %4575 = vmatprep.subr.bf16.mxu1 %v4805_v2 }
 0xde6   : > { %v1820_v43 = vpop.xlane.xlu0 %1819 }
 0xde7   : > { %vm1824_vm12 = vcmp.ge.f32.partialorder %v5223_v49, %v1820_v43 }
 0xde8   : > { %v1826_v55 = vsel %vm1824_vm12, %v4965_v50, 16 }
 0xde9   : > { %v1828_v1 = vsel %vm769_vm5, %v1826_v55, 2147483647 }
 0xdea   : > { %v1823_v3 = vpop.xlane.xlu1 %1822  ;;  %v1830_v4 = vshra.s32 %v1828_v1, 16  ;;  %v1829_v30 = vand.u32 65535, %v1828_v1 }
 0xdeb   : > { %vm1825_vm13 = vcmp.ge.f32.partialorder %v5230_v59, %v1823_v3 }
 0xdec   : > { %v1827_v5 = vsel %vm1825_vm13, %v4965_v50, 16  ;;  %v1832_v8 = vcvt.s32.f32 %v1830_v4  ;;  %v1831_v36 = vcvt.s32.f32 %v1829_v30 }
 0xded   : > { %v1843_v9 = vsel %vm769_vm5, %v1827_v5, 2147483647 }
 0xdee   : > { %1833 = vmin.xlane.f32.xlu0 %v1832_v8  ;;  %v1845_v10 = vshra.s32 %v1843_v9, 16  ;;  %v1844_v39 = vand.u32 65535, %v1843_v9 }
 0xdf0   : > { %v1847_v11 = vcvt.s32.f32 %v1845_v10  ;;  %v1846_v18 = vcvt.s32.f32 %v1844_v39 }
 0xdf2   : > { %1848 = vmin.xlane.f32.xlu1 %v1847_v11 }
 0xe22   : > { %v1754_v12 = vpop.f32.mrf.mxu1 }
 0xe23   : > { %v1755_v15 = vadd.f32 %v1754_v12, %v4998_v42 }
 0xe24   : > { %v4555_v62 = vpop.f32.mrf.mxu1 }
 0xe25   : > { %v1761_v20 = vmul.f32 0.2, %v1755_v15 }
 0xe26   : > { %v1757_v16 = vpop.f32.mrf.mxu1 }
 0xe27   : > { %v1758_v0 = vadd.f32 %v1757_v16, %v5002_v46  ;;  %v1763_v21 = vmax.f32 %v1755_v15, %v1761_v20 }
 0xe28   : > { %v4556_v22 = vpop.f32.mrf.mxu1 }
 0xe29   : > { %v1762_v17 = vmul.f32 0.2, %v1758_v0 }
 0xe2b   : > { %v1764_v26 = vmax.f32 %v1758_v0, %v1762_v17 }
 0xe2d   : > { %v1765_v27 = vpack.c.bf16 %v1764_v26, %v1763_v21 }
 0xe2f   : > { %4560 = vmatmul.mubr.msk.bf16.vlgmr.msra.gmra.mxu0 %vm872_vm14, %v1765_v27 }
 0xe30   : > { %4570 = vmatpush3.bf16.msra.mxu0 %v4940_v23  ;;  %4571 = vmatprep.mubr.msk.bf16.mxu0 %vm4807_vm2, %v4805_v2 }
 0xe31   : > { %4581 = vmatprep.subr.bf16.mxu0 %v4805_v2 }
 0xe77   : > { %v1834_v32 = vpop.xlane.xlu0 %1833 }
 0xe78   : > { %vm1835_vm15 = vcmp.eq.f32.partialorder %v1832_v8, %v1834_v32  ;;  %v1840_v56 = vcvt.f32.s32 %v1834_v32 }
 0xe79   : > { %v1836_v14 = vsel %vm1835_vm15, %v1831_v36, inf }
 0xe7a   : > { %1837 = vmin.xlane.f32.xlu0 %v1836_v14  ;;  %v1841_v41 = vshll.u32 %v1840_v56, 16 }
 0xe7b   : > { %v1849_v13 = vpop.xlane.xlu1 %1848 }
 0xe7c   : > { %vm1850_vm0 = vcmp.eq.f32.partialorder %v1847_v11, %v1849_v13  ;;  %v1855_v57 = vcvt.f32.s32 %v1849_v13 }
 0xe7d   : > { %v1851_v44 = vsel %vm1850_vm0, %v1846_v18, inf }
 0xe7e   : > { %1852 = vmin.xlane.f32.xlu1 %v1851_v44  ;;  %v1856_v63 = vshll.u32 %v1855_v57, 16 }
 0xeef   : > { %v1803_v47 = vpop.f32.mrf.mxu0 }
 0xef0   : > { %v1804_v28 = vadd.f32 %v5049_v58, %v1803_v47 }
 0xef1   : > { %v4561_v24 = vpop.f32.mrf.mxu0 }
 0xef2   : > { %v1810_v25 = vmul.f32 0.2, %v1804_v28 }
 0xef3   : > { %v1806_v51 = vpop.f32.mrf.mxu0 }
 0xef4   : > { %v1812_v53 = vmax.f32 %v1804_v28, %v1810_v25  ;;  %v1807_v19 = vadd.f32 %v5049_v58, %v1806_v51 }
 0xef5   : > { %v4562_v31 = vpop.f32.mrf.mxu0 }
 0xef6   : > { %v5256_v54 = vmax.f32 %v5216_v48, %v1812_v53  ;;  %v1811_v37 = vmul.f32 0.2, %v1807_v19 }
 0xef8   : > { %v1813_v33 = vmax.f32 %v1807_v19, %v1811_v37 }
 0xefa   : > { %v5259_v35 = vmax.f32 %v5219_v52, %v1813_v33 }
 0xf03   : > { %v1838_v34 = vpop.xlane.xlu0 %1837 }
 0xf04   : > { %v1839_v45 = vcvt.f32.s32 %v1838_v34 }
 0xf06   : > { %v1842_v60 = vadd.s32 %v1841_v41, %v1839_v45 }
 0xf07   : > { %v1853_v61 = vpop.xlane.xlu1 %1852 }
 0xf08   : > { %v1854_v43 = vcvt.f32.s32 %v1853_v61  ;;  %vm1858_vm3 = vcmp.eq.s32.totalorder %v4965_v50, %v1842_v60 }
 0xf09   : > { %v5263_v55 = vsel %vm1858_vm3, -1e+30, %v5223_v49  ;;  %v4279_v52 = vsel %vm1858_vm3, 1.0, %v4805_v2 }
 0xf0a   : > { %v1857_v48 = vadd.s32 %v1856_v63, %v1854_v43  ;;  %v1966_v1 = vsel %vm769_vm5, %v5263_v55, -inf }
 0xf0b   : > { %1967 = vmax.xlane.f32.xlu0 %v1966_v1 }
 0xf0c   : > { %vm1859_vm4 = vcmp.eq.s32.totalorder %v4965_v50, %v1857_v48 }
 0xf0d   : > { %v5270_v3 = vsel %vm1859_vm4, -1e+30, %v5230_v59  ;;  %v4280_v4 = vsel %vm1859_vm4, 1.0, %v4805_v2 }
 0xf0e   : > { %v1969_v5 = vsel %vm769_vm5, %v5270_v3, -inf  ;;  %v1864_v8 = vpack.c.bf16 %v4280_v4, %v4279_v52 }
 0xf0f   : > { %1970 = vmax.xlane.f32.xlu1 %v1969_v5 }
 0xf10   : > { %4566 = vmatmul.mubr.msk.bf16.vlgmr.msra.gmra.mxu1 %vm769_vm5, %v1864_v8 }
 0xf11   : > { %4576 = vmatpush3.bf16.msra.mxu1 %v4950_v29  ;;  %4577 = vmatprep.mubr.msk.bf16.mxu1 %vm4807_vm2, %v4805_v2 }
 0xf12   : > { %4587 = vmatprep.subr.bf16.mxu1 %v4805_v2 }
 0xf94   : > { %v1968_v49 = vpop.xlane.xlu0 %1967 }
 0xf95   : > { %vm1972_vm6 = vcmp.ge.f32.partialorder %v5263_v55, %v1968_v49 }
 0xf96   : > { %v1974_v59 = vsel %vm1972_vm6, %v4965_v50, 16  ;;  %vm2407_vm6 = vcmask 1045504  }
 0xf97   : > { %v1976_v9 = vsel %vm769_vm5, %v1974_v59, 2147483647 }
 0xf98   : > { %v1971_v10 = vpop.xlane.xlu1 %1970  ;;  %v1978_v11 = vshra.s32 %v1976_v9, 16  ;;  %v1977_v13 = vand.u32 65535, %v1976_v9 }
 0xf99   : > { %vm1973_vm7 = vcmp.ge.f32.partialorder %v5270_v3, %v1971_v10 }
 0xf9a   : > { %v1975_v12 = vsel %vm1973_vm7, %v4965_v50, 16  ;;  %v1980_v15 = vcvt.s32.f32 %v1978_v11  ;;  %v1979_v44 = vcvt.s32.f32 %v1977_v13 }
 0xf9b   : > { %v1991_v62 = vsel %vm769_vm5, %v1975_v12, 2147483647 }
 0xf9c   : > { %1981 = vmin.xlane.f32.xlu0 %v1980_v15  ;;  %v1993_v16 = vshra.s32 %v1991_v62, 16  ;;  %v1992_v47 = vand.u32 65535, %v1991_v62 }
 0xf9e   : > { %v1995_v20 = vcvt.s32.f32 %v1993_v16  ;;  %v1994_v25 = vcvt.s32.f32 %v1992_v47 }
 0xfa0   : > { %1996 = vmin.xlane.f32.xlu1 %v1995_v20 }
 0xfd0   : > { %v1902_v0 = vpop.f32.mrf.mxu1 }
 0xfd1   : > { %v1903_v22 = vadd.f32 %v1902_v0, %v4998_v42 }
 0xfd2   : > { %v4567_v17 = vpop.f32.mrf.mxu1 }
 0xfd3   : > { %v1909_v26 = vmul.f32 0.2, %v1903_v22 }
 0xfd4   : > { %v1905_v21 = vpop.f32.mrf.mxu1 }
 0xfd5   : > { %v1906_v27 = vadd.f32 %v1905_v21, %v5002_v46  ;;  %v1911_v36 = vmax.f32 %v1903_v22, %v1909_v26 }
 0xfd6   : > { %v4568_v30 = vpop.f32.mrf.mxu1 }
 0xfd7   : > { %v1910_v32 = vmul.f32 0.2, %v1906_v27 }
 0xfd9   : > { %v1912_v39 = vmax.f32 %v1906_v27, %v1910_v32 }
 0xfdb   : > { %v1913_v14 = vpack.c.bf16 %v1912_v39, %v1911_v36 }
 0xfdd   : > { %4572 = vmatmul.mubr.msk.bf16.vlgmr.msra.gmra.mxu0 %vm872_vm14, %v1913_v14 }
 0xfde   : > { %4582 = vmatpush3.bf16.msra.mxu0 %v4940_v23  ;;  %4583 = vmatprep.mubr.msk.bf16.mxu0 %vm4807_vm2, %v4805_v2 }
 0xfdf   : > { %4593 = vmatprep.subr.bf16.mxu0 %v4805_v2 }
0x1025   : > { %v1982_v18 = vpop.xlane.xlu0 %1981 }
0x1026   : > { %vm1983_vm8 = vcmp.eq.f32.partialorder %v1980_v15, %v1982_v18  ;;  %v1988_v63 = vcvt.f32.s32 %v1982_v18 }
0x1027   : > { %v1984_v28 = vsel %vm1983_vm8, %v1979_v44, inf }
0x1028   : > { %1985 = vmin.xlane.f32.xlu0 %v1984_v28  ;;  %v1989_v48 = vshll.u32 %v1988_v63, 16 }
0x1029   : > { %v1997_v24 = vpop.xlane.xlu1 %1996 }
0x102a   : > { %vm1998_vm9 = vcmp.eq.f32.partialorder %v1995_v20, %v1997_v24  ;;  %v2003_v1 = vcvt.f32.s32 %v1997_v24 }
0x102b   : > { %v1999_v51 = vsel %vm1998_vm9, %v1994_v25, inf }
0x102c   : > { %2000 = vmin.xlane.f32.xlu1 %v1999_v51  ;;  %v2004_v8 = vshll.u32 %v2003_v1, 16 }
0x109d   : > { %v1951_v53 = vpop.f32.mrf.mxu0 }
0x109e   : > { %v1952_v19 = vadd.f32 %v5049_v58, %v1951_v53 }
0x109f   : > { %v4573_v31 = vpop.f32.mrf.mxu0 }
0x10a0   : > { %v1958_v37 = vmul.f32 0.2, %v1952_v19 }
0x10a1   : > { %v1954_v33 = vpop.f32.mrf.mxu0 }
0x10a2   : > { %v1960_v56 = vmax.f32 %v1952_v19, %v1958_v37  ;;  %v1955_v34 = vadd.f32 %v5049_v58, %v1954_v33 }
0x10a3   : > { %v4574_v41 = vpop.f32.mrf.mxu0 }
0x10a4   : > { %v5296_v57 = vmax.f32 %v5256_v54, %v1960_v56  ;;  %v1959_v45 = vmul.f32 0.2, %v1955_v34 }
0x10a6   : > { %v1961_v60 = vmax.f32 %v1955_v34, %v1959_v45 }
0x10a8   : > { %v5299_v61 = vmax.f32 %v5259_v35, %v1961_v60 }
0x10b1   : > { %v1986_v43 = vpop.xlane.xlu0 %1985 }
0x10b2   : > { %v1987_v52 = vcvt.f32.s32 %v1986_v43 }
0x10b4   : > { %v1990_v4 = vadd.s32 %v1989_v48, %v1987_v52 }
0x10b5   : > { %v2001_v5 = vpop.xlane.xlu1 %2000 }
0x10b6   : > { %v2002_v49 = vcvt.f32.s32 %v2001_v5  ;;  %vm2006_vm10 = vcmp.eq.s32.totalorder %v4965_v50, %v1990_v4 }
0x10b7   : > { %v2112_v58 = vsel %vm2006_vm10, -1e+30, %v5263_v55  ;;  %v4283_v35 = vsel %vm2006_vm10, 1.0, %v4805_v2 }
0x10b8   : > { %v2005_v54 = vadd.s32 %v2004_v8, %v2002_v49  ;;  %v2114_v59 = vsel %vm769_vm5, %v2112_v58, -inf }
0x10b9   : > { %2115 = vmax.xlane.f32.xlu0 %v2114_v59 }
0x10ba   : > { %vm2007_vm11 = vcmp.eq.s32.totalorder %v4965_v50, %v2005_v54 }
0x10bb   : > { %v2113_v9 = vsel %vm2007_vm11, -1e+30, %v5270_v3  ;;  %v4284_v10 = vsel %vm2007_vm11, 1.0, %v4805_v2 }
0x10bc   : > { %v2117_v11 = vsel %vm769_vm5, %v2113_v9, -inf  ;;  %v2012_v12 = vpack.c.bf16 %v4284_v10, %v4283_v35 }
0x10bd   : > { %2118 = vmax.xlane.f32.xlu1 %v2117_v11 }
0x10be   : > { %4578 = vmatmul.mubr.msk.bf16.vlgmr.msra.gmra.mxu1 %vm769_vm5, %v2012_v12 }
0x10bf   : > { %4588 = vmatpush3.bf16.msra.mxu1 %v4950_v29  ;;  %4589 = vmatprep.mubr.msk.bf16.mxu1 %vm4807_vm2, %v4805_v2 }
0x1142   : > { %v2116_v55 = vpop.xlane.xlu0 %2115 }
0x1143   : > { %vm2120_vm12 = vcmp.ge.f32.partialorder %v2112_v58, %v2116_v55 }
0x1144   : > { %v2122_v15 = vsel %vm2120_vm12, %v4965_v50, 16 }
0x1145   : > { %v2124_v62 = vsel %vm769_vm5, %v2122_v15, 2147483647 }
0x1146   : > { %v2119_v3 = vpop.xlane.xlu1 %2118  ;;  %v2126_v16 = vshra.s32 %v2124_v62, 16  ;;  %v2125_v47 = vand.u32 65535, %v2124_v62 }
0x1147   : > { %vm2121_vm13 = vcmp.ge.f32.partialorder %v2113_v9, %v2119_v3 }
0x1148   : > { %v2123_v20 = vsel %vm2121_vm13, %v4965_v50, 16  ;;  %v2128_v0 = vcvt.s32.f32 %v2126_v16  ;;  %v2127_v24 = vcvt.s32.f32 %v2125_v47 }
0x1149   : > { %v2139_v22 = vsel %vm769_vm5, %v2123_v20, 2147483647 }
0x114a   : > { %2129 = vmin.xlane.f32.xlu0 %v2128_v0  ;;  %v2141_v17 = vshra.s32 %v2139_v22, 16  ;;  %v2140_v25 = vand.u32 65535, %v2139_v22 }
0x114c   : > { %v2143_v29 = vcvt.s32.f32 %v2141_v17  ;;  %v2142_v19 = vcvt.s32.f32 %v2140_v25 }
0x114e   : > { %2144 = vmin.xlane.f32.xlu1 %v2143_v29 }
0x117e   : > { %v2050_v21 = vpop.f32.mrf.mxu1 }
0x117f   : > { %v2051_v26 = vadd.f32 %v2050_v21, %v4998_v42  ;;  %v2262_v21 = vld [vmem:[%s5896_s7] sm:$0xff] }
0x1180   : > { %v4579_v27 = vpop.f32.mrf.mxu1 }
0x1181   : > { %v2057_v32 = vmul.f32 0.2, %v2051_v26 }
0x1182   : > { %v2053_v30 = vpop.f32.mrf.mxu1 }
0x1183   : > { %v2054_v36 = vadd.f32 %v2053_v30, %v5002_v46  ;;  %v2059_v13 = vmax.f32 %v2051_v26, %v2057_v32  ;;  %v5346_v26 = vsel %vm2407_vm6, %v4909_v6, 0  ;;  %v2268_v6 = vld [vmem:[%s5898_s9 + $0x18] sm:$0x3] }
0x1184   : > { %v4580_v39 = vpop.f32.mrf.mxu1 }
0x1185   : > { %v2058_v14 = vmul.f32 0.2, %v2054_v36 }
0x1187   : > { %v2060_v18 = vmax.f32 %v2054_v36, %v2058_v14 }
0x1189   : > { %v2061_v44 = vpack.c.bf16 %v2060_v18, %v2059_v13 }
0x118b   : > { %4584 = vmatmul.mubr.msk.bf16.vlgmr.msra.gmra.mxu0 %vm872_vm14, %v2061_v44  ;;  %v2267_v44 = vld [vmem:[%s5898_s9 + $0x10] sm:$0xff] }
0x118c   : > { %4594 = vmatpush3.bf16.msra.mxu0 %v4940_v23  ;;  %4595 = vmatprep.mubr.msk.bf16.mxu0 %vm4807_vm2, %v4805_v2  ;;  %v4795_v23 = vld [vmem:[%s5894_s5] ss:$0 sm:$0xff]  ;;  %v2507_v25 = vpack.c.bf16 %v2268_v6, %v2267_v44 }
0x118d   : > { %4612 = vmatprep.subr.bf16.mxu0 %v4805_v2 }
0x11d3   : > { %v2130_v28 = vpop.xlane.xlu0 %2129 }
0x11d4   : > { %vm2131_vm15 = vcmp.eq.f32.partialorder %v2128_v0, %v2130_v28  ;;  %v2136_v4 = vcvt.f32.s32 %v2130_v28 }
0x11d5   : > { %v2132_v51 = vsel %vm2131_vm15, %v2127_v24, inf  ;;  %vm2610_vm15 = vcmask 211968  }
0x11d6   : > { %2133 = vmin.xlane.f32.xlu0 %v2132_v51  ;;  %v2137_v8 = vshll.u32 %v2136_v4, 16 }
0x11d7   : > { %v2145_v53 = vpop.xlane.xlu1 %2144 }
0x11d8   : > { %vm2146_vm0 = vcmp.eq.f32.partialorder %v2143_v29, %v2145_v53  ;;  %v2151_v49 = vcvt.f32.s32 %v2145_v53 }
0x11d9   : > { %v2147_v31 = vsel %vm2146_vm0, %v2142_v19, inf }
0x11da   : > { %2148 = vmin.xlane.f32.xlu1 %v2147_v31  ;;  %v2152_v35 = vshll.u32 %v2151_v49, 16 }
0x124b   : > { %v2099_v37 = vpop.f32.mrf.mxu0 }
0x124c   : > { %v2100_v33 = vadd.f32 %v4795_v23, %v2099_v37  ;;  %v2260_v37 = vld [vmem:[%s5895_s6] sm:$0xff] }
0x124d   : > { %v4585_v56 = vpop.f32.mrf.mxu0 }
0x124e   : > { %v2106_v34 = vmul.f32 0.2, %v2100_v33 }
0x124f   : > { %v2102_v41 = vpop.f32.mrf.mxu0 }
0x1250   : > { %v2108_v45 = vmax.f32 %v2100_v33, %v2106_v34  ;;  %v2103_v60 = vadd.f32 %v4795_v23, %v2102_v41  ;;  %v5372_v33 = vsel %vm877_vm1, %v2507_v25, 0 }
0x1251   : > { %v4586_v63 = vpop.f32.mrf.mxu0 }
0x1252   : > { %v2110_v43 = vmax.f32 %v5296_v57, %v2108_v45  ;;  %v2107_v48 = vmul.f32 0.2, %v2103_v60 }
0x1254   : > { %v2109_v1 = vmax.f32 %v2103_v60, %v2107_v48 }
0x1256   : > { %v2111_v52 = vmax.f32 %v5299_v61, %v2109_v1 }
0x125f   : > { %v2134_v5 = vpop.xlane.xlu0 %2133 }
0x1260   : > { %v2135_v58 = vcvt.f32.s32 %v2134_v5 }
0x1262   : > { %v2138_v54 = vadd.s32 %v2137_v8, %v2135_v58 }
0x1263   : > { %v2149_v59 = vpop.xlane.xlu1 %2148 }
0x1264   : > { %v2150_v9 = vcvt.f32.s32 %v2149_v59  ;;  %vm2154_vm3 = vcmp.eq.s32.totalorder %v4965_v50, %v2138_v54 }
0x1265   : > { %v4287_v57 = vsel %vm2154_vm3, 1.0, %v4805_v2 }
0x1266   : > { %v2153_v10 = vadd.s32 %v2152_v35, %v2150_v9 }
0x1268   : > { %vm2155_vm4 = vcmp.eq.s32.totalorder %v4965_v50, %v2153_v10 }
0x1269   : > { %v4288_v11 = vsel %vm2155_vm4, 1.0, %v4805_v2 }
0x126a   : > { %v2160_v12 = vpack.c.bf16 %v4288_v11, %v4287_v57 }
0x126c   : > { %4590 = vmatmul.mubr.msk.bf16.vlgmr.msra.gmra.mxu1 %vm769_vm5, %v2160_v12 }
0x132c   : > { %v2198_v61 = vpop.f32.mrf.mxu1 }
0x132d   : > { %v2199_v55 = vadd.f32 %v2198_v61, %v4998_v42  ;;  %v2263_v42 = vld [vmem:[%s5896_s7 + $0x8] sm:$0x7] }
0x132e   : > { %v4591_v15 = vpop.f32.mrf.mxu1 }
0x132f   : > { %v2205_v3 = vmul.f32 0.2, %v2199_v55 }
0x1330   : > { %v2201_v62 = vpop.f32.mrf.mxu1 }
0x1331   : > { %v2202_v16 = vadd.f32 %v2201_v62, %v5002_v46  ;;  %v2207_v22 = vmax.f32 %v2199_v55, %v2205_v3  ;;  %v2454_v46 = vpack.c.bf16 %v2263_v42, %v2262_v21 }
0x1332   : > { %v4592_v20 = vpop.f32.mrf.mxu1 }
0x1333   : > { %v2206_v0 = vmul.f32 0.2, %v2202_v16  ;;  %v2462_v27 = vand.u32 %v2454_v46, %v5346_v26 }
0x1335   : > { %v2208_v17 = vmax.f32 %v2202_v16, %v2206_v0 }
0x1337   : > { %v2209_v29 = vpack.c.bf16 %v2208_v17, %v2207_v22 }
0x1339   : > { %4596 = vmatmul.mubr.msk.bf16.vlgmr.msra.gmra.mxu0 %vm872_vm14, %v2209_v29  ;;  %vm2272_vm14 = vcmask 89088  }
0x133a   : > { %4614 = vmatprep.mubr.msk.bf16.mxu0 %vm4807_vm2, %v4805_v2  ;;  %4613 = vmatpush3.bf16.msra.mxu0 %v2462_v27 }
0x133b   : > { %4624 = vmatprep.subr.bf16.mxu0 %v4805_v2 }
0x13f9   : > { %v2247_v30 = vpop.f32.mrf.mxu0 }
0x13fa   : > { %v2248_v32 = vadd.f32 %v4795_v23, %v2247_v30 }
0x13fb   : > { %v4597_v36 = vpop.f32.mrf.mxu0 }
0x13fc   : > { %v2254_v39 = vmul.f32 0.2, %v2248_v32 }
0x13fd   : > { %v2250_v14 = vpop.f32.mrf.mxu0 }
0x13fe   : > { %v2256_v13 = vmax.f32 %v2248_v32, %v2254_v39  ;;  %v2251_v18 = vadd.f32 %v4795_v23, %v2250_v14  ;;  %v2261_v23 = vld [vmem:[%s5895_s6 + $0x8] sm:$0x7] }
0x13ff   : > { %v4598_v47 = vpop.f32.mrf.mxu0  ;;  %v2403_v41 = vpack.c.bf16 %v2261_v23, %v2260_v37 }
0x1400   : > { %v5356_v28 = vmax.f32 %v2110_v43, %v2256_v13  ;;  %v2255_v24 = vmul.f32 0.2, %v2251_v18 }
0x1401   : > { %v2411_v60 = vand.u32 %v5346_v26, %v2403_v41 }
0x1402   : > { %v2257_v51 = vmax.f32 %v2251_v18, %v2255_v24  ;;  %4603 = vmatprep.mubr.msk.f32.mxu1 %vm2272_vm14, %v5356_v28  ;;  %v2270_v53 = vmul.f32 %v5356_v28, %v5356_v28 }
0x1404   : > { %v5362_v19 = vmax.f32 %v2111_v52, %v2257_v51  ;;  %v2273_v31 = vsel %vm2272_vm14, %v2270_v53, 0.0 }
0x1405   : > { %2274 = vadd.xlane.f32.xlu0 %v2273_v31 }
0x1406   : > { %4599 = vmatprep.subr.msk.mxu1 %vm2272_vm14, %v5362_v19  ;;  %v2402_v56 = vpack.c.bf16 %v5362_v19, %v5356_v28  ;;  %v2271_v34 = vmul.f32 %v5362_v19, %v5362_v19 }
0x1407   : > { %4600 = vmatpush3.xpose.msk.msra.mxu1 %vm2272_vm14, %v5362_v19 }
0x1408   : > { %4601 = vmatprep.subr.msk.mxu1 %vm2272_vm14, %v5356_v28  ;;  %4615 = vmatmul.mubr.msk.bf16.vlgmr.msra.gmra.mxu0 %vm2272_vm14, %v2402_v56  ;;  %v2276_v45 = vsel %vm2272_vm14, %v2271_v34, 0.0 }
0x1409   : > { %2277 = vadd.xlane.f32.xlu1 %v2276_v45  ;;  %4625 = vmatpush3.bf16.msra.mxu0 %v5372_v33 }
0x140a   : > { %4626 = vmatprep.subr.bf16.mxu0 %v4805_v2  ;;  %4628 = vmatprep.mubr.msk.bf16.mxu0 %vm4807_vm2, %v4805_v2 }
0x140b   : > { %4602 = vmatpush3.xpose.msk.msra.mxu1 %vm2272_vm14, %v5356_v28 }
0x140c   : > { %4606 = vmatprep.subr.bf16.mxu1 %v4805_v2 }
0x140e   : > { %4604 = vmatmul.mubr.msk.f32.vlgmr.msra.gmra.mxu1 %vm2272_vm14, %v5362_v19 }
0x140f   : > { %4607 = vmatpush3.bf16.msra.mxu1 %v2411_v60  ;;  %4608 = vmatprep.mubr.msk.bf16.mxu1 %vm4807_vm2, %v4805_v2 }
0x1410   : > { %4618 = vmatprep.subr.bf16.mxu1 %v4805_v2 }
0x1412   : > { %4609 = vmatmul.mubr.msk.bf16.vlgmr.msra.gmra.mxu1 %vm2272_vm14, %v2402_v56 }
0x1413   : > { %4620 = vmatprep.mubr.msk.bf16.mxu1 %vm4807_vm2, %v4805_v2 }
0x148e   : > { %v2275_v63 = vpop.xlane.xlu0 %2274 }
0x148f   : > { %2364 = vxpose.xlu0.b32.start [1/2] (short) (narrow) %v2275_v63, 8 }
0x1492   : > { %v2278_v43 = vpop.xlane.xlu1 %2277 }
0x1493   : > { %2365 = vxpose.xlu0.b32.end [2/2] (short) (narrow) %v2278_v43, 8 }
0x14c8   : > { %v5402_v48 = vpop.f32.mrf.mxu0 }
0x14ca   : > { %v4616_v1 = vpop.f32.mrf.mxu0 }
0x14cb   : > { %v2266_v1 = vld [vmem:[%s5898_s9 + $0x8] sm:$0xff] }
0x14cc   : > { %v5404_v52 = vpop.f32.mrf.mxu0 }
0x14ce   : > { %v4605_v4 = vpop.f32.mrf.mxu1  ;;  %v4617_v5 = vpop.f32.mrf.mxu0 }
0x14cf   : > { %v2361_v10 = vmul.f32 2.0, %v4605_v4 }
0x14d0   : > { %v2351_v8 = vpop.f32.mrf.mxu1 }
0x14d1   : > { %v2360_v9 = vmul.f32 2.0, %v2351_v8  ;;  %v2363_v61 = vsub.f32 %v2361_v10, %v2278_v43  ;;  %v2265_v43 = vld [vmem:[%s5898_s9] sm:$0xff] }
0x14d2   : > { %v2447_v49 = vpop.f32.mrf.mxu1  ;;  %v5441_v4 = vpack.c.bf16 %v2266_v1, %v2265_v43 }
0x14d3   : > { %v2362_v11 = vsub.f32 %v2360_v9, %v2275_v63 }
0x14d4   : > { %v4610_v58 = vpop.f32.mrf.mxu1  ;;  %4627 = vmatpush3.bf16.msra.mxu0 %v5441_v4 }
0x14d5   : > { %4638 = vmatprep.subr.bf16.mxu0 %v4805_v2 }
0x14d6   : > { %v2450_v54 = vpop.f32.mrf.mxu1 }
0x14d7   : > { %v5406_v59 = vpack.c.bf16 %v2450_v54, %v2447_v49 }
0x14d8   : > { %v4611_v35 = vpop.f32.mrf.mxu1 }
0x14d9   : > { %4619 = vmatpush3.bf16.msra.mxu1 %v5406_v59 }
0x14da   : > { %4632 = vmatprep.subr.bf16.mxu1 %v4805_v2 }
0x150b   : > { %v2380_v57 = vpop.trf.xlu0 }
0x150c   : > { %v2399_v12 = vrot.slane %v2380_v57, %v660_v40 }
0x150e   : > { %v2400_v55 = vsub.f32 %v2362_v11, %v2399_v12  ;;  %v2401_v15 = vsub.f32 %v2363_v61, %v2399_v12  ;;  %v4296_v12 = vld [vmem:[%s5897_s8] ss:$0 sm:$0xff] }
0x150f   : > { %v5455_v61 = vadd.f32 %v4296_v12, %v5402_v48 }
0x1510   : > { %v2508_v62 = vsel %vm769_vm5, %v2400_v55, -inf  ;;  %v2511_v3 = vsel %vm769_vm5, %v2401_v15, -inf }
0x1511   : > { %2509 = vmax.xlane.f32.xlu1 %v2508_v62 }
0x1515   : > { %2512 = vmax.xlane.f32.xlu1 %v2511_v3  ;;  %v5459_v3 = vadd.f32 %v4296_v12, %v5404_v52 }
0x159a   : > { %v2510_v16 = vpop.xlane.xlu1 %2509 }
0x159b   : > { %vm2514_vm1 = vcmp.ge.f32.partialorder %v2400_v55, %v2510_v16 }
0x159c   : > { %v2516_v20 = vsel %vm2514_vm1, %v4965_v50, 16 }
0x159d   : > { %v2518_v0 = vsel %vm769_vm5, %v2516_v20, 2147483647 }
0x159e   : > { %v2513_v22 = vpop.xlane.xlu1 %2512  ;;  %v2520_v17 = vshra.s32 %v2518_v0, 16  ;;  %v2519_v46 = vand.u32 65535, %v2518_v0 }
0x159f   : > { %vm2515_vm7 = vcmp.ge.f32.partialorder %v2401_v15, %v2513_v22 }
0x15a0   : > { %v2517_v38 = vsel %vm2515_vm7, %v4965_v50, 16  ;;  %v2522_v40 = vcvt.s32.f32 %v2520_v17  ;;  %v2521_v30 = vcvt.s32.f32 %v2519_v46 }
0x15a1   : > { %v2533_v29 = vsel %vm769_vm5, %v2517_v38, 2147483647 }
0x15a2   : > { %2523 = vmin.xlane.f32.xlu1 %v2522_v40  ;;  %v2535_v21 = vshra.s32 %v2533_v29, 16  ;;  %v2534_v32 = vand.u32 65535, %v2533_v29 }
0x15a4   : > { %v2537_v42 = vcvt.s32.f32 %v2535_v21  ;;  %v2536_v14 = vcvt.s32.f32 %v2534_v32 }
0x15a6   : > { %2538 = vmin.xlane.f32.xlu1 %v2537_v42 }
0x162b   : > { %v2524_v27 = vpop.xlane.xlu1 %2523 }
0x162c   : > { %vm2525_vm8 = vcmp.eq.f32.partialorder %v2522_v40, %v2524_v27  ;;  %v2530_v18 = vcvt.f32.s32 %v2524_v27 }
0x162d   : > { %v2526_v36 = vsel %vm2525_vm8, %v2521_v30, inf }
0x162e   : > { %2527 = vmin.xlane.f32.xlu1 %v2526_v36  ;;  %v2531_v6 = vshll.u32 %v2530_v18, 16 }
0x162f   : > { %v2539_v39 = vpop.xlane.xlu1 %2538 }
0x1630   : > { %vm2540_vm9 = vcmp.eq.f32.partialorder %v2537_v42, %v2539_v39  ;;  %v2545_v47 = vcvt.f32.s32 %v2539_v39 }
0x1631   : > { %v2541_v13 = vsel %vm2540_vm9, %v2536_v14, inf }
0x1632   : > { %2542 = vmin.xlane.f32.xlu1 %v2541_v13  ;;  %v2546_v53 = vshll.u32 %v2545_v47, 16 }
0x16b7   : > { %v2528_v44 = vpop.xlane.xlu1 %2527 }
0x16b8   : > { %v2529_v24 = vcvt.f32.s32 %v2528_v44 }
0x16ba   : > { %v2532_v25 = vadd.s32 %v2531_v6, %v2529_v24 }
0x16bb   : > { %v2543_v51 = vpop.xlane.xlu1 %2542 }
0x16bc   : > { %v2544_v31 = vcvt.f32.s32 %v2543_v51  ;;  %vm2548_vm10 = vcmp.eq.s32.totalorder %v4965_v50, %v2532_v25 }
0x16bd   : > { %v5419_v37 = vsel %vm2548_vm10, -1e+30, %v2400_v55  ;;  %v4298_v34 = vsel %vm2548_vm10, 1.0, %v4805_v2 }
0x16be   : > { %v2547_v23 = vadd.s32 %v2546_v53, %v2544_v31  ;;  %v2664_v56 = vsel %vm769_vm5, %v5419_v37, -inf }
0x16bf   : > { %2665 = vmax.xlane.f32.xlu1 %v2664_v56 }
0x16c0   : > { %vm2549_vm11 = vcmp.eq.s32.totalorder %v4965_v50, %v2547_v23 }
0x16c1   : > { %v5425_v41 = vsel %vm2549_vm11, -1e+30, %v2401_v15  ;;  %v4299_v45 = vsel %vm2549_vm11, 1.0, %v4805_v2 }
0x16c2   : > { %v2667_v60 = vsel %vm769_vm5, %v5425_v41, -inf  ;;  %v2554_v63 = vpack.c.bf16 %v4299_v45, %v4298_v34 }
0x16c3   : > { %2668 = vmax.xlane.f32.xlu1 %v2667_v60 }
0x16c4   : > { %4621 = vmatmul.mubr.msk.bf16.vlgmr.msra.gmra.mxu1 %vm769_vm5, %v2554_v63 }
0x16c5   : > { %4633 = vmatpush3.bf16.msra.mxu1 %v5406_v59  ;;  %4634 = vmatprep.mubr.msk.bf16.mxu1 %vm4807_vm2, %v4805_v2 }
0x16c6   : > { %4646 = vmatprep.subr.bf16.mxu1 %v4805_v2 }
0x1748   : > { %v2666_v5 = vpop.xlane.xlu1 %2665 }
0x1749   : > { %vm2670_vm12 = vcmp.ge.f32.partialorder %v5419_v37, %v2666_v5 }
0x174a   : > { %v2672_v8 = vsel %vm2670_vm12, %v4965_v50, 16 }
0x174b   : > { %v2674_v49 = vsel %vm769_vm5, %v2672_v8, 2147483647 }
0x174c   : > { %v2669_v58 = vpop.xlane.xlu1 %2668  ;;  %v2676_v54 = vshra.s32 %v2674_v49, 16  ;;  %v2675_v48 = vand.u32 65535, %v2674_v49 }
0x174d   : > { %vm2671_vm13 = vcmp.ge.f32.partialorder %v5425_v41, %v2669_v58 }
0x174e   : > { %v2673_v35 = vsel %vm2671_vm13, %v4965_v50, 16  ;;  %v2678_v9 = vcvt.s32.f32 %v2676_v54  ;;  %v2677_v21 = vcvt.s32.f32 %v2675_v48 }
0x174f   : > { %v2689_v10 = vsel %vm769_vm5, %v2673_v35, 2147483647 }
0x1750   : > { %2679 = vmin.xlane.f32.xlu1 %v2678_v9  ;;  %v2691_v57 = vshra.s32 %v2689_v10, 16  ;;  %v2690_v42 = vand.u32 65535, %v2689_v10 }
0x1752   : > { %v2693_v11 = vcvt.s32.f32 %v2691_v57  ;;  %v2692_v30 = vcvt.s32.f32 %v2690_v42 }
0x1754   : > { %2694 = vmin.xlane.f32.xlu1 %v2693_v11 }
0x1784   : > { %v2592_v55 = vpop.f32.mrf.mxu1 }
0x1785   : > { %v2593_v15 = vadd.f32 %v2592_v55, %v5455_v61 }
0x1786   : > { %v4622_v62 = vpop.f32.mrf.mxu1 }
0x1787   : > { %v2599_v20 = vmul.f32 0.2, %v2593_v15 }
0x1788   : > { %v2595_v16 = vpop.f32.mrf.mxu1 }
0x1789   : > { %v2596_v0 = vadd.f32 %v2595_v16, %v5459_v3  ;;  %v2601_v38 = vmax.f32 %v2593_v15, %v2599_v20 }
0x178a   : > { %v4623_v22 = vpop.f32.mrf.mxu1 }
0x178b   : > { %v2600_v17 = vmul.f32 0.2, %v2596_v0 }
0x178d   : > { %v2602_v40 = vmax.f32 %v2596_v0, %v2600_v17 }
0x178f   : > { %v2603_v29 = vpack.c.bf16 %v2602_v40, %v2601_v38 }
0x1791   : > { %4629 = vmatmul.mubr.msk.bf16.vlgmr.msra.gmra.mxu0 %vm2610_vm15, %v2603_v29 }
0x1792   : > { %4639 = vmatpush3.bf16.msra.mxu0 %v5372_v33  ;;  %4642 = vmatprep.mubr.msk.bf16.mxu0 %vm4807_vm2, %v4805_v2 }
0x1793   : > { %4640 = vmatprep.subr.bf16.mxu0 %v4805_v2 }
0x1796   : > { %4641 = vmatpush3.bf16.msra.mxu0 %v5441_v4 }
0x1797   : > { %4652 = vmatprep.subr.bf16.mxu0 %v4805_v2 }
0x17d9   : > { %v2680_v52 = vpop.xlane.xlu1 %2679 }
0x17da   : > { %vm2681_vm0 = vcmp.eq.f32.partialorder %v2678_v9, %v2680_v52  ;;  %v2686_v18 = vcvt.f32.s32 %v2680_v52 }
0x17db   : > { %v2682_v46 = vsel %vm2681_vm0, %v2677_v21, inf }
0x17dc   : > { %2683 = vmin.xlane.f32.xlu1 %v2682_v46  ;;  %v2687_v6 = vshll.u32 %v2686_v18, 16 }
0x17dd   : > { %v2695_v27 = vpop.xlane.xlu1 %2694 }
0x17de   : > { %vm2696_vm3 = vcmp.eq.f32.partialorder %v2693_v11, %v2695_v27  ;;  %v2701_v47 = vcvt.f32.s32 %v2695_v27  ;;  %v5510_v27 = vld [vmem:[%s5899_s10] ss:$0 sm:$0xff] }
0x17df   : > { %v2697_v32 = vsel %vm2696_vm3, %v2692_v30, inf }
0x17e0   : > { %2698 = vmin.xlane.f32.xlu1 %v2697_v32  ;;  %v2702_v53 = vshll.u32 %v2701_v47, 16 }
0x1851   : > { %v5469_v36 = vpop.f32.mrf.mxu0 }
0x1852   : > { %v2652_v30 = vadd.f32 %v5510_v27, %v5469_v36 }
0x1853   : > { %v4630_v39 = vpop.f32.mrf.mxu0 }
0x1854   : > { %v2658_v39 = vmul.f32 0.2, %v2652_v30 }
0x1855   : > { %v5471_v14 = vpop.f32.mrf.mxu0 }
0x1857   : > { %v4631_v13 = vpop.f32.mrf.mxu0 }
0x1858   : > { %v2655_v13 = vadd.f32 %v5510_v27, %v5471_v14 }
0x1865   : > { %v2684_v44 = vpop.xlane.xlu1 %2683 }
0x1866   : > { %v2685_v24 = vcvt.f32.s32 %v2684_v44 }
0x1868   : > { %v2688_v25 = vadd.s32 %v2687_v6, %v2685_v24  ;;  %v2660_v24 = vmax.f32 %v2652_v30, %v2658_v39 }
0x1869   : > { %v2699_v51 = vpop.xlane.xlu1 %2698 }
0x186a   : > { %v2700_v31 = vcvt.f32.s32 %v2699_v51  ;;  %vm2704_vm4 = vcmp.eq.s32.totalorder %v4965_v50, %v2688_v25  ;;  %v2659_v25 = vmul.f32 0.2, %v2655_v13 }
0x186b   : > { %v5475_v23 = vsel %vm2704_vm4, -1e+30, %v5419_v37  ;;  %v4303_v45 = vsel %vm2704_vm4, 1.0, %v4805_v2 }
0x186c   : > { %v2703_v56 = vadd.s32 %v2702_v53, %v2700_v31  ;;  %v2812_v34 = vsel %vm769_vm5, %v5475_v23, -inf  ;;  %v2661_v36 = vmax.f32 %v2655_v13, %v2659_v25 }
0x186d   : > { %2813 = vmax.xlane.f32.xlu0 %v2812_v34 }
0x186e   : > { %vm2705_vm6 = vcmp.eq.s32.totalorder %v4965_v50, %v2703_v56 }
0x186f   : > { %v5482_v60 = vsel %vm2705_vm6, -1e+30, %v5425_v41  ;;  %v4304_v63 = vsel %vm2705_vm6, 1.0, %v4805_v2 }
0x1870   : > { %v2815_v43 = vsel %vm769_vm5, %v5482_v60, -inf  ;;  %v2710_v1 = vpack.c.bf16 %v4304_v63, %v4303_v45 }
0x1871   : > { %2816 = vmax.xlane.f32.xlu1 %v2815_v43 }
0x1872   : > { %4635 = vmatmul.mubr.msk.bf16.vlgmr.msra.gmra.mxu1 %vm769_vm5, %v2710_v1 }
0x1873   : > { %4647 = vmatpush3.bf16.msra.mxu1 %v5406_v59  ;;  %4648 = vmatprep.mubr.msk.bf16.mxu1 %vm4807_vm2, %v4805_v2 }
0x1874   : > { %4660 = vmatprep.subr.bf16.mxu1 %v4805_v2 }
0x18f6   : > { %v2814_v37 = vpop.xlane.xlu0 %2813 }
0x18f7   : > { %vm2818_vm1 = vcmp.ge.f32.partialorder %v5475_v23, %v2814_v37 }
0x18f8   : > { %v2820_v41 = vsel %vm2818_vm1, %v4965_v50, 16 }
0x18f9   : > { %v2822_v5 = vsel %vm769_vm5, %v2820_v41, 2147483647 }
0x18fa   : > { %v2817_v8 = vpop.xlane.xlu1 %2816  ;;  %v2824_v49 = vshra.s32 %v2822_v5, 16  ;;  %v2823_v38 = vand.u32 65535, %v2822_v5 }
0x18fb   : > { %vm2819_vm7 = vcmp.ge.f32.partialorder %v5482_v60, %v2817_v8 }
0x18fc   : > { %v2821_v58 = vsel %vm2819_vm7, %v4965_v50, 16  ;;  %v2826_v54 = vcvt.s32.f32 %v2824_v49  ;;  %v2825_v29 = vcvt.s32.f32 %v2823_v38 }
0x18fd   : > { %v2837_v35 = vsel %vm769_vm5, %v2821_v58, 2147483647 }
0x18fe   : > { %2827 = vmin.xlane.f32.xlu1 %v2826_v54  ;;  %v2839_v9 = vshra.s32 %v2837_v35, 16  ;;  %v2838_v48 = vand.u32 65535, %v2837_v35 }
0x1900   : > { %v2841_v10 = vcvt.s32.f32 %v2839_v9  ;;  %v2840_v42 = vcvt.s32.f32 %v2838_v48 }
0x1902   : > { %2842 = vmin.xlane.f32.xlu1 %v2841_v10 }
0x1932   : > { %v2748_v57 = vpop.f32.mrf.mxu1 }
0x1933   : > { %v2749_v11 = vadd.f32 %v2748_v57, %v5455_v61 }
0x1934   : > { %v4636_v12 = vpop.f32.mrf.mxu1 }
0x1935   : > { %v2755_v15 = vmul.f32 0.2, %v2749_v11 }
0x1936   : > { %v2751_v55 = vpop.f32.mrf.mxu1 }
0x1937   : > { %v2752_v62 = vadd.f32 %v2751_v55, %v5459_v3  ;;  %v2757_v0 = vmax.f32 %v2749_v11, %v2755_v15 }
0x1938   : > { %v4637_v16 = vpop.f32.mrf.mxu1 }
0x1939   : > { %v2756_v20 = vmul.f32 0.2, %v2752_v62 }
0x193b   : > { %v2758_v22 = vmax.f32 %v2752_v62, %v2756_v20 }
0x193d   : > { %v2759_v17 = vpack.c.bf16 %v2758_v22, %v2757_v0 }
0x193f   : > { %4643 = vmatmul.mubr.msk.bf16.vlgmr.msra.gmra.mxu0 %vm2610_vm15, %v2759_v17 }
0x1940   : > { %4653 = vmatpush3.bf16.msra.mxu0 %v5372_v33  ;;  %4656 = vmatprep.mubr.msk.bf16.mxu0 %vm4807_vm2, %v4805_v2 }
0x1941   : > { %4654 = vmatprep.subr.bf16.mxu0 %v4805_v2 }
0x1944   : > { %4655 = vmatpush3.bf16.msra.mxu0 %v5441_v4 }
0x1945   : > { %4666 = vmatprep.subr.bf16.mxu0 %v4805_v2 }
0x1987   : > { %v2828_v40 = vpop.xlane.xlu1 %2827 }
0x1988   : > { %vm2829_vm8 = vcmp.eq.f32.partialorder %v2826_v54, %v2828_v40  ;;  %v2834_v43 = vcvt.f32.s32 %v2828_v40 }
0x1989   : > { %v2830_v52 = vsel %vm2829_vm8, %v2825_v29, inf }
0x198a   : > { %2831 = vmin.xlane.f32.xlu1 %v2830_v52  ;;  %v2835_v1 = vshll.u32 %v2834_v43, 16 }
0x198b   : > { %v2843_v21 = vpop.xlane.xlu1 %2842 }
0x198c   : > { %vm2844_vm9 = vcmp.eq.f32.partialorder %v2841_v10, %v2843_v21  ;;  %v2849_v37 = vcvt.f32.s32 %v2843_v21 }
0x198d   : > { %v2845_v46 = vsel %vm2844_vm9, %v2840_v42, inf }
0x198e   : > { %2846 = vmin.xlane.f32.xlu1 %v2845_v46  ;;  %v2850_v49 = vshll.u32 %v2849_v37, 16 }
0x19ff   : > { %v2797_v32 = vpop.f32.mrf.mxu0 }
0x1a00   : > { %v2798_v18 = vadd.f32 %v5510_v27, %v2797_v32 }
0x1a01   : > { %v4644_v44 = vpop.f32.mrf.mxu0 }
0x1a02   : > { %v2804_v6 = vmul.f32 0.2, %v2798_v18 }
0x1a03   : > { %v2800_v47 = vpop.f32.mrf.mxu0 }
0x1a04   : > { %v2806_v51 = vmax.f32 %v2798_v18, %v2804_v6  ;;  %v2801_v53 = vadd.f32 %v5510_v27, %v2800_v47 }
0x1a05   : > { %v4645_v31 = vpop.f32.mrf.mxu0 }
0x1a06   : > { %v5518_v56 = vmax.f32 %v2660_v24, %v2806_v51  ;;  %v2805_v34 = vmul.f32 0.2, %v2801_v53 }
0x1a08   : > { %v2807_v45 = vmax.f32 %v2801_v53, %v2805_v34 }
0x1a0a   : > { %v5520_v63 = vmax.f32 %v2661_v36, %v2807_v45 }
0x1a13   : > { %v2832_v14 = vpop.xlane.xlu1 %2831 }
0x1a14   : > { %v2833_v41 = vcvt.f32.s32 %v2832_v14 }
0x1a16   : > { %v2836_v5 = vadd.s32 %v2835_v1, %v2833_v41 }
0x1a17   : > { %v2847_v8 = vpop.xlane.xlu1 %2846 }
0x1a18   : > { %v2848_v58 = vcvt.f32.s32 %v2847_v8  ;;  %vm2852_vm10 = vcmp.eq.s32.totalorder %v4965_v50, %v2836_v5 }
0x1a19   : > { %v5524_v54 = vsel %vm2852_vm10, -1e+30, %v5475_v23  ;;  %v4307_v10 = vsel %vm2852_vm10, 1.0, %v4805_v2 }
0x1a1a   : > { %v2851_v35 = vadd.s32 %v2850_v49, %v2848_v58  ;;  %v2960_v9 = vsel %vm769_vm5, %v5524_v54, -inf }
0x1a1b   : > { %2961 = vmax.xlane.f32.xlu1 %v2960_v9 }
0x1a1c   : > { %vm2853_vm11 = vcmp.eq.s32.totalorder %v4965_v50, %v2851_v35 }
0x1a1d   : > { %v5531_v57 = vsel %vm2853_vm11, -1e+30, %v5482_v60  ;;  %v4308_v11 = vsel %vm2853_vm11, 1.0, %v4805_v2 }
0x1a1e   : > { %v2963_v12 = vsel %vm769_vm5, %v5531_v57, -inf  ;;  %v2858_v55 = vpack.c.bf16 %v4308_v11, %v4307_v10 }
0x1a1f   : > { %2964 = vmax.xlane.f32.xlu1 %v2963_v12 }
0x1a20   : > { %4649 = vmatmul.mubr.msk.bf16.vlgmr.msra.gmra.mxu1 %vm769_vm5, %v2858_v55 }
0x1a21   : > { %4661 = vmatpush3.bf16.msra.mxu1 %v5406_v59  ;;  %4662 = vmatprep.mubr.msk.bf16.mxu1 %vm4807_vm2, %v4805_v2 }
0x1a22   : > { %4674 = vmatprep.subr.bf16.mxu1 %v4805_v2 }
0x1aa4   : > { %v2962_v23 = vpop.xlane.xlu1 %2961 }
0x1aa5   : > { %vm2966_vm12 = vcmp.ge.f32.partialorder %v5524_v54, %v2962_v23 }
0x1aa6   : > { %v2968_v60 = vsel %vm2966_vm12, %v4965_v50, 16 }
0x1aa7   : > { %v2970_v15 = vsel %vm769_vm5, %v2968_v60, 2147483647 }
0x1aa8   : > { %v2965_v62 = vpop.xlane.xlu1 %2964  ;;  %v2972_v16 = vshra.s32 %v2970_v15, 16  ;;  %v2971_v18 = vand.u32 65535, %v2970_v15 }
0x1aa9   : > { %vm2967_vm13 = vcmp.ge.f32.partialorder %v5531_v57, %v2965_v62 }
0x1aaa   : > { %v2969_v20 = vsel %vm2967_vm13, %v4965_v50, 16  ;;  %v2974_v0 = vcvt.s32.f32 %v2972_v16  ;;  %v2973_v47 = vcvt.s32.f32 %v2971_v18 }
0x1aab   : > { %v2985_v22 = vsel %vm769_vm5, %v2969_v20, 2147483647 }
0x1aac   : > { %2975 = vmin.xlane.f32.xlu1 %v2974_v0  ;;  %v2987_v17 = vshra.s32 %v2985_v22, 16  ;;  %v2986_v44 = vand.u32 65535, %v2985_v22 }
0x1aae   : > { %v2989_v38 = vcvt.s32.f32 %v2987_v17  ;;  %v2988_v51 = vcvt.s32.f32 %v2986_v44 }
0x1ab0   : > { %2990 = vmin.xlane.f32.xlu1 %v2989_v38 }
0x1ae0   : > { %v2896_v40 = vpop.f32.mrf.mxu1 }
0x1ae1   : > { %v2897_v29 = vadd.f32 %v2896_v40, %v5455_v61 }
0x1ae2   : > { %v4650_v48 = vpop.f32.mrf.mxu1 }
0x1ae3   : > { %v2903_v21 = vmul.f32 0.2, %v2897_v29 }
0x1ae4   : > { %v2899_v52 = vpop.f32.mrf.mxu1 }
0x1ae5   : > { %v2900_v42 = vadd.f32 %v2899_v52, %v5459_v3  ;;  %v2905_v32 = vmax.f32 %v2897_v29, %v2903_v21 }
0x1ae6   : > { %v4651_v46 = vpop.f32.mrf.mxu1 }
0x1ae7   : > { %v2904_v30 = vmul.f32 0.2, %v2900_v42 }
0x1ae9   : > { %v2906_v39 = vmax.f32 %v2900_v42, %v2904_v30 }
0x1aeb   : > { %v2907_v13 = vpack.c.bf16 %v2906_v39, %v2905_v32 }
0x1aed   : > { %4657 = vmatmul.mubr.msk.bf16.vlgmr.msra.gmra.mxu0 %vm2610_vm15, %v2907_v13 }
0x1aee   : > { %4667 = vmatpush3.bf16.msra.mxu0 %v5372_v33  ;;  %4670 = vmatprep.mubr.msk.bf16.mxu0 %vm4807_vm2, %v4805_v2 }
0x1aef   : > { %4668 = vmatprep.subr.bf16.mxu0 %v4805_v2 }
0x1af2   : > { %4669 = vmatpush3.bf16.msra.mxu0 %v5441_v4 }
0x1af3   : > { %4680 = vmatprep.subr.bf16.mxu0 %v4805_v2 }
0x1b35   : > { %v2976_v6 = vpop.xlane.xlu1 %2975 }
0x1b36   : > { %vm2977_vm0 = vcmp.eq.f32.partialorder %v2974_v0, %v2976_v6  ;;  %v2982_v58 = vcvt.f32.s32 %v2976_v6 }
0x1b37   : > { %v2978_v24 = vsel %vm2977_vm0, %v2973_v47, inf }
0x1b38   : > { %2979 = vmin.xlane.f32.xlu1 %v2978_v24  ;;  %v2983_v9 = vshll.u32 %v2982_v58, 16 }
0x1b39   : > { %v2991_v25 = vpop.xlane.xlu1 %2990 }
0x1b3a   : > { %vm2992_vm3 = vcmp.eq.f32.partialorder %v2989_v38, %v2991_v25  ;;  %v2997_v10 = vcvt.f32.s32 %v2991_v25 }
0x1b3b   : > { %v2993_v53 = vsel %vm2992_vm3, %v2988_v51, inf }
0x1b3c   : > { %2994 = vmin.xlane.f32.xlu1 %v2993_v53  ;;  %v2998_v23 = vshll.u32 %v2997_v10, 16 }
0x1bad   : > { %v2945_v31 = vpop.f32.mrf.mxu0 }
0x1bae   : > { %v2946_v34 = vadd.f32 %v5510_v27, %v2945_v31 }
0x1baf   : > { %v4658_v36 = vpop.f32.mrf.mxu0 }
0x1bb0   : > { %v2952_v45 = vmul.f32 0.2, %v2946_v34 }
0x1bb1   : > { %v2948_v43 = vpop.f32.mrf.mxu0 }
0x1bb2   : > { %v2954_v14 = vmax.f32 %v2946_v34, %v2952_v45  ;;  %v2949_v1 = vadd.f32 %v5510_v27, %v2948_v43 }
0x1bb3   : > { %v4659_v37 = vpop.f32.mrf.mxu0 }
0x1bb4   : > { %v5559_v41 = vmax.f32 %v5518_v56, %v2954_v14  ;;  %v2953_v5 = vmul.f32 0.2, %v2949_v1 }
0x1bb6   : > { %v2955_v8 = vmax.f32 %v2949_v1, %v2953_v5 }
0x1bb8   : > { %v5562_v49 = vmax.f32 %v5520_v63, %v2955_v8 }
0x1bc1   : > { %v2980_v35 = vpop.xlane.xlu1 %2979 }
0x1bc2   : > { %v2981_v11 = vcvt.f32.s32 %v2980_v35 }
0x1bc4   : > { %v2984_v12 = vadd.s32 %v2983_v9, %v2981_v11 }
0x1bc5   : > { %v2995_v55 = vpop.xlane.xlu1 %2994 }
0x1bc6   : > { %vm3000_vm4 = vcmp.eq.s32.totalorder %v4965_v50, %v2984_v12  ;;  %v2996_v60 = vcvt.f32.s32 %v2995_v55 }
0x1bc7   : > { %v5566_v15 = vsel %vm3000_vm4, -1e+30, %v5524_v54  ;;  %v4311_v63 = vsel %vm3000_vm4, 1.0, %v4805_v2 }
0x1bc8   : > { %v2999_v56 = vadd.s32 %v2998_v23, %v2996_v60  ;;  %v3108_v62 = vsel %vm769_vm5, %v5566_v15, -inf }
0x1bc9   : > { %3109 = vmax.xlane.f32.xlu1 %v3108_v62 }
0x1bca   : > { %vm3001_vm6 = vcmp.eq.s32.totalorder %v4965_v50, %v2999_v56 }
0x1bcb   : > { %v5573_v16 = vsel %vm3001_vm6, -1e+30, %v5531_v57  ;;  %v4312_v20 = vsel %vm3001_vm6, 1.0, %v4805_v2 }
0x1bcc   : > { %v3111_v0 = vsel %vm769_vm5, %v5573_v16, -inf  ;;  %v3006_v22 = vpack.c.bf16 %v4312_v20, %v4311_v63 }
0x1bcd   : > { %3112 = vmax.xlane.f32.xlu0 %v3111_v0 }
0x1bce   : > { %4663 = vmatmul.mubr.msk.bf16.vlgmr.msra.gmra.mxu1 %vm769_vm5, %v3006_v22 }
0x1bcf   : > { %4675 = vmatpush3.bf16.msra.mxu1 %v5406_v59  ;;  %4676 = vmatprep.mubr.msk.bf16.mxu1 %vm4807_vm2, %v4805_v2 }
0x1bd0   : > { %4688 = vmatprep.subr.bf16.mxu1 %v4805_v2 }
0x1c52   : > { %v3110_v54 = vpop.xlane.xlu1 %3109 }
0x1c53   : > { %vm3114_vm1 = vcmp.ge.f32.partialorder %v5566_v15, %v3110_v54 }
0x1c54   : > { %v3116_v57 = vsel %vm3114_vm1, %v4965_v50, 16 }
0x1c55   : > { %v3118_v17 = vsel %vm769_vm5, %v3116_v57, 2147483647 }
0x1c56   : > { %v3120_v38 = vshra.s32 %v3118_v17, 16  ;;  %v3113_v40 = vpop.xlane.xlu0 %3112  ;;  %v3119_v51 = vand.u32 65535, %v3118_v17 }
0x1c57   : > { %vm3115_vm7 = vcmp.ge.f32.partialorder %v5573_v16, %v3113_v40 }
0x1c58   : > { %v3117_v29 = vsel %vm3115_vm7, %v4965_v50, 16  ;;  %v3122_v48 = vcvt.s32.f32 %v3120_v38  ;;  %v3121_v31 = vcvt.s32.f32 %v3119_v51 }
0x1c59   : > { %v3133_v52 = vsel %vm769_vm5, %v3117_v29, 2147483647 }
0x1c5a   : > { %3123 = vmin.xlane.f32.xlu1 %v3122_v48  ;;  %v3135_v21 = vshra.s32 %v3133_v52, 16  ;;  %v3134_v34 = vand.u32 65535, %v3133_v52 }
0x1c5c   : > { %v3137_v42 = vcvt.s32.f32 %v3135_v21  ;;  %v3136_v43 = vcvt.s32.f32 %v3134_v34 }
0x1c5e   : > { %3138 = vmin.xlane.f32.xlu0 %v3137_v42 }
0x1c8e   : > { %v3044_v46 = vpop.f32.mrf.mxu1 }
0x1c8f   : > { %v3045_v30 = vadd.f32 %v3044_v46, %v5455_v61 }
0x1c90   : > { %v4664_v32 = vpop.f32.mrf.mxu1 }
0x1c91   : > { %v3051_v13 = vmul.f32 0.2, %v3045_v30 }
0x1c92   : > { %v3047_v39 = vpop.f32.mrf.mxu1 }
0x1c93   : > { %v3048_v18 = vadd.f32 %v3047_v39, %v5459_v3  ;;  %v3053_v47 = vmax.f32 %v3045_v30, %v3051_v13 }
0x1c94   : > { %v4665_v44 = vpop.f32.mrf.mxu1 }
0x1c95   : > { %v3052_v6 = vmul.f32 0.2, %v3048_v18 }
0x1c97   : > { %v3054_v24 = vmax.f32 %v3048_v18, %v3052_v6 }
0x1c99   : > { %v3055_v25 = vpack.c.bf16 %v3054_v24, %v3053_v47 }
0x1c9b   : > { %4671 = vmatmul.mubr.msk.bf16.vlgmr.msra.gmra.mxu0 %vm2610_vm15, %v3055_v25 }
0x1c9c   : > { %4681 = vmatpush3.bf16.msra.mxu0 %v5372_v33  ;;  %4684 = vmatprep.mubr.msk.bf16.mxu0 %vm4807_vm2, %v4805_v2 }
0x1c9d   : > { %4682 = vmatprep.subr.bf16.mxu0 %v4805_v2 }
0x1ca0   : > { %4683 = vmatpush3.bf16.msra.mxu0 %v5441_v4 }
0x1ca1   : > { %4694 = vmatprep.subr.bf16.mxu0 %v4805_v2 }
0x1ce3   : > { %v3124_v53 = vpop.xlane.xlu1 %3123 }
0x1ce4   : > { %vm3125_vm8 = vcmp.eq.f32.partialorder %v3122_v48, %v3124_v53  ;;  %v3130_v60 = vcvt.f32.s32 %v3124_v53 }
0x1ce5   : > { %v3126_v36 = vsel %vm3125_vm8, %v3121_v31, inf }
0x1ce6   : > { %3127 = vmin.xlane.f32.xlu1 %v3126_v36  ;;  %v3131_v62 = vshll.u32 %v3130_v60, 16 }
0x1ce7   : > { %v3139_v45 = vpop.xlane.xlu0 %3138 }
0x1ce8   : > { %vm3140_vm9 = vcmp.eq.f32.partialorder %v3137_v42, %v3139_v45  ;;  %v3145_v63 = vcvt.f32.s32 %v3139_v45 }
0x1ce9   : > { %v3141_v14 = vsel %vm3140_vm9, %v3136_v43, inf }
0x1cea   : > { %3142 = vmin.xlane.f32.xlu0 %v3141_v14  ;;  %v3146_v54 = vshll.u32 %v3145_v63, 16 }
0x1d5b   : > { %v3093_v1 = vpop.f32.mrf.mxu0 }
0x1d5c   : > { %v3094_v37 = vadd.f32 %v5510_v27, %v3093_v1 }
0x1d5d   : > { %v4672_v5 = vpop.f32.mrf.mxu0 }
0x1d5e   : > { %v3100_v8 = vmul.f32 0.2, %v3094_v37 }
0x1d5f   : > { %v3096_v58 = vpop.f32.mrf.mxu0 }
0x1d60   : > { %v3102_v35 = vmax.f32 %v3094_v37, %v3100_v8  ;;  %v3097_v9 = vadd.f32 %v5510_v27, %v3096_v58 }
0x1d61   : > { %v4673_v10 = vpop.f32.mrf.mxu0 }
0x1d62   : > { %v5601_v11 = vmax.f32 %v5559_v41, %v3102_v35  ;;  %v3101_v12 = vmul.f32 0.2, %v3097_v9 }
0x1d64   : > { %v3103_v55 = vmax.f32 %v3097_v9, %v3101_v12 }
0x1d66   : > { %v5604_v23 = vmax.f32 %v5562_v49, %v3103_v55 }
0x1d6f   : > { %v3128_v56 = vpop.xlane.xlu1 %3127 }
0x1d70   : > { %v3129_v20 = vcvt.f32.s32 %v3128_v56 }
0x1d72   : > { %v3132_v0 = vadd.s32 %v3131_v62, %v3129_v20 }
0x1d73   : > { %v3143_v22 = vpop.xlane.xlu0 %3142 }
0x1d74   : > { %vm3148_vm10 = vcmp.eq.s32.totalorder %v4965_v50, %v3132_v0  ;;  %v3144_v57 = vcvt.f32.s32 %v3143_v22 }
0x1d75   : > { %v5608_v17 = vsel %vm3148_vm10, -1e+30, %v5566_v15  ;;  %v4315_v49 = vsel %vm3148_vm10, 1.0, %v4805_v2 }
0x1d76   : > { %v3147_v41 = vadd.s32 %v3146_v54, %v3144_v57  ;;  %v3256_v38 = vsel %vm769_vm5, %v5608_v17, -inf }
0x1d77   : > { %3257 = vmax.xlane.f32.xlu1 %v3256_v38 }
0x1d78   : > { %vm3149_vm11 = vcmp.eq.s32.totalorder %v4965_v50, %v3147_v41 }
0x1d79   : > { %v5615_v40 = vsel %vm3149_vm11, -1e+30, %v5573_v16  ;;  %v4316_v29 = vsel %vm3149_vm11, 1.0, %v4805_v2 }
0x1d7a   : > { %v3259_v48 = vsel %vm769_vm5, %v5615_v40, -inf  ;;  %v3154_v52 = vpack.c.bf16 %v4316_v29, %v4315_v49 }
0x1d7b   : > { %3260 = vmax.xlane.f32.xlu0 %v3259_v48 }
0x1d7c   : > { %4677 = vmatmul.mubr.msk.bf16.vlgmr.msra.gmra.mxu1 %vm769_vm5, %v3154_v52 }
0x1d7d   : > { %4689 = vmatpush3.bf16.msra.mxu1 %v5406_v59  ;;  %4690 = vmatprep.mubr.msk.bf16.mxu1 %vm4807_vm2, %v4805_v2 }
0x1d7e   : > { %4702 = vmatprep.subr.bf16.mxu1 %v4805_v2 }
0x1e00   : > { %v3258_v15 = vpop.xlane.xlu1 %3257 }
0x1e01   : > { %vm3262_vm12 = vcmp.ge.f32.partialorder %v5608_v17, %v3258_v15 }
0x1e02   : > { %v3264_v16 = vsel %vm3262_vm12, %v4965_v50, 16 }
0x1e03   : > { %v3266_v21 = vsel %vm769_vm5, %v3264_v16, 2147483647 }
0x1e04   : > { %v3268_v42 = vshra.s32 %v3266_v21, 16  ;;  %v3261_v46 = vpop.xlane.xlu0 %3260  ;;  %v3267_v43 = vand.u32 65535, %v3266_v21 }
0x1e05   : > { %vm3263_vm13 = vcmp.ge.f32.partialorder %v5615_v40, %v3261_v46 }
0x1e06   : > { %v3265_v30 = vsel %vm3263_vm13, %v4965_v50, 16  ;;  %v3270_v32 = vcvt.s32.f32 %v3268_v42  ;;  %v3269_v1 = vcvt.s32.f32 %v3267_v43 }
0x1e07   : > { %v3281_v39 = vsel %vm769_vm5, %v3265_v30, 2147483647 }
0x1e08   : > { %3271 = vmin.xlane.f32.xlu1 %v3270_v32  ;;  %v3283_v13 = vshra.s32 %v3281_v39, 16  ;;  %v3282_v37 = vand.u32 65535, %v3281_v39 }
0x1e0a   : > { %v3285_v18 = vcvt.s32.f32 %v3283_v13  ;;  %v3284_v58 = vcvt.s32.f32 %v3282_v37 }
0x1e0c   : > { %3286 = vmin.xlane.f32.xlu0 %v3285_v18 }
0x1e3c   : > { %v3192_v44 = vpop.f32.mrf.mxu1 }
0x1e3d   : > { %v3193_v6 = vadd.f32 %v3192_v44, %v5455_v61 }
0x1e3e   : > { %v4678_v47 = vpop.f32.mrf.mxu1 }
0x1e3f   : > { %v3199_v25 = vmul.f32 0.2, %v3193_v6 }
0x1e40   : > { %v3195_v24 = vpop.f32.mrf.mxu1 }
0x1e41   : > { %v3196_v51 = vadd.f32 %v3195_v24, %v5459_v3  ;;  %v3201_v34 = vmax.f32 %v3193_v6, %v3199_v25 }
0x1e42   : > { %v4679_v53 = vpop.f32.mrf.mxu1 }
0x1e43   : > { %v3200_v31 = vmul.f32 0.2, %v3196_v51 }
0x1e45   : > { %v3202_v36 = vmax.f32 %v3196_v51, %v3200_v31 }
0x1e47   : > { %v3203_v45 = vpack.c.bf16 %v3202_v36, %v3201_v34 }
0x1e49   : > { %4685 = vmatmul.mubr.msk.bf16.vlgmr.msra.gmra.mxu0 %vm2610_vm15, %v3203_v45 }
0x1e4a   : > { %4695 = vmatpush3.bf16.msra.mxu0 %v5372_v33  ;;  %4698 = vmatprep.mubr.msk.bf16.mxu0 %vm4807_vm2, %v4805_v2 }
0x1e4b   : > { %4696 = vmatprep.subr.bf16.mxu0 %v4805_v2 }
0x1e4e   : > { %4697 = vmatpush3.bf16.msra.mxu0 %v5441_v4 }
0x1e4f   : > { %4708 = vmatprep.subr.bf16.mxu0 %v4805_v2 }
0x1e91   : > { %v3272_v14 = vpop.xlane.xlu1 %3271 }
0x1e92   : > { %vm3273_vm0 = vcmp.eq.f32.partialorder %v3270_v32, %v3272_v14  ;;  %v3278_v57 = vcvt.f32.s32 %v3272_v14 }
0x1e93   : > { %v3274_v5 = vsel %vm3273_vm0, %v3269_v1, inf }
0x1e94   : > { %3275 = vmin.xlane.f32.xlu1 %v3274_v5  ;;  %v3279_v38 = vshll.u32 %v3278_v57, 16 }
0x1e95   : > { %v3287_v8 = vpop.xlane.xlu0 %3286 }
0x1e96   : > { %vm3288_vm3 = vcmp.eq.f32.partialorder %v3285_v18, %v3287_v8  ;;  %v3293_v49 = vcvt.f32.s32 %v3287_v8 }
0x1e97   : > { %v3289_v35 = vsel %vm3288_vm3, %v3284_v58, inf }
0x1e98   : > { %3290 = vmin.xlane.f32.xlu0 %v3289_v35  ;;  %v3294_v15 = vshll.u32 %v3293_v49, 16 }
0x1f09   : > { %v3241_v9 = vpop.f32.mrf.mxu0 }
0x1f0a   : > { %v3242_v10 = vadd.f32 %v5510_v27, %v3241_v9 }
0x1f0b   : > { %v4686_v12 = vpop.f32.mrf.mxu0 }
0x1f0c   : > { %v3248_v55 = vmul.f32 0.2, %v3242_v10 }
0x1f0d   : > { %v3244_v60 = vpop.f32.mrf.mxu0 }
0x1f0e   : > { %v3250_v56 = vmax.f32 %v3242_v10, %v3248_v55  ;;  %v3245_v62 = vadd.f32 %v5510_v27, %v3244_v60 }
0x1f0f   : > { %v4687_v63 = vpop.f32.mrf.mxu0 }
0x1f10   : > { %v5643_v20 = vmax.f32 %v5601_v11, %v3250_v56  ;;  %v3249_v0 = vmul.f32 0.2, %v3245_v62 }
0x1f12   : > { %v3251_v22 = vmax.f32 %v3245_v62, %v3249_v0 }
0x1f14   : > { %v5646_v54 = vmax.f32 %v5604_v23, %v3251_v22 }
0x1f1d   : > { %v3276_v41 = vpop.xlane.xlu1 %3275 }
0x1f1e   : > { %v3277_v29 = vcvt.f32.s32 %v3276_v41 }
0x1f20   : > { %v3280_v48 = vadd.s32 %v3279_v38, %v3277_v29 }
0x1f21   : > { %v3291_v52 = vpop.xlane.xlu0 %3290 }
0x1f22   : > { %vm3296_vm4 = vcmp.eq.s32.totalorder %v4965_v50, %v3280_v48  ;;  %v3292_v16 = vcvt.f32.s32 %v3291_v52 }
0x1f23   : > { %v5650_v21 = vsel %vm3296_vm4, -1e+30, %v5608_v17  ;;  %v4319_v23 = vsel %vm3296_vm4, 1.0, %v4805_v2 }
0x1f24   : > { %v3295_v11 = vadd.s32 %v3294_v15, %v3292_v16  ;;  %v3404_v42 = vsel %vm769_vm5, %v5650_v21, -inf }
0x1f25   : > { %3405 = vmax.xlane.f32.xlu1 %v3404_v42 }
0x1f26   : > { %vm3297_vm6 = vcmp.eq.s32.totalorder %v4965_v50, %v3295_v11 }
0x1f27   : > { %v5657_v46 = vsel %vm3297_vm6, -1e+30, %v5615_v40  ;;  %v4320_v30 = vsel %vm3297_vm6, 1.0, %v4805_v2 }
0x1f28   : > { %v3407_v32 = vsel %vm769_vm5, %v5657_v46, -inf  ;;  %v3302_v39 = vpack.c.bf16 %v4320_v30, %v4319_v23 }
0x1f29   : > { %3408 = vmax.xlane.f32.xlu0 %v3407_v32 }
0x1f2a   : > { %4691 = vmatmul.mubr.msk.bf16.vlgmr.msra.gmra.mxu1 %vm769_vm5, %v3302_v39 }
0x1f2b   : > { %4703 = vmatpush3.bf16.msra.mxu1 %v5406_v59  ;;  %4704 = vmatprep.mubr.msk.bf16.mxu1 %vm4807_vm2, %v4805_v2 }
0x1f2c   : > { %4716 = vmatprep.subr.bf16.mxu1 %v4805_v2 }
0x1fae   : > { %v3406_v17 = vpop.xlane.xlu1 %3405 }
0x1faf   : > { %vm3410_vm1 = vcmp.ge.f32.partialorder %v5650_v21, %v3406_v17 }
0x1fb0   : > { %v3412_v40 = vsel %vm3410_vm1, %v4965_v50, 16 }
0x1fb1   : > { %v3414_v13 = vsel %vm769_vm5, %v3412_v40, 2147483647 }
0x1fb2   : > { %v3416_v18 = vshra.s32 %v3414_v13, 16  ;;  %v3409_v44 = vpop.xlane.xlu0 %3408  ;;  %v3415_v58 = vand.u32 65535, %v3414_v13 }
0x1fb3   : > { %vm3411_vm7 = vcmp.ge.f32.partialorder %v5657_v46, %v3409_v44 }
0x1fb4   : > { %v3413_v6 = vsel %vm3411_vm7, %v4965_v50, 16  ;;  %v3418_v47 = vcvt.s32.f32 %v3416_v18  ;;  %v3417_v10 = vcvt.s32.f32 %v3415_v58 }
0x1fb5   : > { %v3429_v24 = vsel %vm769_vm5, %v3413_v6, 2147483647 }
0x1fb6   : > { %3419 = vmin.xlane.f32.xlu1 %v3418_v47  ;;  %v3431_v25 = vshra.s32 %v3429_v24, 16  ;;  %v3430_v35 = vand.u32 65535, %v3429_v24 }
0x1fb8   : > { %v3433_v51 = vcvt.s32.f32 %v3431_v25  ;;  %v3432_v60 = vcvt.s32.f32 %v3430_v35 }
0x1fba   : > { %3434 = vmin.xlane.f32.xlu0 %v3433_v51 }
0x1fea   : > { %v3340_v53 = vpop.f32.mrf.mxu1 }
0x1feb   : > { %v3341_v31 = vadd.f32 %v3340_v53, %v5455_v61 }
0x1fec   : > { %v4692_v34 = vpop.f32.mrf.mxu1 }
0x1fed   : > { %v3347_v45 = vmul.f32 0.2, %v3341_v31 }
0x1fee   : > { %v3343_v36 = vpop.f32.mrf.mxu1 }
0x1fef   : > { %v3344_v43 = vadd.f32 %v3343_v36, %v5459_v3  ;;  %v3349_v37 = vmax.f32 %v3341_v31, %v3347_v45 }
0x1ff0   : > { %v4693_v14 = vpop.f32.mrf.mxu1 }
0x1ff1   : > { %v3348_v1 = vmul.f32 0.2, %v3344_v43 }
0x1ff3   : > { %v3350_v5 = vmax.f32 %v3344_v43, %v3348_v1 }
0x1ff5   : > { %v3351_v8 = vpack.c.bf16 %v3350_v5, %v3349_v37 }
0x1ff7   : > { %4699 = vmatmul.mubr.msk.bf16.vlgmr.msra.gmra.mxu0 %vm2610_vm15, %v3351_v8 }
0x1ff8   : > { %4709 = vmatpush3.bf16.msra.mxu0 %v5372_v33  ;;  %4712 = vmatprep.mubr.msk.bf16.mxu0 %vm4807_vm2, %v4805_v2 }
0x1ff9   : > { %4710 = vmatprep.subr.bf16.mxu0 %v4805_v2 }
0x1ffc   : > { %4711 = vmatpush3.bf16.msra.mxu0 %v5441_v4 }
0x1ffd   : > { %4722 = vmatprep.subr.bf16.mxu0 %v4805_v2 }
0x203f   : > { %v3420_v9 = vpop.xlane.xlu1 %3419 }
0x2040   : > { %vm3421_vm8 = vcmp.eq.f32.partialorder %v3418_v47, %v3420_v9  ;;  %v3426_v16 = vcvt.f32.s32 %v3420_v9 }
0x2041   : > { %v3422_v12 = vsel %vm3421_vm8, %v3417_v10, inf }
0x2042   : > { %3423 = vmin.xlane.f32.xlu1 %v3422_v12  ;;  %v3427_v42 = vshll.u32 %v3426_v16, 16 }
0x2043   : > { %v3435_v55 = vpop.xlane.xlu0 %3434 }
0x2044   : > { %vm3436_vm9 = vcmp.eq.f32.partialorder %v3433_v51, %v3435_v55  ;;  %v3441_v23 = vcvt.f32.s32 %v3435_v55 }
0x2045   : > { %v3437_v56 = vsel %vm3436_vm9, %v3432_v60, inf }
0x2046   : > { %3438 = vmin.xlane.f32.xlu0 %v3437_v56  ;;  %v3442_v17 = vshll.u32 %v3441_v23, 16 }
0x20b7   : > { %v3389_v62 = vpop.f32.mrf.mxu0 }
0x20b8   : > { %v3390_v63 = vadd.f32 %v5510_v27, %v3389_v62 }
0x20b9   : > { %v4700_v0 = vpop.f32.mrf.mxu0 }
0x20ba   : > { %v3396_v22 = vmul.f32 0.2, %v3390_v63 }
0x20bb   : > { %v3392_v57 = vpop.f32.mrf.mxu0 }
0x20bc   : > { %v3398_v41 = vmax.f32 %v3390_v63, %v3396_v22  ;;  %v3393_v38 = vadd.f32 %v5510_v27, %v3392_v57 }
0x20bd   : > { %v4701_v49 = vpop.f32.mrf.mxu0 }
0x20be   : > { %v5685_v29 = vmax.f32 %v5643_v20, %v3398_v41  ;;  %v3397_v48 = vmul.f32 0.2, %v3393_v38 }
0x20c0   : > { %v3399_v52 = vmax.f32 %v3393_v38, %v3397_v48 }
0x20c2   : > { %v5688_v15 = vmax.f32 %v5646_v54, %v3399_v52 }
0x20cb   : > { %v3424_v11 = vpop.xlane.xlu1 %3423 }
0x20cc   : > { %v3425_v30 = vcvt.f32.s32 %v3424_v11 }
0x20ce   : > { %v3428_v32 = vadd.s32 %v3427_v42, %v3425_v30 }
0x20cf   : > { %v3439_v39 = vpop.xlane.xlu0 %3438 }
0x20d0   : > { %vm3444_vm10 = vcmp.eq.s32.totalorder %v4965_v50, %v3428_v32  ;;  %v3440_v40 = vcvt.f32.s32 %v3439_v39 }
0x20d1   : > { %v5692_v13 = vsel %vm3444_vm10, -1e+30, %v5650_v21  ;;  %v4323_v54 = vsel %vm3444_vm10, 1.0, %v4805_v2 }
0x20d2   : > { %v3443_v20 = vadd.s32 %v3442_v17, %v3440_v40  ;;  %v3552_v18 = vsel %vm769_vm5, %v5692_v13, -inf }
0x20d3   : > { %3553 = vmax.xlane.f32.xlu1 %v3552_v18 }
0x20d4   : > { %vm3445_vm11 = vcmp.eq.s32.totalorder %v4965_v50, %v3443_v20 }
0x20d5   : > { %v4324_v44 = vsel %vm3445_vm11, 1.0, %v4805_v2  ;;  %v5700_v6 = vsel %vm3445_vm11, -1e+30, %v5657_v46 }
0x20d6   : > { %v3450_v47 = vpack.c.bf16 %v4324_v44, %v4323_v54  ;;  %v3555_v24 = vsel %vm769_vm5, %v5700_v6, -inf }
0x20d7   : > { %3556 = vmax.xlane.f32.xlu0 %v3555_v24 }
0x20d8   : > { %4705 = vmatmul.mubr.msk.bf16.vlgmr.msra.gmra.mxu1 %vm769_vm5, %v3450_v47 }
0x20d9   : > { %4717 = vmatpush3.bf16.msra.mxu1 %v5406_v59  ;;  %4718 = vmatprep.mubr.msk.bf16.mxu1 %vm4807_vm2, %v4805_v2 }
0x20da   : > { %4730 = vmatprep.subr.bf16.mxu1 %v4805_v2 }
0x215c   : > { %v3554_v21 = vpop.xlane.xlu1 %3553 }
0x215d   : > { %vm3558_vm12 = vcmp.ge.f32.partialorder %v5692_v13, %v3554_v21 }
0x215e   : > { %v3560_v46 = vsel %vm3558_vm12, %v4965_v50, 16 }
0x215f   : > { %v3562_v25 = vsel %vm769_vm5, %v3560_v46, 2147483647 }
0x2160   : > { %v3564_v51 = vshra.s32 %v3562_v25, 16  ;;  %v3557_v53 = vpop.xlane.xlu0 %3556  ;;  %v3563_v60 = vand.u32 65535, %v3562_v25 }
0x2161   : > { %vm3559_vm13 = vcmp.ge.f32.partialorder %v5700_v6, %v3557_v53 }
0x2162   : > { %v3561_v31 = vsel %vm3559_vm13, %v4965_v50, 16  ;;  %v3566_v34 = vcvt.s32.f32 %v3564_v51  ;;  %v3565_v63 = vcvt.s32.f32 %v3563_v60 }
0x2163   : > { %v3577_v36 = vsel %vm769_vm5, %v3561_v31, 2147483647 }
0x2164   : > { %v3579_v45 = vshra.s32 %v3577_v36, 16  ;;  %3567 = vmin.xlane.f32.xlu1 %v3566_v34  ;;  %v3578_v56 = vand.u32 65535, %v3577_v36 }
0x2166   : > { %v3581_v43 = vcvt.s32.f32 %v3579_v45  ;;  %v3580_v57 = vcvt.s32.f32 %v3578_v56 }
0x2168   : > { %3582 = vmin.xlane.f32.xlu0 %v3581_v43 }
0x2198   : > { %v3488_v14 = vpop.f32.mrf.mxu1 }
0x2199   : > { %v3489_v1 = vadd.f32 %v3488_v14, %v5455_v61 }
0x219a   : > { %v4706_v37 = vpop.f32.mrf.mxu1 }
0x219b   : > { %v3495_v8 = vmul.f32 0.2, %v3489_v1 }
0x219c   : > { %v3491_v5 = vpop.f32.mrf.mxu1 }
0x219d   : > { %v3492_v58 = vadd.f32 %v3491_v5, %v5459_v3  ;;  %v3497_v10 = vmax.f32 %v3489_v1, %v3495_v8 }
0x219e   : > { %v4707_v35 = vpop.f32.mrf.mxu1 }
0x219f   : > { %v3496_v9 = vmul.f32 0.2, %v3492_v58 }
0x21a1   : > { %v3498_v12 = vmax.f32 %v3492_v58, %v3496_v9 }
0x21a3   : > { %v3499_v55 = vpack.c.bf16 %v3498_v12, %v3497_v10 }
0x21a5   : > { %4713 = vmatmul.mubr.msk.bf16.vlgmr.msra.gmra.mxu0 %vm2610_vm15, %v3499_v55 }
0x21a6   : > { %4723 = vmatpush3.bf16.msra.mxu0 %v5372_v33  ;;  %4726 = vmatprep.mubr.msk.bf16.mxu0 %vm4807_vm2, %v4805_v2 }
0x21a7   : > { %4724 = vmatprep.subr.bf16.mxu0 %v4805_v2 }
0x21aa   : > { %4725 = vmatpush3.bf16.msra.mxu0 %v5441_v4 }
0x21ab   : > { %4736 = vmatprep.subr.bf16.mxu0 %v4805_v2 }
0x21ed   : > { %v3568_v62 = vpop.xlane.xlu1 %3567 }
0x21ee   : > { %vm3569_vm0 = vcmp.eq.f32.partialorder %v3566_v34, %v3568_v62  ;;  %v3574_v40 = vcvt.f32.s32 %v3568_v62 }
0x21ef   : > { %v3570_v0 = vsel %vm3569_vm0, %v3565_v63, inf }
0x21f0   : > { %3571 = vmin.xlane.f32.xlu1 %v3570_v0  ;;  %v3575_v18 = vshll.u32 %v3574_v40, 16 }
0x21f1   : > { %v3583_v22 = vpop.xlane.xlu0 %3582 }
0x21f2   : > { %vm3584_vm3 = vcmp.eq.f32.partialorder %v3581_v43, %v3583_v22  ;;  %v3589_v54 = vcvt.f32.s32 %v3583_v22 }
0x21f3   : > { %v3585_v41 = vsel %vm3584_vm3, %v3580_v57, inf }
0x21f4   : > { %3586 = vmin.xlane.f32.xlu0 %v3585_v41  ;;  %v3590_v21 = vshll.u32 %v3589_v54, 16 }
0x2265   : > { %v3537_v38 = vpop.f32.mrf.mxu0 }
0x2266   : > { %v3538_v49 = vadd.f32 %v5510_v27, %v3537_v38 }
0x2267   : > { %v4714_v48 = vpop.f32.mrf.mxu0 }
0x2268   : > { %v3544_v52 = vmul.f32 0.2, %v3538_v49 }
0x2269   : > { %v3540_v16 = vpop.f32.mrf.mxu0 }
0x226a   : > { %v3546_v11 = vmax.f32 %v3538_v49, %v3544_v52  ;;  %v3541_v42 = vadd.f32 %v5510_v27, %v3540_v16 }
0x226b   : > { %v4715_v23 = vpop.f32.mrf.mxu0 }
0x226c   : > { %v5727_v30 = vmax.f32 %v5685_v29, %v3546_v11  ;;  %v3545_v32 = vmul.f32 0.2, %v3541_v42 }
0x226e   : > { %v3547_v39 = vmax.f32 %v3541_v42, %v3545_v32 }
0x2270   : > { %v5730_v17 = vmax.f32 %v5688_v15, %v3547_v39 }
0x2279   : > { %v3572_v20 = vpop.xlane.xlu1 %3571 }
0x227a   : > { %v3573_v44 = vcvt.f32.s32 %v3572_v20 }
0x227c   : > { %v3576_v47 = vadd.s32 %v3575_v18, %v3573_v44 }
0x227d   : > { %v3587_v24 = vpop.xlane.xlu0 %3586 }
0x227e   : > { %vm3592_vm4 = vcmp.eq.s32.totalorder %v4965_v50, %v3576_v47  ;;  %v3588_v46 = vcvt.f32.s32 %v3587_v24 }
0x227f   : > { %v5734_v25 = vsel %vm3592_vm4, -1e+30, %v5692_v13  ;;  %v4327_v15 = vsel %vm3592_vm4, 1.0, %v4805_v2 }
0x2280   : > { %v3591_v29 = vadd.s32 %v3590_v21, %v3588_v46  ;;  %v3700_v51 = vsel %vm769_vm5, %v5734_v25, -inf }
0x2281   : > { %3701 = vmax.xlane.f32.xlu1 %v3700_v51 }
0x2282   : > { %vm3593_vm6 = vcmp.eq.s32.totalorder %v4965_v50, %v3591_v29 }
0x2283   : > { %v4328_v53 = vsel %vm3593_vm6, 1.0, %v4805_v2  ;;  %v5742_v31 = vsel %vm3593_vm6, -1e+30, %v5700_v6 }
0x2284   : > { %v3598_v34 = vpack.c.bf16 %v4328_v53, %v4327_v15  ;;  %v3703_v36 = vsel %vm769_vm5, %v5742_v31, -inf }
0x2285   : > { %3704 = vmax.xlane.f32.xlu0 %v3703_v36 }
0x2286   : > { %4719 = vmatmul.mubr.msk.bf16.vlgmr.msra.gmra.mxu1 %vm769_vm5, %v3598_v34 }
0x2287   : > { %4731 = vmatpush3.bf16.msra.mxu1 %v5406_v59  ;;  %4732 = vmatprep.mubr.msk.bf16.mxu1 %vm4807_vm2, %v4805_v2 }
0x2288   : > { %4744 = vmatprep.subr.bf16.mxu1 %v4805_v2 }
0x230a   : > { %v3702_v13 = vpop.xlane.xlu1 %3701 }
0x230b   : > { %vm3706_vm1 = vcmp.ge.f32.partialorder %v5734_v25, %v3702_v13 }
0x230c   : > { %v3708_v6 = vsel %vm3706_vm1, %v4965_v50, 16  ;;  %vm4093_vm1 = vcmask 1042432  }
0x230d   : > { %v3710_v45 = vsel %vm769_vm5, %v3708_v6, 2147483647 }
0x230e   : > { %v3712_v43 = vshra.s32 %v3710_v45, 16  ;;  %v3705_v14 = vpop.xlane.xlu0 %3704  ;;  %v3711_v57 = vand.u32 65535, %v3710_v45 }
0x230f   : > { %vm3707_vm7 = vcmp.ge.f32.partialorder %v5742_v31, %v3705_v14 }
0x2310   : > { %v3709_v1 = vsel %vm3707_vm7, %v4965_v50, 16  ;;  %v3714_v37 = vcvt.s32.f32 %v3712_v43  ;;  %v3713_v49 = vcvt.s32.f32 %v3711_v57 }
0x2311   : > { %v3725_v5 = vsel %vm769_vm5, %v3709_v1, 2147483647 }
0x2312   : > { %v3727_v8 = vshra.s32 %v3725_v5, 16  ;;  %3715 = vmin.xlane.f32.xlu1 %v3714_v37  ;;  %v3726_v41 = vand.u32 65535, %v3725_v5 }
0x2314   : > { %v3729_v58 = vcvt.s32.f32 %v3727_v8  ;;  %v3728_v16 = vcvt.s32.f32 %v3726_v41 }
0x2316   : > { %3730 = vmin.xlane.f32.xlu0 %v3729_v58 }
0x2346   : > { %v3636_v35 = vpop.f32.mrf.mxu1 }
0x2347   : > { %v3637_v9 = vadd.f32 %v3636_v35, %v5455_v61 }
0x2348   : > { %v4720_v10 = vpop.f32.mrf.mxu1 }
0x2349   : > { %v3643_v55 = vmul.f32 0.2, %v3637_v9 }
0x234a   : > { %v3639_v12 = vpop.f32.mrf.mxu1 }
0x234b   : > { %v3640_v60 = vadd.f32 %v3639_v12, %v5459_v3  ;;  %v3645_v63 = vmax.f32 %v3637_v9, %v3643_v55 }
0x234c   : > { %v4721_v56 = vpop.f32.mrf.mxu1 }
0x234d   : > { %v3644_v62 = vmul.f32 0.2, %v3640_v60 }
0x234f   : > { %v3646_v0 = vmax.f32 %v3640_v60, %v3644_v62 }
0x2351   : > { %v3647_v22 = vpack.c.bf16 %v3646_v0, %v3645_v63 }
0x2353   : > { %4727 = vmatmul.mubr.msk.bf16.vlgmr.msra.gmra.mxu0 %vm2610_vm15, %v3647_v22 }
0x2354   : > { %4737 = vmatpush3.bf16.msra.mxu0 %v5372_v33  ;;  %4740 = vmatprep.mubr.msk.bf16.mxu0 %vm4807_vm2, %v4805_v2 }
0x2355   : > { %4738 = vmatprep.subr.bf16.mxu0 %v4805_v2 }
0x2358   : > { %4739 = vmatpush3.bf16.msra.mxu0 %v5441_v4 }
0x2359   : > { %4750 = vmatprep.subr.bf16.mxu0 %v4805_v2 }
0x239b   : > { %v3716_v38 = vpop.xlane.xlu1 %3715 }
0x239c   : > { %vm3717_vm8 = vcmp.eq.f32.partialorder %v3714_v37, %v3716_v38  ;;  %v3722_v46 = vcvt.f32.s32 %v3716_v38 }
0x239d   : > { %v3718_v48 = vsel %vm3717_vm8, %v3713_v49, inf }
0x239e   : > { %3719 = vmin.xlane.f32.xlu1 %v3718_v48  ;;  %v3723_v51 = vshll.u32 %v3722_v46, 16 }
0x239f   : > { %v3731_v52 = vpop.xlane.xlu0 %3730 }
0x23a0   : > { %vm3732_vm9 = vcmp.eq.f32.partialorder %v3729_v58, %v3731_v52  ;;  %v3737_v15 = vcvt.f32.s32 %v3731_v52 }
0x23a1   : > { %v3733_v11 = vsel %vm3732_vm9, %v3728_v16, inf }
0x23a2   : > { %3734 = vmin.xlane.f32.xlu0 %v3733_v11  ;;  %v3738_v13 = vshll.u32 %v3737_v15, 16 }
0x2413   : > { %v3685_v42 = vpop.f32.mrf.mxu0 }
0x2414   : > { %v3686_v23 = vadd.f32 %v5510_v27, %v3685_v42 }
0x2415   : > { %v4728_v32 = vpop.f32.mrf.mxu0 }
0x2416   : > { %v3692_v39 = vmul.f32 0.2, %v3686_v23 }
0x2417   : > { %v3688_v40 = vpop.f32.mrf.mxu0 }
0x2418   : > { %v3694_v20 = vmax.f32 %v3686_v23, %v3692_v39  ;;  %v3689_v18 = vadd.f32 %v5510_v27, %v3688_v40  ;;  %v5803_v40 = vld [vmem:[%s5899_s10] ss:$0 sm:$0xff] }
0x2419   : > { %v4729_v54 = vpop.f32.mrf.mxu0 }
0x241a   : > { %v5769_v44 = vmax.f32 %v5727_v30, %v3694_v20  ;;  %v3693_v47 = vmul.f32 0.2, %v3689_v18 }
0x241c   : > { %v3695_v24 = vmax.f32 %v3689_v18, %v3693_v47 }
0x241e   : > { %v5772_v21 = vmax.f32 %v5730_v17, %v3695_v24 }
0x2427   : > { %v3720_v29 = vpop.xlane.xlu1 %3719 }
0x2428   : > { %v3721_v53 = vcvt.f32.s32 %v3720_v29 }
0x242a   : > { %v3724_v34 = vadd.s32 %v3723_v51, %v3721_v53 }
0x242b   : > { %v3735_v36 = vpop.xlane.xlu0 %3734 }
0x242c   : > { %v3736_v6 = vcvt.f32.s32 %v3735_v36  ;;  %vm3740_vm10 = vcmp.eq.s32.totalorder %v4965_v50, %v3724_v34 }
0x242d   : > { %v3846_v27 = vsel %vm3740_vm10, -1e+30, %v5734_v25  ;;  %v4331_v17 = vsel %vm3740_vm10, 1.0, %v4805_v2 }
0x242e   : > { %v3739_v30 = vadd.s32 %v3738_v13, %v3736_v6  ;;  %v3848_v45 = vsel %vm769_vm5, %v3846_v27, -inf }
0x242f   : > { %3849 = vmax.xlane.f32.xlu1 %v3848_v45 }
0x2430   : > { %vm3741_vm11 = vcmp.eq.s32.totalorder %v4965_v50, %v3739_v30 }
0x2431   : > { %v3847_v43 = vsel %vm3741_vm11, -1e+30, %v5742_v31  ;;  %v4332_v14 = vsel %vm3741_vm11, 1.0, %v4805_v2 }
0x2432   : > { %v3851_v1 = vsel %vm769_vm5, %v3847_v43, -inf  ;;  %v3746_v37 = vpack.c.bf16 %v4332_v14, %v4331_v17 }
0x2433   : > { %3852 = vmax.xlane.f32.xlu0 %v3851_v1 }
0x2434   : > { %4733 = vmatmul.mubr.msk.bf16.vlgmr.msra.gmra.mxu1 %vm769_vm5, %v3746_v37 }
0x2435   : > { %4745 = vmatpush3.bf16.msra.mxu1 %v5406_v59  ;;  %4746 = vmatprep.mubr.msk.bf16.mxu1 %vm4807_vm2, %v4805_v2 }
0x2436   : > { %4758 = vmatprep.subr.bf16.mxu1 %v4805_v2 }
0x24b8   : > { %v3850_v25 = vpop.xlane.xlu1 %3849 }
0x24b9   : > { %vm3854_vm12 = vcmp.ge.f32.partialorder %v3846_v27, %v3850_v25 }
0x24ba   : > { %v3856_v5 = vsel %vm3854_vm12, %v4965_v50, 16 }
0x24bb   : > { %v3858_v31 = vsel %vm769_vm5, %v3856_v5, 2147483647 }
0x24bc   : > { %v3860_v8 = vshra.s32 %v3858_v31, 16  ;;  %v3853_v58 = vpop.xlane.xlu0 %3852  ;;  %v3859_v48 = vand.u32 65535, %v3858_v31  ;;  %v4078_v31 = vld [vmem:[%s5902_s13 + $0x20] sm:$0x1f] }
0x24bd   : > { %vm3855_vm13 = vcmp.ge.f32.partialorder %v3847_v43, %v3853_v58 }
0x24be   : > { %v3857_v35 = vsel %vm3855_vm13, %v4965_v50, 16  ;;  %v3862_v9 = vcvt.s32.f32 %v3860_v8  ;;  %v3861_v11 = vcvt.s32.f32 %v3859_v48  ;;  %v4006_v48 = vld [vmem:[%s5900_s11 + $0x8] sm:$0xff] }
0x24bf   : > { %v3873_v10 = vsel %vm769_vm5, %v3857_v35, 2147483647  ;;  %v4081_v35 = vpack.c.bf16 %v4078_v31, %v4078_v31 }
0x24c0   : > { %v3875_v59 = vshra.s32 %v3873_v10, 16  ;;  %3863 = vmin.xlane.f32.xlu1 %v3862_v9  ;;  %v3874_v52 = vand.u32 65535, %v3873_v10  ;;  %v4095_v10 = vsel %vm4093_vm1, %v4912_v7, 0  ;;  %v4010_v7 = vld [vmem:[%s5900_s11 + $0x28] sm:$0x7] }
0x24c2   : > { %v3877_v12 = vcvt.s32.f32 %v3875_v59  ;;  %v3876_v32 = vcvt.s32.f32 %v3874_v52 }
0x24c4   : > { %3878 = vmin.xlane.f32.xlu0 %v3877_v12 }
0x24f4   : > { %v3784_v55 = vpop.f32.mrf.mxu1 }
0x24f5   : > { %v3785_v60 = vadd.f32 %v3784_v55, %v5455_v61 }
0x24f6   : > { %v4734_v56 = vpop.f32.mrf.mxu1 }
0x24f7   : > { %v3791_v63 = vmul.f32 0.2, %v3785_v60 }
0x24f8   : > { %v3787_v62 = vpop.f32.mrf.mxu1 }
0x24f9   : > { %v3788_v0 = vadd.f32 %v3787_v62, %v5459_v3  ;;  %v3793_v41 = vmax.f32 %v3785_v60, %v3791_v63  ;;  %v4097_v60 = vand.u32 %v4095_v10, %v4081_v35  ;;  %v4007_v62 = vld [vmem:[%s5900_s11 + $0x10] sm:$0xff]  ;;  %v4008_v63 = vld [vmem:[%s5900_s11 + $0x18] sm:$0xff] }
0x24fa   : > { %v4735_v22 = vpop.f32.mrf.mxu1 }
0x24fb   : > { %v3792_v57 = vmul.f32 0.2, %v3788_v0  ;;  %v4012_v22 = vpack.c.bf16 %v4008_v63, %v4007_v62 }
0x24fd   : > { %v3794_v38 = vmax.f32 %v3788_v0, %v3792_v57 }
0x24ff   : > { %v3795_v49 = vpack.c.bf16 %v3794_v38, %v3793_v41 }
0x2501   : > { %4741 = vmatmul.mubr.msk.bf16.vlgmr.msra.gmra.mxu0 %vm2610_vm15, %v3795_v49  ;;  %v4005_v49 = vld [vmem:[%s5900_s11] sm:$0xff] }
0x2502   : > { %4751 = vmatpush3.bf16.msra.mxu0 %v5372_v33  ;;  %4754 = vmatprep.mubr.msk.bf16.mxu0 %vm4807_vm2, %v4805_v2  ;;  %v4011_v52 = vpack.c.bf16 %v4006_v48, %v4005_v49 }
0x2503   : > { %4752 = vmatprep.subr.bf16.mxu0 %v4805_v2 }
0x2506   : > { %4753 = vmatpush3.bf16.msra.mxu0 %v5441_v4 }
0x2507   : > { %4768 = vmatprep.subr.bf16.mxu0 %v4805_v2 }
0x2549   : > { %v3864_v16 = vpop.xlane.xlu1 %3863 }
0x254a   : > { %vm3865_vm0 = vcmp.eq.f32.partialorder %v3862_v9, %v3864_v16  ;;  %v3870_v34 = vcvt.f32.s32 %v3864_v16 }
0x254b   : > { %v3866_v42 = vsel %vm3865_vm0, %v3861_v11, inf }
0x254c   : > { %3867 = vmin.xlane.f32.xlu1 %v3866_v42  ;;  %v3871_v13 = vshll.u32 %v3870_v34, 16  ;;  %v4339_v34 = vld [vmem:[%s5901_s12] ss:$0 sm:$0xff] }
0x254d   : > { %v3879_v23 = vpop.xlane.xlu0 %3878 }
0x254e   : > { %vm3880_vm3 = vcmp.eq.f32.partialorder %v3877_v12, %v3879_v23  ;;  %v3885_v6 = vcvt.f32.s32 %v3879_v23 }
0x254f   : > { %v3881_v33 = vsel %vm3880_vm3, %v3876_v32, inf }
0x2550   : > { %3882 = vmin.xlane.f32.xlu0 %v3881_v33  ;;  %v3886_v17 = vshll.u32 %v3885_v6, 16 }
0x25c1   : > { %v3833_v39 = vpop.f32.mrf.mxu0 }
0x25c2   : > { %v3834_v4 = vadd.f32 %v5803_v40, %v3833_v39 }
0x25c3   : > { %v4742_v20 = vpop.f32.mrf.mxu0 }
0x25c4   : > { %v3840_v18 = vmul.f32 0.2, %v3834_v4 }
0x25c5   : > { %v3836_v54 = vpop.f32.mrf.mxu0 }
0x25c6   : > { %v3842_v47 = vmax.f32 %v3834_v4, %v3840_v18  ;;  %v3837_v24 = vadd.f32 %v5803_v40, %v3836_v54 }
0x25c7   : > { %v4743_v46 = vpop.f32.mrf.mxu0 }
0x25c8   : > { %v5808_v29 = vmax.f32 %v5769_v44, %v3842_v47  ;;  %v3841_v51 = vmul.f32 0.2, %v3837_v24 }
0x25ca   : > { %v3843_v15 = vmax.f32 %v3837_v24, %v3841_v51  ;;  %v4077_v51 = vld [vmem:[%s5902_s13 + $0x18] sm:$0xff] }
0x25cc   : > { %v5811_v53 = vmax.f32 %v5772_v21, %v3843_v15 }
0x25d5   : > { %v3868_v36 = vpop.xlane.xlu1 %3867 }
0x25d6   : > { %v3869_v27 = vcvt.f32.s32 %v3868_v36 }
0x25d8   : > { %v3872_v30 = vadd.s32 %v3871_v13, %v3869_v27 }
0x25d9   : > { %v3883_v45 = vpop.xlane.xlu0 %3882 }
0x25da   : > { %v3884_v43 = vcvt.f32.s32 %v3883_v45  ;;  %vm3888_vm4 = vcmp.eq.s32.totalorder %v4965_v50, %v3872_v30 }
0x25db   : > { %v4335_v44 = vsel %vm3888_vm4, 1.0, %v4805_v2 }
0x25dc   : > { %v3887_v14 = vadd.s32 %v3886_v17, %v3884_v43 }
0x25de   : > { %vm3889_vm6 = vcmp.eq.s32.totalorder %v4965_v50, %v3887_v14 }
0x25df   : > { %v4336_v1 = vsel %vm3889_vm6, 1.0, %v4805_v2 }
0x25e0   : > { %v3894_v21 = vpack.c.bf16 %v4336_v1, %v4335_v44  ;;  %v4341_v1 = vld [vmem:[%s5903_s14] ss:$0 sm:$0xff] }
0x25e2   : > { %4747 = vmatmul.mubr.msk.bf16.vlgmr.msra.gmra.mxu1 %vm769_vm5, %v3894_v21 }
0x25e3   : > { %4764 = vmatprep.mubr.msk.bf16.mxu1 %vm4807_vm2, %v4805_v2 }
0x26a2   : > { %v3932_v37 = vpop.f32.mrf.mxu1 }
0x26a3   : > { %v3933_v25 = vadd.f32 %v3932_v37, %v5455_v61  ;;  %v4009_v61 = vld [vmem:[%s5900_s11 + $0x20] sm:$0xff] }
0x26a4   : > { %v4748_v5 = vpop.f32.mrf.mxu1 }
0x26a5   : > { %v3939_v8 = vmul.f32 0.2, %v3933_v25 }
0x26a6   : > { %v3935_v50 = vpop.f32.mrf.mxu1 }
0x26a7   : > { %v3936_v58 = vadd.f32 %v3935_v50, %v5459_v3  ;;  %v3941_v12 = vmax.f32 %v3933_v25, %v3939_v8  ;;  %v4013_v3 = vpack.c.bf16 %v4010_v7, %v4009_v61 }
0x26a8   : > { %v4749_v9 = vpop.f32.mrf.mxu1 }
0x26a9   : > { %v3940_v59 = vmul.f32 0.2, %v3936_v58  ;;  %v4026_v0 = vand.u32 %v4013_v3, %v5346_v26 }
0x26ab   : > { %v3942_v55 = vmax.f32 %v3936_v58, %v3940_v59  ;;  %4759 = vmatpush3.bf16.msra.mxu1 %v4026_v0 }
0x26ac   : > { %4760 = vmatprep.subr.bf16.mxu1 %v4805_v2 }
0x26ad   : > { %v3943_v56 = vpack.c.bf16 %v3942_v55, %v3941_v12 }
0x26af   : > { %4755 = vmatmul.mubr.msk.bf16.vlgmr.msra.gmra.mxu0 %vm2610_vm15, %v3943_v56  ;;  %4761 = vmatpush3.bf16.msra.mxu1 %v4012_v22 }
0x26b0   : > { %4769 = vmatpush3.bf16.msra.mxu0 %v4097_v60  ;;  %4774 = vmatprep.mubr.msk.bf16.mxu0 %vm4807_vm2, %v4805_v2  ;;  %vm4021_vm2 = vcmask 351232  }
0x26b1   : > { %4770 = vmatprep.subr.bf16.mxu0 %v4805_v2  ;;  %4762 = vmatprep.subr.bf16.mxu1 %v4805_v2 }
0x26b3   : > { %4763 = vmatpush3.bf16.msra.mxu1 %v4011_v52 }
0x276f   : > { %v3981_v57 = vpop.f32.mrf.mxu0 }
0x2770   : > { %v3982_v41 = vadd.f32 %v5803_v40, %v3981_v57 }
0x2771   : > { %v4756_v38 = vpop.f32.mrf.mxu0 }
0x2772   : > { %v3988_v26 = vmul.f32 0.2, %v3982_v41 }
0x2773   : > { %v3984_v16 = vpop.f32.mrf.mxu0 }
0x2774   : > { %v3985_v11 = vadd.f32 %v5803_v40, %v3984_v16  ;;  %v3990_v23 = vmax.f32 %v3982_v41, %v3988_v26 }
0x2775   : > { %v4757_v42 = vpop.f32.mrf.mxu0 }
0x2776   : > { %v3989_v32 = vmul.f32 0.2, %v3985_v11  ;;  %v3992_v39 = vmax.f32 %v5808_v29, %v3990_v23  ;;  %v4076_v29 = vld [vmem:[%s5902_s13 + $0x10] sm:$0xff] }
0x2777   : > { %v4080_v15 = vpack.c.bf16 %v4077_v51, %v4076_v29 }
0x2778   : > { %v3991_v33 = vmax.f32 %v3985_v11, %v3989_v32 }
0x2779   : > { %4771 = vmatpush3.bf16.msra.mxu0 %v4080_v15 }
0x277a   : > { %v3993_v4 = vmax.f32 %v5811_v53, %v3991_v33  ;;  %4772 = vmatprep.subr.bf16.mxu0 %v4805_v2 }
0x277c   : > { %v4790_v20 = vpack.i.bf16 %v3993_v4, %v3992_v39 }
0x277e   : > { %4791 = vrot.lane.b32.xlu1 %v4790_v20, %s4808_s22  ;;  %s4345_s22 = sshll.u32 %s5906_s19, 5 }
0x277f   : > { %s491_s25 = scalar_lea.vmem %s5904_s15, %s4345_s22 }
0x27f0   : > { %v4792_v18 = vpop.permute.xlu1 %4791 }
0x27f1   : > { %v4794_v54 = vunpack.i.h.bf16 %v4792_v18  ;;  %v4793_v47 = vunpack.i.l.bf16 %v4792_v18 }
0x27f3   : > { %v4003_v24 = vsel %vm2272_vm14, %v5362_v19, %v4794_v54  ;;  %v4002_v40 = vsel %vm2272_vm14, %v5356_v28, %v4793_v47  ;;  %v4074_v19 = vld [vmem:[%s5902_s13] sm:$0xff]  ;;  %v4075_v28 = vld [vmem:[%s5902_s13 + $0x8] sm:$0xff]  ;;  %vm4089_vm14 = vcmask 302080  }
0x27f4   : > { %v4004_v46 = vpack.c.bf16 %v4003_v24, %v4002_v40  ;;  %v4079_v53 = vpack.c.bf16 %v4075_v28, %v4074_v19 }
0x27f6   : > { %4765 = vmatmul.mubr.msk.bf16.vlgmr.msra.gmra.mxu1 %vm4021_vm2, %v4004_v46  ;;  %4773 = vmatpush3.bf16.msra.mxu0 %v4079_v53 }
0x28b6   : > { %v4062_v36 = vpop.f32.mrf.mxu1 }
0x28b7   : > { %v4063_v13 = vadd.f32 %v4339_v34, %v4062_v36 }
0x28b8   : > { %v4766_v6 = vpop.f32.mrf.mxu1 }
0x28b9   : > { %v4069_v30 = vmul.f32 0.2, %v4063_v13 }
0x28ba   : > { %v4065_v27 = vpop.f32.mrf.mxu1 }
0x28bb   : > { %v4066_v2 = vadd.f32 %v4339_v34, %v4065_v27  ;;  %v4071_v43 = vmax.f32 %v4063_v13, %v4069_v30 }
0x28bc   : > { %v4767_v45 = vpop.f32.mrf.mxu1 }
0x28bd   : > { %v4070_v17 = vmul.f32 0.2, %v4066_v2 }
0x28bf   : > { %v4072_v14 = vmax.f32 %v4066_v2, %v4070_v17 }
0x28c1   : > { %v4073_v44 = vpack.c.bf16 %v4072_v14, %v4071_v43 }
0x28c3   : > { %4775 = vmatmul.mubr.msk.bf16.vlgmr.msra.gmra.mxu0 %vm4089_vm14, %v4073_v44 }
0x2983   : > { %v4133_v21 = vpop.f32.mrf.mxu0 }
0x2984   : > { %v4134_v37 = vadd.f32 %v4341_v1, %v4133_v21 }
0x2985   : > { %v4776_v25 = vpop.f32.mrf.mxu0 }
0x2986   : > { %v4140_v5 = vmul.f32 0.2, %v4134_v37 }
0x2987   : > { %v4136_v31 = vpop.f32.mrf.mxu0 }
0x2988   : > { %v4142_v50 = vmax.f32 %v4134_v37, %v4140_v5  ;;  %v4137_v8 = vadd.f32 %v4341_v1, %v4136_v31 }
0x2989   : > { %v4777_v58 = vpop.f32.mrf.mxu0 }
0x298a   : > { %v4141_v35 = vmul.f32 0.2, %v4137_v8  ;;  %4144 = vxpose.xlu0.b32.start [1/2] (short) (narrow) %v4142_v50, 32 }
0x298c   : > { %v4143_v9 = vmax.f32 %v4137_v8, %v4141_v35 }
0x298e   : > { %4145 = vxpose.xlu0.b32.end [2/2] (short) (narrow) %v4143_v9, 32 }
0x2a06   : > { %v4160_v10 = vpop.trf.xlu0 }
0x2a07   : > { %4176 = vst.msk [vmem:[%s491_s25] sm:$0xff] %vm769_vm5, %v4160_v10 }
0x2a0a   : > { %v4161_v59 = vpop.trf.xlu0 }
0x2a0b   : > { %4177 = vst.msk [vmem:[%s491_s25 + $0x8] sm:$0xff] %vm769_vm5, %v4161_v59 }
0x2a0e   : > { %v4162_v12 = vpop.trf.xlu0 }
0x2a0f   : > { %4178 = vst.msk [vmem:[%s491_s25 + $0x10] sm:$0xff] %vm769_vm5, %v4162_v12 }
0x2a12   : > { %v4163_v55 = vpop.trf.xlu0 }
0x2a13   : > { %4179 = vst.msk [vmem:[%s491_s25 + $0x18] sm:$0xff] %vm769_vm5, %v4163_v55 }
0x2a14 PF: > { %s25_s18 = sadd.s32 1, %s4803_s18  }
0x2a15   : > { %p22_p4 = scmp.ge.s32.totalorder %s25_s18, 4  }
0x2a17   :  { %24 = sbr.rel (!%p22_p4) target bundleno = 1 (0x1), region = 110 }

</bundles_post_ra>
